<compile_context>
chip_gen: v7x
topology: tpu7x:2x2x1
jax: 0.10.0
libtpu: 0.0.40
codegen_flags: <defaults>
</compile_context>

<pallas_src>
import math

import jax
import jax.numpy as jnp
from jax.experimental import pallas as pl
from jax.experimental.pallas import tpu as pltpu

# ---------------------------- model hyper-params ----------------------------
B = 2            # batch
T = 8            # sequence length
D = 32           # hidden size
H = 4            # attention heads
DH = D // H      # head dim
F = 64           # FFN inner size
V = 64           # vocab size
VP = 128         # vocab padded to a full lane width (lane-dense logits store)
L = 2            # decoder layers
MAX_POS = 16     # positional-embedding table size
BT = B * T       # flattened (batch * seq) rows
EPS = 1e-5

QKV_W = 128          # fused QKV output width (3*D = 96 padded to 128 lanes)
ROWS_PER_LAYER = 8   # rows of the packed bias/LN slab used per layer
VEC_ROWS = 24        # L*8 + 2 final-LN rows, padded up to a multiple of 8


def _layernorm(x, g, b):
    mu = jnp.mean(x, axis=-1, keepdims=True)
    var = jnp.mean((x - mu) ** 2, axis=-1, keepdims=True)
    return (x - mu) * jax.lax.rsqrt(var + EPS) * g + b


# ------------------------------ fused Pallas kernel ------------------------------
def fused_decoder_kernel(x_ref, wqkv_ref, wo_ref, w1_ref, w2_ref,
                         vec_ref, embt_ref, o_ref):
    """Whole decoder forward (use_cache=False) on one VMEM-resident block.

    x_ref:    (B*T, D)        flattened activations
    wqkv_ref: (L, D, 128)     [Wq | Wk | Wv] per layer, lane-padded to 128
    wo_ref:   (L*H, DH, D)    per-head slices of the attention output proj
    w1_ref:   (L, D, F)       FFN up
    w2_ref:   (L, F, D)       FFN down
    vec_ref:  (VEC_ROWS, 128) packed bias/LN slab (one DMA for all vectors)
    embt_ref: (D, VP)         embed_tokens^T zero-padded to 128 lanes
    o_ref:    (B*T, VP)       logits (padded vocab, lane-dense store)
    """
    x = x_ref[...].astype(jnp.float32)
    vec = vec_ref[...]                                   # one load of the slab

    # causal mask (no-cache => full TxT lower-triangular attention per batch)
    qi = jax.lax.broadcasted_iota(jnp.int32, (T, T), 0)
    ki = jax.lax.broadcasted_iota(jnp.int32, (T, T), 1)
    causal = ki <= qi
    scale = 1.0 / math.sqrt(DH)

    # TODO(synk): replace the unrolled layer loop with lax.fori_loop (or a grid
    # axis) once L grows beyond the toy config, to bound live ranges.
    for li in range(L):
        base = li * ROWS_PER_LAYER
        ln1g = vec[base + 0:base + 1, :D]
        ln1b = vec[base + 1:base + 2, :D]
        bqkv = vec[base + 2:base + 3, :]                 # padded lanes are zero
        bo   = vec[base + 3:base + 4, :D]
        ln2g = vec[base + 4:base + 5, :D]
        ln2b = vec[base + 5:base + 6, :D]
        b1   = vec[base + 6:base + 7, :F]
        b2   = vec[base + 7:base + 8, :D]

        # ---- causal self-attention (pre-LN, full recompute: no KV cache) ----
        h = _layernorm(x, ln1g, ln1b)
        # single lane-dense fused QKV matmul per layer (both batch elements)
        qkv = jnp.dot(h, wqkv_ref[li],
                      preferred_element_type=jnp.float32) + bqkv   # (BT, 128)

        attn = jnp.zeros((BT, D), jnp.float32)
        for hd in range(H):
            # static lane slices of the fused QKV result
            q = qkv[:, hd * DH:(hd + 1) * DH]                       # (BT, DH)
            k = qkv[:, D + hd * DH:D + (hd + 1) * DH]
            v = qkv[:, 2 * D + hd * DH:2 * D + (hd + 1) * DH]
            o_parts = []
            for b in range(B):
                rows = slice(b * T, (b + 1) * T)        # static sublane slice
                s = jnp.einsum('qd,kd->qk', q[rows], k[rows],
                               preferred_element_type=jnp.float32) * scale
                s = jnp.where(causal, s, -1e30)
                s = s - jnp.max(s, axis=-1, keepdims=True)
                p = jnp.exp(s)
                denom = jnp.sum(p, axis=-1, keepdims=True)
                r = pl.reciprocal(denom, approx=True)
                r = r * (2.0 - denom * r)               # one Newton step
                p = p * r
                o_parts.append(jnp.dot(p, v[rows],
                                       preferred_element_type=jnp.float32))
            # stack both batches along sublanes -> ONE Wo dot per head
            o_h = jnp.concatenate(o_parts, axis=0)                  # (BT, DH)
            attn = attn + jnp.dot(o_h, wo_ref[li * H + hd],
                                  preferred_element_type=jnp.float32)
        x = x + attn + bo

        # ---- FFN block (pre-LN, ReLU) ----
        h2 = _layernorm(x, ln2g, ln2b)
        f = jnp.dot(h2, w1_ref[li], preferred_element_type=jnp.float32) + b1
        f = jnp.maximum(f, 0.0)
        f = jnp.dot(f, w2_ref[li], preferred_element_type=jnp.float32) + b2
        x = x + f

    # ---- final LayerNorm + tied output projection (lane-dense padded vocab) ----
    fg = vec[L * ROWS_PER_LAYER:L * ROWS_PER_LAYER + 1, :D]
    fb = vec[L * ROWS_PER_LAYER + 1:L * ROWS_PER_LAYER + 2, :D]
    hf = _layernorm(x, fg, fb)
    o_ref[...] = jnp.dot(hf, embt_ref[...],
                         preferred_element_type=jnp.float32).astype(o_ref.dtype)


# ------------------------------ pallas wrappers ------------------------------
def _full(shape):
    # whole array as one VMEM block; grid=(1,) => index_map returns zeros
    return pl.BlockSpec(shape, lambda i, _n=len(shape): (0,) * _n)


def _pad_row(v, width=128):
    """(1, n) row zero-padded to (1, width)."""
    return jnp.zeros((1, width), jnp.float32).at[:, :v.shape[1]].set(v)


def _pack_params(params):
    """Wrapper-side layout plumbing (free):
      * fuse Wq|Wk|Wv into one lane-dense (L, D, 128) slab,
      * keep per-head Wo slices (L*H, DH, D),
      * coalesce ALL bias / LayerNorm vectors into one (VEC_ROWS, 128) slab,
      * pre-transpose + lane-pad the tied embedding."""
    layers = params["layers"]

    wqkv = jnp.zeros((L, D, QKV_W), jnp.float32)
    vec_rows = []
    for li, lp in enumerate(layers):
        w_cat = jnp.concatenate([lp["wq"], lp["wk"], lp["wv"]], axis=1)  # (D, 3D)
        wqkv = wqkv.at[li, :, :3 * D].set(w_cat)
        b_cat = jnp.concatenate([lp["bq"], lp["bk"], lp["bv"]], axis=1)  # (1, 3D)
        vec_rows += [
            _pad_row(lp["ln1_g"]), _pad_row(lp["ln1_b"]),
            _pad_row(b_cat),
            _pad_row(lp["bo"]),
            _pad_row(lp["ln2_g"]), _pad_row(lp["ln2_b"]),
            _pad_row(lp["b1"]), _pad_row(lp["b2"]),
        ]
    vec_rows += [_pad_row(params["final_ln_g"]), _pad_row(params["final_ln_b"])]
    vec = jnp.concatenate(vec_rows, axis=0)                       # (L*8+2, 128)
    vec = jnp.zeros((VEC_ROWS, 128), jnp.float32).at[:vec.shape[0]].set(vec)

    wo = jnp.concatenate([lp["wo"].reshape(H, DH, D) for lp in layers], axis=0)
    w1 = jnp.stack([lp["w1"] for lp in layers], axis=0)            # (L, D, F)
    w2 = jnp.stack([lp["w2"] for lp in layers], axis=0)            # (L, F, D)

    emb_t = jnp.zeros((D, VP), jnp.float32).at[:, :V].set(params["embed_tokens"].T)
    return wqkv, wo, w1, w2, vec, emb_t


def decoder_no_cache_forward(tokens, params):
    """Equivalent of DecoderNoCacheWrapper.forward(tokens): decoder(tokens, use_cache=False)."""
    emb = params["embed_tokens"]
    pos = params["embed_positions"]
    # TODO(synk): embedding gather + position add kept in the wrapper (gather is
    # not a Pallas TPU hot path); everything downstream runs in one fused kernel.
    # TODO(synk): fairseq LearnedPositionalEmbedding padding_idx offset omitted.
    x = (emb[tokens] * math.sqrt(D) + pos[:T][None, :, :]).astype(jnp.float32)
    x = x.reshape(BT, D)

    wqkv, wo, w1, w2, vec, emb_t = _pack_params(params)

    in_specs = [
        _full((BT, D)),            # activations
        _full((L, D, QKV_W)),      # fused QKV weights (lane-padded)
        _full((L * H, DH, D)),     # per-head Wo slices
        _full((L, D, F)),          # FFN up
        _full((L, F, D)),          # FFN down
        _full((VEC_ROWS, 128)),    # coalesced bias / LayerNorm slab
        _full((D, VP)),            # embed_tokens^T (lane-padded)
    ]

    logits_p = pl.pallas_call(
        fused_decoder_kernel,
        out_shape=jax.ShapeDtypeStruct((BT, VP), jnp.float32),
        grid=(1,),
        in_specs=in_specs,
        out_specs=_full((BT, VP)),
        compiler_params=pltpu.CompilerParams(dimension_semantics=("arbitrary",)),
    )(x, wqkv, wo, w1, w2, vec, emb_t)

    return logits_p.reshape(B, T, VP)[:, :, :V]


# ------------------------------ pure-JAX reference ------------------------------
def _ref_forward(tokens, params):
    x = params["embed_tokens"][tokens] * math.sqrt(D) + params["embed_positions"][:T][None]
    x = x.astype(jnp.float32)
    causal = jnp.arange(T)[None, :] <= jnp.arange(T)[:, None]
    for lp in params["layers"]:
        h = _layernorm(x, lp["ln1_g"], lp["ln1_b"])
        q = h @ lp["wq"] + lp["bq"]
        k = h @ lp["wk"] + lp["bk"]
        v = h @ lp["wv"] + lp["bv"]
        qh = q.reshape(B, T, H, DH).transpose(0, 2, 1, 3)
        kh = k.reshape(B, T, H, DH).transpose(0, 2, 1, 3)
        vh = v.reshape(B, T, H, DH).transpose(0, 2, 1, 3)
        s = jnp.einsum('bhqd,bhkd->bhqk', qh, kh) / math.sqrt(DH)
        s = jnp.where(causal[None, None], s, -1e30)
        p = jax.nn.softmax(s, axis=-1)
        a = jnp.einsum('bhqk,bhkd->bhqd', p, vh).transpose(0, 2, 1, 3).reshape(B, T, D)
        x = x + a @ lp["wo"] + lp["bo"]
        h2 = _layernorm(x, lp["ln2_g"], lp["ln2_b"])
        f = jnp.maximum(h2 @ lp["w1"] + lp["b1"], 0.0) @ lp["w2"] + lp["b2"]
        x = x + f
    hf = _layernorm(x, params["final_ln_g"], params["final_ln_b"])
    return jnp.einsum('btd,vd->btv', hf, params["embed_tokens"])


# ------------------------------ parameter init ------------------------------
def init_params(key):
    def nrm(k, shape, scale=0.02):
        return jax.random.normal(k, shape, dtype=jnp.float32) * scale

    keys = jax.random.split(key, 4 + L)
    params = {
        "embed_tokens": nrm(keys[0], (V, D)),
        "embed_positions": nrm(keys[1], (MAX_POS, D)),
        "final_ln_g": 1.0 + nrm(keys[2], (1, D)),
        "final_ln_b": nrm(keys[3], (1, D)),
        "layers": [],
    }
    for li in range(L):
        ks = jax.random.split(keys[4 + li], 16)
        params["layers"].append({
            "ln1_g": 1.0 + nrm(ks[0], (1, D)),
            "ln1_b": nrm(ks[1], (1, D)),
            "wq": nrm(ks[2], (D, D)), "bq": nrm(ks[3], (1, D)),
            "wk": nrm(ks[4], (D, D)), "bk": nrm(ks[5], (1, D)),
            "wv": nrm(ks[6], (D, D)), "bv": nrm(ks[7], (1, D)),
            "wo": nrm(ks[8], (D, D)), "bo": nrm(ks[9], (1, D)),
            "ln2_g": 1.0 + nrm(ks[10], (1, D)),
            "ln2_b": nrm(ks[11], (1, D)),
            "w1": nrm(ks[12], (D, F)), "b1": nrm(ks[13], (1, F)),
            "w2": nrm(ks[14], (F, D)), "b2": nrm(ks[15], (1, D)),
        })
    return params


if __name__ == "__main__":
    key = jax.random.PRNGKey(0)
    pkey, tkey = jax.random.split(key)
    params = init_params(pkey)
    tokens = jax.random.randint(tkey, (B, T), 0, V, dtype=jnp.int32)

    fwd = jax.jit(decoder_no_cache_forward)
    logits = jax.block_until_ready(fwd(tokens, params))
    assert logits.shape == (B, T, V), logits.shape

    ref = jax.block_until_ready(_ref_forward(tokens, params))
    max_err = float(jnp.max(jnp.abs(logits - ref)))
    assert jnp.allclose(logits, ref, atol=5e-3, rtol=5e-3), max_err

    # TODO(synk): fairseq encoder cross-attention / incremental_state plumbing
    # is omitted; the wrapper semantics reproduced here are use_cache=False,
    # i.e. full causal recompute on every call.
    print("KERNEL_OK")
</pallas_src>

<mosaic_0001>
module attributes {stable_mosaic.version = 11 : i64} {
  func.func @fused_decoder_kernel(%arg0: i32, %arg1: memref<16x32xf32, #tpu.memory_space<vmem>>, %arg2: memref<2x32x128xf32, #tpu.memory_space<vmem>>, %arg3: memref<8x8x32xf32, #tpu.memory_space<vmem>>, %arg4: memref<2x32x64xf32, #tpu.memory_space<vmem>>, %arg5: memref<2x64x32xf32, #tpu.memory_space<vmem>>, %arg6: memref<24x128xf32, #tpu.memory_space<vmem>>, %arg7: memref<32x128xf32, #tpu.memory_space<vmem>>, %arg8: memref<16x128xf32, #tpu.memory_space<vmem>>) attributes {dimension_semantics = [#tpu.dimension_semantics<arbitrary>], iteration_bounds = array<i64: 1>, scalar_prefetch = 0 : i64, scratch_operands = 0 : i64, tpu.core_type = #tpu.core_type<tc>, window_params = [{pipeline_mode = #tpu.pipeline_mode<synchronous>, transform_indices = @transform_0, window_bounds = array<i64: 16, 32>}, {pipeline_mode = #tpu.pipeline_mode<synchronous>, transform_indices = @transform_1, window_bounds = array<i64: 2, 32, 128>}, {pipeline_mode = #tpu.pipeline_mode<synchronous>, transform_indices = @transform_2, window_bounds = array<i64: 8, 8, 32>}, {pipeline_mode = #tpu.pipeline_mode<synchronous>, transform_indices = @transform_3, window_bounds = array<i64: 2, 32, 64>}, {pipeline_mode = #tpu.pipeline_mode<synchronous>, transform_indices = @transform_4, window_bounds = array<i64: 2, 64, 32>}, {pipeline_mode = #tpu.pipeline_mode<synchronous>, transform_indices = @transform_5, window_bounds = array<i64: 24, 128>}, {pipeline_mode = #tpu.pipeline_mode<synchronous>, transform_indices = @transform_6, window_bounds = array<i64: 32, 128>}, {pipeline_mode = #tpu.pipeline_mode<synchronous>, transform_indices = @transform_7, window_bounds = array<i64: 16, 128>}]} {
    %c0 = arith.constant 0 : index
    %c0_0 = arith.constant 0 : index
    %0 = vector.load %arg1[%c0, %c0_0] : memref<16x32xf32, #tpu.memory_space<vmem>>, vector<16x32xf32>
    %c0_1 = arith.constant 0 : index
    %c0_2 = arith.constant 0 : index
    %1 = vector.load %arg6[%c0_1, %c0_2] : memref<24x128xf32, #tpu.memory_space<vmem>>, vector<24x128xf32>
    %2 = tpu.iota {dimensions = array<i32: 0>} : vector<8x8xi32>
    %3 = tpu.iota {dimensions = array<i32: 1>} : vector<8x8xi32>
    %4 = arith.cmpi sle, %3, %2 : vector<8x8xi32>
    %5 = vector.extract_strided_slice %1 {offsets = [0, 0], sizes = [1, 32], strides = [1, 1]} : vector<24x128xf32> to vector<1x32xf32>
    %6 = vector.extract_strided_slice %1 {offsets = [1, 0], sizes = [1, 32], strides = [1, 1]} : vector<24x128xf32> to vector<1x32xf32>
    %7 = vector.extract_strided_slice %1 {offsets = [2, 0], sizes = [1, 128], strides = [1, 1]} : vector<24x128xf32> to vector<1x128xf32>
    %8 = vector.extract_strided_slice %1 {offsets = [3, 0], sizes = [1, 32], strides = [1, 1]} : vector<24x128xf32> to vector<1x32xf32>
    %9 = vector.extract_strided_slice %1 {offsets = [4, 0], sizes = [1, 32], strides = [1, 1]} : vector<24x128xf32> to vector<1x32xf32>
    %10 = vector.extract_strided_slice %1 {offsets = [5, 0], sizes = [1, 32], strides = [1, 1]} : vector<24x128xf32> to vector<1x32xf32>
    %11 = vector.extract_strided_slice %1 {offsets = [6, 0], sizes = [1, 64], strides = [1, 1]} : vector<24x128xf32> to vector<1x64xf32>
    %12 = vector.extract_strided_slice %1 {offsets = [7, 0], sizes = [1, 32], strides = [1, 1]} : vector<24x128xf32> to vector<1x32xf32>
    %cst = arith.constant dense<0.000000e+00> : vector<16xf32>
    %13 = vector.multi_reduction <add>, %0, %cst [1] : vector<16x32xf32> to vector<16xf32>
    %14 = vector.shape_cast %13 : vector<16xf32> to vector<16x1xf32>
    %cst_3 = arith.constant 3.200000e+01 : f32
    %15 = vector.broadcast %cst_3 : f32 to vector<16x1xf32>
    %16 = arith.divf %14, %15 : vector<16x1xf32>
    %17 = vector.broadcast %16 : vector<16x1xf32> to vector<16x32xf32>
    %18 = arith.subf %0, %17 : vector<16x32xf32>
    %19 = arith.mulf %18, %18 : vector<16x32xf32>
    %cst_4 = arith.constant dense<0.000000e+00> : vector<16xf32>
    %20 = vector.multi_reduction <add>, %19, %cst_4 [1] : vector<16x32xf32> to vector<16xf32>
    %21 = vector.shape_cast %20 : vector<16xf32> to vector<16x1xf32>
    %cst_5 = arith.constant 3.200000e+01 : f32
    %22 = vector.broadcast %cst_5 : f32 to vector<16x1xf32>
    %23 = arith.divf %21, %22 : vector<16x1xf32>
    %24 = vector.broadcast %16 : vector<16x1xf32> to vector<16x32xf32>
    %25 = arith.subf %0, %24 : vector<16x32xf32>
    %cst_6 = arith.constant 9.99999974E-6 : f32
    %26 = vector.broadcast %cst_6 : f32 to vector<16x1xf32>
    %27 = arith.addf %23, %26 : vector<16x1xf32>
    %28 = math.rsqrt %27 : vector<16x1xf32>
    %29 = vector.broadcast %28 : vector<16x1xf32> to vector<16x32xf32>
    %30 = arith.mulf %25, %29 : vector<16x32xf32>
    %31 = vector.broadcast %5 : vector<1x32xf32> to vector<16x32xf32>
    %32 = arith.mulf %30, %31 : vector<16x32xf32>
    %33 = vector.broadcast %6 : vector<1x32xf32> to vector<16x32xf32>
    %34 = arith.addf %32, %33 : vector<16x32xf32>
    %c0_7 = arith.constant 0 : index
    %c0_8 = arith.constant 0 : index
    %c0_9 = arith.constant 0 : index
    %35 = vector.load %arg2[%c0_7, %c0_8, %c0_9] : memref<2x32x128xf32, #tpu.memory_space<vmem>>, vector<1x32x128xf32>
    %36 = vector.shape_cast %35 : vector<1x32x128xf32> to vector<32x128xf32>
    %cst_10 = arith.constant dense<0.000000e+00> : vector<16x128xf32>
    %37 = tpu.matmul %34, %36, %cst_10 {dimension_numbers = #tpu.dot_dimension_numbers<[1], [0], [0], [1], [0, 0, 1, 1], [], []>} : vector<16x32xf32>, vector<32x128xf32>, vector<16x128xf32> -> vector<16x128xf32>
    %38 = vector.broadcast %7 : vector<1x128xf32> to vector<16x128xf32>
    %39 = arith.addf %37, %38 : vector<16x128xf32>
    %cst_11 = arith.constant 0.000000e+00 : f32
    %40 = vector.broadcast %cst_11 : f32 to vector<16x32xf32>
    %41 = vector.extract_strided_slice %39 {offsets = [0, 0], sizes = [16, 8], strides = [1, 1]} : vector<16x128xf32> to vector<16x8xf32>
    %42 = vector.extract_strided_slice %39 {offsets = [0, 32], sizes = [16, 8], strides = [1, 1]} : vector<16x128xf32> to vector<16x8xf32>
    %43 = vector.extract_strided_slice %39 {offsets = [0, 64], sizes = [16, 8], strides = [1, 1]} : vector<16x128xf32> to vector<16x8xf32>
    %44 = vector.extract_strided_slice %41 {offsets = [0, 0], sizes = [8, 8], strides = [1, 1]} : vector<16x8xf32> to vector<8x8xf32>
    %45 = vector.extract_strided_slice %42 {offsets = [0, 0], sizes = [8, 8], strides = [1, 1]} : vector<16x8xf32> to vector<8x8xf32>
    "tpu.trace_start"() <{level = 10 : i32, message = "qd,kd->qk"}> : () -> ()
    %cst_12 = arith.constant dense<0.000000e+00> : vector<8x8xf32>
    %46 = tpu.matmul %44, %45, %cst_12 {dimension_numbers = #tpu.dot_dimension_numbers<[1], [1], [0], [0], [0, 0, 1, 0], [], []>} : vector<8x8xf32>, vector<8x8xf32>, vector<8x8xf32> -> vector<8x8xf32>
    "tpu.trace_stop"() : () -> ()
    %cst_13 = arith.constant 0.353553385 : f32
    %47 = vector.broadcast %cst_13 : f32 to vector<8x8xf32>
    %48 = arith.mulf %46, %47 : vector<8x8xf32>
    %cst_14 = arith.constant -1.000000e+30 : f32
    %49 = vector.broadcast %cst_14 : f32 to vector<8x8xf32>
    %50 = arith.select %4, %48, %49 : vector<8x8xi1>, vector<8x8xf32>
    %cst_15 = arith.constant dense<0xFF800000> : vector<8xf32>
    %51 = vector.multi_reduction <maximumf>, %50, %cst_15 [1] : vector<8x8xf32> to vector<8xf32>
    %52 = vector.shape_cast %51 : vector<8xf32> to vector<8x1xf32>
    %53 = vector.broadcast %52 : vector<8x1xf32> to vector<8x8xf32>
    %54 = arith.subf %50, %53 : vector<8x8xf32>
    %55 = math.exp %54 : vector<8x8xf32>
    %cst_16 = arith.constant dense<0.000000e+00> : vector<8xf32>
    %56 = vector.multi_reduction <add>, %55, %cst_16 [1] : vector<8x8xf32> to vector<8xf32>
    %57 = vector.shape_cast %56 : vector<8xf32> to vector<8x1xf32>
    %58 = tpu.reciprocal %57 {approx = true} : vector<8x1xf32> -> vector<8x1xf32>
    %59 = arith.mulf %57, %58 : vector<8x1xf32>
    %cst_17 = arith.constant 2.000000e+00 : f32
    %60 = vector.broadcast %cst_17 : f32 to vector<8x1xf32>
    %61 = arith.subf %60, %59 : vector<8x1xf32>
    %62 = arith.mulf %58, %61 : vector<8x1xf32>
    %63 = vector.broadcast %62 : vector<8x1xf32> to vector<8x8xf32>
    %64 = arith.mulf %55, %63 : vector<8x8xf32>
    %65 = vector.extract_strided_slice %43 {offsets = [0, 0], sizes = [8, 8], strides = [1, 1]} : vector<16x8xf32> to vector<8x8xf32>
    %cst_18 = arith.constant dense<0.000000e+00> : vector<8x8xf32>
    %66 = tpu.matmul %64, %65, %cst_18 {dimension_numbers = #tpu.dot_dimension_numbers<[1], [0], [0], [1], [0, 0, 1, 1], [], []>} : vector<8x8xf32>, vector<8x8xf32>, vector<8x8xf32> -> vector<8x8xf32>
    %67 = vector.extract_strided_slice %41 {offsets = [8, 0], sizes = [8, 8], strides = [1, 1]} : vector<16x8xf32> to vector<8x8xf32>
    %68 = vector.extract_strided_slice %42 {offsets = [8, 0], sizes = [8, 8], strides = [1, 1]} : vector<16x8xf32> to vector<8x8xf32>
    "tpu.trace_start"() <{level = 10 : i32, message = "qd,kd->qk"}> : () -> ()
    %cst_19 = arith.constant dense<0.000000e+00> : vector<8x8xf32>
    %69 = tpu.matmul %67, %68, %cst_19 {dimension_numbers = #tpu.dot_dimension_numbers<[1], [1], [0], [0], [0, 0, 1, 0], [], []>} : vector<8x8xf32>, vector<8x8xf32>, vector<8x8xf32> -> vector<8x8xf32>
    "tpu.trace_stop"() : () -> ()
    %cst_20 = arith.constant 0.353553385 : f32
    %70 = vector.broadcast %cst_20 : f32 to vector<8x8xf32>
    %71 = arith.mulf %69, %70 : vector<8x8xf32>
    %cst_21 = arith.constant -1.000000e+30 : f32
    %72 = vector.broadcast %cst_21 : f32 to vector<8x8xf32>
    %73 = arith.select %4, %71, %72 : vector<8x8xi1>, vector<8x8xf32>
    %cst_22 = arith.constant dense<0xFF800000> : vector<8xf32>
    %74 = vector.multi_reduction <maximumf>, %73, %cst_22 [1] : vector<8x8xf32> to vector<8xf32>
    %75 = vector.shape_cast %74 : vector<8xf32> to vector<8x1xf32>
    %76 = vector.broadcast %75 : vector<8x1xf32> to vector<8x8xf32>
    %77 = arith.subf %73, %76 : vector<8x8xf32>
    %78 = math.exp %77 : vector<8x8xf32>
    %cst_23 = arith.constant dense<0.000000e+00> : vector<8xf32>
    %79 = vector.multi_reduction <add>, %78, %cst_23 [1] : vector<8x8xf32> to vector<8xf32>
    %80 = vector.shape_cast %79 : vector<8xf32> to vector<8x1xf32>
    %81 = tpu.reciprocal %80 {approx = true} : vector<8x1xf32> -> vector<8x1xf32>
    %82 = arith.mulf %80, %81 : vector<8x1xf32>
    %cst_24 = arith.constant 2.000000e+00 : f32
    %83 = vector.broadcast %cst_24 : f32 to vector<8x1xf32>
    %84 = arith.subf %83, %82 : vector<8x1xf32>
    %85 = arith.mulf %81, %84 : vector<8x1xf32>
    %86 = vector.broadcast %85 : vector<8x1xf32> to vector<8x8xf32>
    %87 = arith.mulf %78, %86 : vector<8x8xf32>
    %88 = vector.extract_strided_slice %43 {offsets = [8, 0], sizes = [8, 8], strides = [1, 1]} : vector<16x8xf32> to vector<8x8xf32>
    %cst_25 = arith.constant dense<0.000000e+00> : vector<8x8xf32>
    %89 = tpu.matmul %87, %88, %cst_25 {dimension_numbers = #tpu.dot_dimension_numbers<[1], [0], [0], [1], [0, 0, 1, 1], [], []>} : vector<8x8xf32>, vector<8x8xf32>, vector<8x8xf32> -> vector<8x8xf32>
    %90 = tpu.concatenate %66, %89 in 0 : vector<8x8xf32>, vector<8x8xf32> -> vector<16x8xf32>
    %c0_26 = arith.constant 0 : index
    %c0_27 = arith.constant 0 : index
    %c0_28 = arith.constant 0 : index
    %91 = vector.load %arg3[%c0_26, %c0_27, %c0_28] : memref<8x8x32xf32, #tpu.memory_space<vmem>>, vector<1x8x32xf32>
    %92 = vector.shape_cast %91 : vector<1x8x32xf32> to vector<8x32xf32>
    %cst_29 = arith.constant dense<0.000000e+00> : vector<16x32xf32>
    %93 = tpu.matmul %90, %92, %cst_29 {dimension_numbers = #tpu.dot_dimension_numbers<[1], [0], [0], [1], [0, 0, 1, 1], [], []>} : vector<16x8xf32>, vector<8x32xf32>, vector<16x32xf32> -> vector<16x32xf32>
    %94 = arith.addf %40, %93 : vector<16x32xf32>
    %95 = vector.extract_strided_slice %39 {offsets = [0, 8], sizes = [16, 8], strides = [1, 1]} : vector<16x128xf32> to vector<16x8xf32>
    %96 = vector.extract_strided_slice %39 {offsets = [0, 40], sizes = [16, 8], strides = [1, 1]} : vector<16x128xf32> to vector<16x8xf32>
    %97 = vector.extract_strided_slice %39 {offsets = [0, 72], sizes = [16, 8], strides = [1, 1]} : vector<16x128xf32> to vector<16x8xf32>
    %98 = vector.extract_strided_slice %95 {offsets = [0, 0], sizes = [8, 8], strides = [1, 1]} : vector<16x8xf32> to vector<8x8xf32>
    %99 = vector.extract_strided_slice %96 {offsets = [0, 0], sizes = [8, 8], strides = [1, 1]} : vector<16x8xf32> to vector<8x8xf32>
    "tpu.trace_start"() <{level = 10 : i32, message = "qd,kd->qk"}> : () -> ()
    %cst_30 = arith.constant dense<0.000000e+00> : vector<8x8xf32>
    %100 = tpu.matmul %98, %99, %cst_30 {dimension_numbers = #tpu.dot_dimension_numbers<[1], [1], [0], [0], [0, 0, 1, 0], [], []>} : vector<8x8xf32>, vector<8x8xf32>, vector<8x8xf32> -> vector<8x8xf32>
    "tpu.trace_stop"() : () -> ()
    %cst_31 = arith.constant 0.353553385 : f32
    %101 = vector.broadcast %cst_31 : f32 to vector<8x8xf32>
    %102 = arith.mulf %100, %101 : vector<8x8xf32>
    %cst_32 = arith.constant -1.000000e+30 : f32
    %103 = vector.broadcast %cst_32 : f32 to vector<8x8xf32>
    %104 = arith.select %4, %102, %103 : vector<8x8xi1>, vector<8x8xf32>
    %cst_33 = arith.constant dense<0xFF800000> : vector<8xf32>
    %105 = vector.multi_reduction <maximumf>, %104, %cst_33 [1] : vector<8x8xf32> to vector<8xf32>
    %106 = vector.shape_cast %105 : vector<8xf32> to vector<8x1xf32>
    %107 = vector.broadcast %106 : vector<8x1xf32> to vector<8x8xf32>
    %108 = arith.subf %104, %107 : vector<8x8xf32>
    %109 = math.exp %108 : vector<8x8xf32>
    %cst_34 = arith.constant dense<0.000000e+00> : vector<8xf32>
    %110 = vector.multi_reduction <add>, %109, %cst_34 [1] : vector<8x8xf32> to vector<8xf32>
    %111 = vector.shape_cast %110 : vector<8xf32> to vector<8x1xf32>
    %112 = tpu.reciprocal %111 {approx = true} : vector<8x1xf32> -> vector<8x1xf32>
    %113 = arith.mulf %111, %112 : vector<8x1xf32>
    %cst_35 = arith.constant 2.000000e+00 : f32
    %114 = vector.broadcast %cst_35 : f32 to vector<8x1xf32>
    %115 = arith.subf %114, %113 : vector<8x1xf32>
    %116 = arith.mulf %112, %115 : vector<8x1xf32>
    %117 = vector.broadcast %116 : vector<8x1xf32> to vector<8x8xf32>
    %118 = arith.mulf %109, %117 : vector<8x8xf32>
    %119 = vector.extract_strided_slice %97 {offsets = [0, 0], sizes = [8, 8], strides = [1, 1]} : vector<16x8xf32> to vector<8x8xf32>
    %cst_36 = arith.constant dense<0.000000e+00> : vector<8x8xf32>
    %120 = tpu.matmul %118, %119, %cst_36 {dimension_numbers = #tpu.dot_dimension_numbers<[1], [0], [0], [1], [0, 0, 1, 1], [], []>} : vector<8x8xf32>, vector<8x8xf32>, vector<8x8xf32> -> vector<8x8xf32>
    %121 = vector.extract_strided_slice %95 {offsets = [8, 0], sizes = [8, 8], strides = [1, 1]} : vector<16x8xf32> to vector<8x8xf32>
    %122 = vector.extract_strided_slice %96 {offsets = [8, 0], sizes = [8, 8], strides = [1, 1]} : vector<16x8xf32> to vector<8x8xf32>
    "tpu.trace_start"() <{level = 10 : i32, message = "qd,kd->qk"}> : () -> ()
    %cst_37 = arith.constant dense<0.000000e+00> : vector<8x8xf32>
    %123 = tpu.matmul %121, %122, %cst_37 {dimension_numbers = #tpu.dot_dimension_numbers<[1], [1], [0], [0], [0, 0, 1, 0], [], []>} : vector<8x8xf32>, vector<8x8xf32>, vector<8x8xf32> -> vector<8x8xf32>
    "tpu.trace_stop"() : () -> ()
    %cst_38 = arith.constant 0.353553385 : f32
    %124 = vector.broadcast %cst_38 : f32 to vector<8x8xf32>
    %125 = arith.mulf %123, %124 : vector<8x8xf32>
    %cst_39 = arith.constant -1.000000e+30 : f32
    %126 = vector.broadcast %cst_39 : f32 to vector<8x8xf32>
    %127 = arith.select %4, %125, %126 : vector<8x8xi1>, vector<8x8xf32>
    %cst_40 = arith.constant dense<0xFF800000> : vector<8xf32>
    %128 = vector.multi_reduction <maximumf>, %127, %cst_40 [1] : vector<8x8xf32> to vector<8xf32>
    %129 = vector.shape_cast %128 : vector<8xf32> to vector<8x1xf32>
    %130 = vector.broadcast %129 : vector<8x1xf32> to vector<8x8xf32>
    %131 = arith.subf %127, %130 : vector<8x8xf32>
    %132 = math.exp %131 : vector<8x8xf32>
    %cst_41 = arith.constant dense<0.000000e+00> : vector<8xf32>
    %133 = vector.multi_reduction <add>, %132, %cst_41 [1] : vector<8x8xf32> to vector<8xf32>
    %134 = vector.shape_cast %133 : vector<8xf32> to vector<8x1xf32>
    %135 = tpu.reciprocal %134 {approx = true} : vector<8x1xf32> -> vector<8x1xf32>
    %136 = arith.mulf %134, %135 : vector<8x1xf32>
    %cst_42 = arith.constant 2.000000e+00 : f32
    %137 = vector.broadcast %cst_42 : f32 to vector<8x1xf32>
    %138 = arith.subf %137, %136 : vector<8x1xf32>
    %139 = arith.mulf %135, %138 : vector<8x1xf32>
    %140 = vector.broadcast %139 : vector<8x1xf32> to vector<8x8xf32>
    %141 = arith.mulf %132, %140 : vector<8x8xf32>
    %142 = vector.extract_strided_slice %97 {offsets = [8, 0], sizes = [8, 8], strides = [1, 1]} : vector<16x8xf32> to vector<8x8xf32>
    %cst_43 = arith.constant dense<0.000000e+00> : vector<8x8xf32>
    %143 = tpu.matmul %141, %142, %cst_43 {dimension_numbers = #tpu.dot_dimension_numbers<[1], [0], [0], [1], [0, 0, 1, 1], [], []>} : vector<8x8xf32>, vector<8x8xf32>, vector<8x8xf32> -> vector<8x8xf32>
    %144 = tpu.concatenate %120, %143 in 0 : vector<8x8xf32>, vector<8x8xf32> -> vector<16x8xf32>
    %c1 = arith.constant 1 : index
    %c0_44 = arith.constant 0 : index
    %c0_45 = arith.constant 0 : index
    %145 = vector.load %arg3[%c1, %c0_44, %c0_45] : memref<8x8x32xf32, #tpu.memory_space<vmem>>, vector<1x8x32xf32>
    %146 = vector.shape_cast %145 : vector<1x8x32xf32> to vector<8x32xf32>
    %cst_46 = arith.constant dense<0.000000e+00> : vector<16x32xf32>
    %147 = tpu.matmul %144, %146, %cst_46 {dimension_numbers = #tpu.dot_dimension_numbers<[1], [0], [0], [1], [0, 0, 1, 1], [], []>} : vector<16x8xf32>, vector<8x32xf32>, vector<16x32xf32> -> vector<16x32xf32>
    %148 = arith.addf %94, %147 : vector<16x32xf32>
    %149 = vector.extract_strided_slice %39 {offsets = [0, 16], sizes = [16, 8], strides = [1, 1]} : vector<16x128xf32> to vector<16x8xf32>
    %150 = vector.extract_strided_slice %39 {offsets = [0, 48], sizes = [16, 8], strides = [1, 1]} : vector<16x128xf32> to vector<16x8xf32>
    %151 = vector.extract_strided_slice %39 {offsets = [0, 80], sizes = [16, 8], strides = [1, 1]} : vector<16x128xf32> to vector<16x8xf32>
    %152 = vector.extract_strided_slice %149 {offsets = [0, 0], sizes = [8, 8], strides = [1, 1]} : vector<16x8xf32> to vector<8x8xf32>
    %153 = vector.extract_strided_slice %150 {offsets = [0, 0], sizes = [8, 8], strides = [1, 1]} : vector<16x8xf32> to vector<8x8xf32>
    "tpu.trace_start"() <{level = 10 : i32, message = "qd,kd->qk"}> : () -> ()
    %cst_47 = arith.constant dense<0.000000e+00> : vector<8x8xf32>
    %154 = tpu.matmul %152, %153, %cst_47 {dimension_numbers = #tpu.dot_dimension_numbers<[1], [1], [0], [0], [0, 0, 1, 0], [], []>} : vector<8x8xf32>, vector<8x8xf32>, vector<8x8xf32> -> vector<8x8xf32>
    "tpu.trace_stop"() : () -> ()
    %cst_48 = arith.constant 0.353553385 : f32
    %155 = vector.broadcast %cst_48 : f32 to vector<8x8xf32>
    %156 = arith.mulf %154, %155 : vector<8x8xf32>
    %cst_49 = arith.constant -1.000000e+30 : f32
    %157 = vector.broadcast %cst_49 : f32 to vector<8x8xf32>
    %158 = arith.select %4, %156, %157 : vector<8x8xi1>, vector<8x8xf32>
    %cst_50 = arith.constant dense<0xFF800000> : vector<8xf32>
    %159 = vector.multi_reduction <maximumf>, %158, %cst_50 [1] : vector<8x8xf32> to vector<8xf32>
    %160 = vector.shape_cast %159 : vector<8xf32> to vector<8x1xf32>
    %161 = vector.broadcast %160 : vector<8x1xf32> to vector<8x8xf32>
    %162 = arith.subf %158, %161 : vector<8x8xf32>
    %163 = math.exp %162 : vector<8x8xf32>
    %cst_51 = arith.constant dense<0.000000e+00> : vector<8xf32>
    %164 = vector.multi_reduction <add>, %163, %cst_51 [1] : vector<8x8xf32> to vector<8xf32>
    %165 = vector.shape_cast %164 : vector<8xf32> to vector<8x1xf32>
    %166 = tpu.reciprocal %165 {approx = true} : vector<8x1xf32> -> vector<8x1xf32>
    %167 = arith.mulf %165, %166 : vector<8x1xf32>
    %cst_52 = arith.constant 2.000000e+00 : f32
    %168 = vector.broadcast %cst_52 : f32 to vector<8x1xf32>
    %169 = arith.subf %168, %167 : vector<8x1xf32>
    %170 = arith.mulf %166, %169 : vector<8x1xf32>
    %171 = vector.broadcast %170 : vector<8x1xf32> to vector<8x8xf32>
    %172 = arith.mulf %163, %171 : vector<8x8xf32>
    %173 = vector.extract_strided_slice %151 {offsets = [0, 0], sizes = [8, 8], strides = [1, 1]} : vector<16x8xf32> to vector<8x8xf32>
    %cst_53 = arith.constant dense<0.000000e+00> : vector<8x8xf32>
    %174 = tpu.matmul %172, %173, %cst_53 {dimension_numbers = #tpu.dot_dimension_numbers<[1], [0], [0], [1], [0, 0, 1, 1], [], []>} : vector<8x8xf32>, vector<8x8xf32>, vector<8x8xf32> -> vector<8x8xf32>
    %175 = vector.extract_strided_slice %149 {offsets = [8, 0], sizes = [8, 8], strides = [1, 1]} : vector<16x8xf32> to vector<8x8xf32>
    %176 = vector.extract_strided_slice %150 {offsets = [8, 0], sizes = [8, 8], strides = [1, 1]} : vector<16x8xf32> to vector<8x8xf32>
    "tpu.trace_start"() <{level = 10 : i32, message = "qd,kd->qk"}> : () -> ()
    %cst_54 = arith.constant dense<0.000000e+00> : vector<8x8xf32>
    %177 = tpu.matmul %175, %176, %cst_54 {dimension_numbers = #tpu.dot_dimension_numbers<[1], [1], [0], [0], [0, 0, 1, 0], [], []>} : vector<8x8xf32>, vector<8x8xf32>, vector<8x8xf32> -> vector<8x8xf32>
    "tpu.trace_stop"() : () -> ()
    %cst_55 = arith.constant 0.353553385 : f32
    %178 = vector.broadcast %cst_55 : f32 to vector<8x8xf32>
    %179 = arith.mulf %177, %178 : vector<8x8xf32>
    %cst_56 = arith.constant -1.000000e+30 : f32
    %180 = vector.broadcast %cst_56 : f32 to vector<8x8xf32>
    %181 = arith.select %4, %179, %180 : vector<8x8xi1>, vector<8x8xf32>
    %cst_57 = arith.constant dense<0xFF800000> : vector<8xf32>
    %182 = vector.multi_reduction <maximumf>, %181, %cst_57 [1] : vector<8x8xf32> to vector<8xf32>
    %183 = vector.shape_cast %182 : vector<8xf32> to vector<8x1xf32>
    %184 = vector.broadcast %183 : vector<8x1xf32> to vector<8x8xf32>
    %185 = arith.subf %181, %184 : vector<8x8xf32>
    %186 = math.exp %185 : vector<8x8xf32>
    %cst_58 = arith.constant dense<0.000000e+00> : vector<8xf32>
    %187 = vector.multi_reduction <add>, %186, %cst_58 [1] : vector<8x8xf32> to vector<8xf32>
    %188 = vector.shape_cast %187 : vector<8xf32> to vector<8x1xf32>
    %189 = tpu.reciprocal %188 {approx = true} : vector<8x1xf32> -> vector<8x1xf32>
    %190 = arith.mulf %188, %189 : vector<8x1xf32>
    %cst_59 = arith.constant 2.000000e+00 : f32
    %191 = vector.broadcast %cst_59 : f32 to vector<8x1xf32>
    %192 = arith.subf %191, %190 : vector<8x1xf32>
    %193 = arith.mulf %189, %192 : vector<8x1xf32>
    %194 = vector.broadcast %193 : vector<8x1xf32> to vector<8x8xf32>
    %195 = arith.mulf %186, %194 : vector<8x8xf32>
    %196 = vector.extract_strided_slice %151 {offsets = [8, 0], sizes = [8, 8], strides = [1, 1]} : vector<16x8xf32> to vector<8x8xf32>
    %cst_60 = arith.constant dense<0.000000e+00> : vector<8x8xf32>
    %197 = tpu.matmul %195, %196, %cst_60 {dimension_numbers = #tpu.dot_dimension_numbers<[1], [0], [0], [1], [0, 0, 1, 1], [], []>} : vector<8x8xf32>, vector<8x8xf32>, vector<8x8xf32> -> vector<8x8xf32>
    %198 = tpu.concatenate %174, %197 in 0 : vector<8x8xf32>, vector<8x8xf32> -> vector<16x8xf32>
    %c2 = arith.constant 2 : index
    %c0_61 = arith.constant 0 : index
    %c0_62 = arith.constant 0 : index
    %199 = vector.load %arg3[%c2, %c0_61, %c0_62] : memref<8x8x32xf32, #tpu.memory_space<vmem>>, vector<1x8x32xf32>
    %200 = vector.shape_cast %199 : vector<1x8x32xf32> to vector<8x32xf32>
    %cst_63 = arith.constant dense<0.000000e+00> : vector<16x32xf32>
    %201 = tpu.matmul %198, %200, %cst_63 {dimension_numbers = #tpu.dot_dimension_numbers<[1], [0], [0], [1], [0, 0, 1, 1], [], []>} : vector<16x8xf32>, vector<8x32xf32>, vector<16x32xf32> -> vector<16x32xf32>
    %202 = arith.addf %148, %201 : vector<16x32xf32>
    %203 = vector.extract_strided_slice %39 {offsets = [0, 24], sizes = [16, 8], strides = [1, 1]} : vector<16x128xf32> to vector<16x8xf32>
    %204 = vector.extract_strided_slice %39 {offsets = [0, 56], sizes = [16, 8], strides = [1, 1]} : vector<16x128xf32> to vector<16x8xf32>
    %205 = vector.extract_strided_slice %39 {offsets = [0, 88], sizes = [16, 8], strides = [1, 1]} : vector<16x128xf32> to vector<16x8xf32>
    %206 = vector.extract_strided_slice %203 {offsets = [0, 0], sizes = [8, 8], strides = [1, 1]} : vector<16x8xf32> to vector<8x8xf32>
    %207 = vector.extract_strided_slice %204 {offsets = [0, 0], sizes = [8, 8], strides = [1, 1]} : vector<16x8xf32> to vector<8x8xf32>
    "tpu.trace_start"() <{level = 10 : i32, message = "qd,kd->qk"}> : () -> ()
    %cst_64 = arith.constant dense<0.000000e+00> : vector<8x8xf32>
    %208 = tpu.matmul %206, %207, %cst_64 {dimension_numbers = #tpu.dot_dimension_numbers<[1], [1], [0], [0], [0, 0, 1, 0], [], []>} : vector<8x8xf32>, vector<8x8xf32>, vector<8x8xf32> -> vector<8x8xf32>
    "tpu.trace_stop"() : () -> ()
    %cst_65 = arith.constant 0.353553385 : f32
    %209 = vector.broadcast %cst_65 : f32 to vector<8x8xf32>
    %210 = arith.mulf %208, %209 : vector<8x8xf32>
    %cst_66 = arith.constant -1.000000e+30 : f32
    %211 = vector.broadcast %cst_66 : f32 to vector<8x8xf32>
    %212 = arith.select %4, %210, %211 : vector<8x8xi1>, vector<8x8xf32>
    %cst_67 = arith.constant dense<0xFF800000> : vector<8xf32>
    %213 = vector.multi_reduction <maximumf>, %212, %cst_67 [1] : vector<8x8xf32> to vector<8xf32>
    %214 = vector.shape_cast %213 : vector<8xf32> to vector<8x1xf32>
    %215 = vector.broadcast %214 : vector<8x1xf32> to vector<8x8xf32>
    %216 = arith.subf %212, %215 : vector<8x8xf32>
    %217 = math.exp %216 : vector<8x8xf32>
    %cst_68 = arith.constant dense<0.000000e+00> : vector<8xf32>
    %218 = vector.multi_reduction <add>, %217, %cst_68 [1] : vector<8x8xf32> to vector<8xf32>
    %219 = vector.shape_cast %218 : vector<8xf32> to vector<8x1xf32>
    %220 = tpu.reciprocal %219 {approx = true} : vector<8x1xf32> -> vector<8x1xf32>
    %221 = arith.mulf %219, %220 : vector<8x1xf32>
    %cst_69 = arith.constant 2.000000e+00 : f32
    %222 = vector.broadcast %cst_69 : f32 to vector<8x1xf32>
    %223 = arith.subf %222, %221 : vector<8x1xf32>
    %224 = arith.mulf %220, %223 : vector<8x1xf32>
    %225 = vector.broadcast %224 : vector<8x1xf32> to vector<8x8xf32>
    %226 = arith.mulf %217, %225 : vector<8x8xf32>
    %227 = vector.extract_strided_slice %205 {offsets = [0, 0], sizes = [8, 8], strides = [1, 1]} : vector<16x8xf32> to vector<8x8xf32>
    %cst_70 = arith.constant dense<0.000000e+00> : vector<8x8xf32>
    %228 = tpu.matmul %226, %227, %cst_70 {dimension_numbers = #tpu.dot_dimension_numbers<[1], [0], [0], [1], [0, 0, 1, 1], [], []>} : vector<8x8xf32>, vector<8x8xf32>, vector<8x8xf32> -> vector<8x8xf32>
    %229 = vector.extract_strided_slice %203 {offsets = [8, 0], sizes = [8, 8], strides = [1, 1]} : vector<16x8xf32> to vector<8x8xf32>
    %230 = vector.extract_strided_slice %204 {offsets = [8, 0], sizes = [8, 8], strides = [1, 1]} : vector<16x8xf32> to vector<8x8xf32>
    "tpu.trace_start"() <{level = 10 : i32, message = "qd,kd->qk"}> : () -> ()
    %cst_71 = arith.constant dense<0.000000e+00> : vector<8x8xf32>
    %231 = tpu.matmul %229, %230, %cst_71 {dimension_numbers = #tpu.dot_dimension_numbers<[1], [1], [0], [0], [0, 0, 1, 0], [], []>} : vector<8x8xf32>, vector<8x8xf32>, vector<8x8xf32> -> vector<8x8xf32>
    "tpu.trace_stop"() : () -> ()
    %cst_72 = arith.constant 0.353553385 : f32
    %232 = vector.broadcast %cst_72 : f32 to vector<8x8xf32>
    %233 = arith.mulf %231, %232 : vector<8x8xf32>
    %cst_73 = arith.constant -1.000000e+30 : f32
    %234 = vector.broadcast %cst_73 : f32 to vector<8x8xf32>
    %235 = arith.select %4, %233, %234 : vector<8x8xi1>, vector<8x8xf32>
    %cst_74 = arith.constant dense<0xFF800000> : vector<8xf32>
    %236 = vector.multi_reduction <maximumf>, %235, %cst_74 [1] : vector<8x8xf32> to vector<8xf32>
    %237 = vector.shape_cast %236 : vector<8xf32> to vector<8x1xf32>
    %238 = vector.broadcast %237 : vector<8x1xf32> to vector<8x8xf32>
    %239 = arith.subf %235, %238 : vector<8x8xf32>
    %240 = math.exp %239 : vector<8x8xf32>
    %cst_75 = arith.constant dense<0.000000e+00> : vector<8xf32>
    %241 = vector.multi_reduction <add>, %240, %cst_75 [1] : vector<8x8xf32> to vector<8xf32>
    %242 = vector.shape_cast %241 : vector<8xf32> to vector<8x1xf32>
    %243 = tpu.reciprocal %242 {approx = true} : vector<8x1xf32> -> vector<8x1xf32>
    %244 = arith.mulf %242, %243 : vector<8x1xf32>
    %cst_76 = arith.constant 2.000000e+00 : f32
    %245 = vector.broadcast %cst_76 : f32 to vector<8x1xf32>
    %246 = arith.subf %245, %244 : vector<8x1xf32>
    %247 = arith.mulf %243, %246 : vector<8x1xf32>
    %248 = vector.broadcast %247 : vector<8x1xf32> to vector<8x8xf32>
    %249 = arith.mulf %240, %248 : vector<8x8xf32>
    %250 = vector.extract_strided_slice %205 {offsets = [8, 0], sizes = [8, 8], strides = [1, 1]} : vector<16x8xf32> to vector<8x8xf32>
    %cst_77 = arith.constant dense<0.000000e+00> : vector<8x8xf32>
    %251 = tpu.matmul %249, %250, %cst_77 {dimension_numbers = #tpu.dot_dimension_numbers<[1], [0], [0], [1], [0, 0, 1, 1], [], []>} : vector<8x8xf32>, vector<8x8xf32>, vector<8x8xf32> -> vector<8x8xf32>
    %252 = tpu.concatenate %228, %251 in 0 : vector<8x8xf32>, vector<8x8xf32> -> vector<16x8xf32>
    %c3 = arith.constant 3 : index
    %c0_78 = arith.constant 0 : index
    %c0_79 = arith.constant 0 : index
    %253 = vector.load %arg3[%c3, %c0_78, %c0_79] : memref<8x8x32xf32, #tpu.memory_space<vmem>>, vector<1x8x32xf32>
    %254 = vector.shape_cast %253 : vector<1x8x32xf32> to vector<8x32xf32>
    %cst_80 = arith.constant dense<0.000000e+00> : vector<16x32xf32>
    %255 = tpu.matmul %252, %254, %cst_80 {dimension_numbers = #tpu.dot_dimension_numbers<[1], [0], [0], [1], [0, 0, 1, 1], [], []>} : vector<16x8xf32>, vector<8x32xf32>, vector<16x32xf32> -> vector<16x32xf32>
    %256 = arith.addf %202, %255 : vector<16x32xf32>
    %257 = arith.addf %0, %256 : vector<16x32xf32>
    %258 = vector.broadcast %8 : vector<1x32xf32> to vector<16x32xf32>
    %259 = arith.addf %257, %258 : vector<16x32xf32>
    %cst_81 = arith.constant dense<0.000000e+00> : vector<16xf32>
    %260 = vector.multi_reduction <add>, %259, %cst_81 [1] : vector<16x32xf32> to vector<16xf32>
    %261 = vector.shape_cast %260 : vector<16xf32> to vector<16x1xf32>
    %cst_82 = arith.constant 3.200000e+01 : f32
    %262 = vector.broadcast %cst_82 : f32 to vector<16x1xf32>
    %263 = arith.divf %261, %262 : vector<16x1xf32>
    %264 = vector.broadcast %263 : vector<16x1xf32> to vector<16x32xf32>
    %265 = arith.subf %259, %264 : vector<16x32xf32>
    %266 = arith.mulf %265, %265 : vector<16x32xf32>
    %cst_83 = arith.constant dense<0.000000e+00> : vector<16xf32>
    %267 = vector.multi_reduction <add>, %266, %cst_83 [1] : vector<16x32xf32> to vector<16xf32>
    %268 = vector.shape_cast %267 : vector<16xf32> to vector<16x1xf32>
    %cst_84 = arith.constant 3.200000e+01 : f32
    %269 = vector.broadcast %cst_84 : f32 to vector<16x1xf32>
    %270 = arith.divf %268, %269 : vector<16x1xf32>
    %271 = vector.broadcast %263 : vector<16x1xf32> to vector<16x32xf32>
    %272 = arith.subf %259, %271 : vector<16x32xf32>
    %cst_85 = arith.constant 9.99999974E-6 : f32
    %273 = vector.broadcast %cst_85 : f32 to vector<16x1xf32>
    %274 = arith.addf %270, %273 : vector<16x1xf32>
    %275 = math.rsqrt %274 : vector<16x1xf32>
    %276 = vector.broadcast %275 : vector<16x1xf32> to vector<16x32xf32>
    %277 = arith.mulf %272, %276 : vector<16x32xf32>
    %278 = vector.broadcast %9 : vector<1x32xf32> to vector<16x32xf32>
    %279 = arith.mulf %277, %278 : vector<16x32xf32>
    %280 = vector.broadcast %10 : vector<1x32xf32> to vector<16x32xf32>
    %281 = arith.addf %279, %280 : vector<16x32xf32>
    %c0_86 = arith.constant 0 : index
    %c0_87 = arith.constant 0 : index
    %c0_88 = arith.constant 0 : index
    %282 = vector.load %arg4[%c0_86, %c0_87, %c0_88] : memref<2x32x64xf32, #tpu.memory_space<vmem>>, vector<1x32x64xf32>
    %283 = vector.shape_cast %282 : vector<1x32x64xf32> to vector<32x64xf32>
    %cst_89 = arith.constant dense<0.000000e+00> : vector<16x64xf32>
    %284 = tpu.matmul %281, %283, %cst_89 {dimension_numbers = #tpu.dot_dimension_numbers<[1], [0], [0], [1], [0, 0, 1, 1], [], []>} : vector<16x32xf32>, vector<32x64xf32>, vector<16x64xf32> -> vector<16x64xf32>
    %285 = vector.broadcast %11 : vector<1x64xf32> to vector<16x64xf32>
    %286 = arith.addf %284, %285 : vector<16x64xf32>
    %cst_90 = arith.constant 0.000000e+00 : f32
    %287 = vector.broadcast %cst_90 : f32 to vector<16x64xf32>
    %288 = arith.maximumf %286, %287 : vector<16x64xf32>
    %c0_91 = arith.constant 0 : index
    %c0_92 = arith.constant 0 : index
    %c0_93 = arith.constant 0 : index
    %289 = vector.load %arg5[%c0_91, %c0_92, %c0_93] : memref<2x64x32xf32, #tpu.memory_space<vmem>>, vector<1x64x32xf32>
    %290 = vector.shape_cast %289 : vector<1x64x32xf32> to vector<64x32xf32>
    %cst_94 = arith.constant dense<0.000000e+00> : vector<16x32xf32>
    %291 = tpu.matmul %288, %290, %cst_94 {dimension_numbers = #tpu.dot_dimension_numbers<[1], [0], [0], [1], [0, 0, 1, 1], [], []>} : vector<16x64xf32>, vector<64x32xf32>, vector<16x32xf32> -> vector<16x32xf32>
    %292 = vector.broadcast %12 : vector<1x32xf32> to vector<16x32xf32>
    %293 = arith.addf %291, %292 : vector<16x32xf32>
    %294 = arith.addf %259, %293 : vector<16x32xf32>
    %295 = vector.extract_strided_slice %1 {offsets = [8, 0], sizes = [1, 32], strides = [1, 1]} : vector<24x128xf32> to vector<1x32xf32>
    %296 = vector.extract_strided_slice %1 {offsets = [9, 0], sizes = [1, 32], strides = [1, 1]} : vector<24x128xf32> to vector<1x32xf32>
    %297 = vector.extract_strided_slice %1 {offsets = [10, 0], sizes = [1, 128], strides = [1, 1]} : vector<24x128xf32> to vector<1x128xf32>
    %298 = vector.extract_strided_slice %1 {offsets = [11, 0], sizes = [1, 32], strides = [1, 1]} : vector<24x128xf32> to vector<1x32xf32>
    %299 = vector.extract_strided_slice %1 {offsets = [12, 0], sizes = [1, 32], strides = [1, 1]} : vector<24x128xf32> to vector<1x32xf32>
    %300 = vector.extract_strided_slice %1 {offsets = [13, 0], sizes = [1, 32], strides = [1, 1]} : vector<24x128xf32> to vector<1x32xf32>
    %301 = vector.extract_strided_slice %1 {offsets = [14, 0], sizes = [1, 64], strides = [1, 1]} : vector<24x128xf32> to vector<1x64xf32>
    %302 = vector.extract_strided_slice %1 {offsets = [15, 0], sizes = [1, 32], strides = [1, 1]} : vector<24x128xf32> to vector<1x32xf32>
    %cst_95 = arith.constant dense<0.000000e+00> : vector<16xf32>
    %303 = vector.multi_reduction <add>, %294, %cst_95 [1] : vector<16x32xf32> to vector<16xf32>
    %304 = vector.shape_cast %303 : vector<16xf32> to vector<16x1xf32>
    %cst_96 = arith.constant 3.200000e+01 : f32
    %305 = vector.broadcast %cst_96 : f32 to vector<16x1xf32>
    %306 = arith.divf %304, %305 : vector<16x1xf32>
    %307 = vector.broadcast %306 : vector<16x1xf32> to vector<16x32xf32>
    %308 = arith.subf %294, %307 : vector<16x32xf32>
    %309 = arith.mulf %308, %308 : vector<16x32xf32>
    %cst_97 = arith.constant dense<0.000000e+00> : vector<16xf32>
    %310 = vector.multi_reduction <add>, %309, %cst_97 [1] : vector<16x32xf32> to vector<16xf32>
    %311 = vector.shape_cast %310 : vector<16xf32> to vector<16x1xf32>
    %cst_98 = arith.constant 3.200000e+01 : f32
    %312 = vector.broadcast %cst_98 : f32 to vector<16x1xf32>
    %313 = arith.divf %311, %312 : vector<16x1xf32>
    %314 = vector.broadcast %306 : vector<16x1xf32> to vector<16x32xf32>
    %315 = arith.subf %294, %314 : vector<16x32xf32>
    %cst_99 = arith.constant 9.99999974E-6 : f32
    %316 = vector.broadcast %cst_99 : f32 to vector<16x1xf32>
    %317 = arith.addf %313, %316 : vector<16x1xf32>
    %318 = math.rsqrt %317 : vector<16x1xf32>
    %319 = vector.broadcast %318 : vector<16x1xf32> to vector<16x32xf32>
    %320 = arith.mulf %315, %319 : vector<16x32xf32>
    %321 = vector.broadcast %295 : vector<1x32xf32> to vector<16x32xf32>
    %322 = arith.mulf %320, %321 : vector<16x32xf32>
    %323 = vector.broadcast %296 : vector<1x32xf32> to vector<16x32xf32>
    %324 = arith.addf %322, %323 : vector<16x32xf32>
    %c1_100 = arith.constant 1 : index
    %c0_101 = arith.constant 0 : index
    %c0_102 = arith.constant 0 : index
    %325 = vector.load %arg2[%c1_100, %c0_101, %c0_102] : memref<2x32x128xf32, #tpu.memory_space<vmem>>, vector<1x32x128xf32>
    %326 = vector.shape_cast %325 : vector<1x32x128xf32> to vector<32x128xf32>
    %cst_103 = arith.constant dense<0.000000e+00> : vector<16x128xf32>
    %327 = tpu.matmul %324, %326, %cst_103 {dimension_numbers = #tpu.dot_dimension_numbers<[1], [0], [0], [1], [0, 0, 1, 1], [], []>} : vector<16x32xf32>, vector<32x128xf32>, vector<16x128xf32> -> vector<16x128xf32>
    %328 = vector.broadcast %297 : vector<1x128xf32> to vector<16x128xf32>
    %329 = arith.addf %327, %328 : vector<16x128xf32>
    %cst_104 = arith.constant 0.000000e+00 : f32
    %330 = vector.broadcast %cst_104 : f32 to vector<16x32xf32>
    %331 = vector.extract_strided_slice %329 {offsets = [0, 0], sizes = [16, 8], strides = [1, 1]} : vector<16x128xf32> to vector<16x8xf32>
    %332 = vector.extract_strided_slice %329 {offsets = [0, 32], sizes = [16, 8], strides = [1, 1]} : vector<16x128xf32> to vector<16x8xf32>
    %333 = vector.extract_strided_slice %329 {offsets = [0, 64], sizes = [16, 8], strides = [1, 1]} : vector<16x128xf32> to vector<16x8xf32>
    %334 = vector.extract_strided_slice %331 {offsets = [0, 0], sizes = [8, 8], strides = [1, 1]} : vector<16x8xf32> to vector<8x8xf32>
    %335 = vector.extract_strided_slice %332 {offsets = [0, 0], sizes = [8, 8], strides = [1, 1]} : vector<16x8xf32> to vector<8x8xf32>
    "tpu.trace_start"() <{level = 10 : i32, message = "qd,kd->qk"}> : () -> ()
    %cst_105 = arith.constant dense<0.000000e+00> : vector<8x8xf32>
    %336 = tpu.matmul %334, %335, %cst_105 {dimension_numbers = #tpu.dot_dimension_numbers<[1], [1], [0], [0], [0, 0, 1, 0], [], []>} : vector<8x8xf32>, vector<8x8xf32>, vector<8x8xf32> -> vector<8x8xf32>
    "tpu.trace_stop"() : () -> ()
    %cst_106 = arith.constant 0.353553385 : f32
    %337 = vector.broadcast %cst_106 : f32 to vector<8x8xf32>
    %338 = arith.mulf %336, %337 : vector<8x8xf32>
    %cst_107 = arith.constant -1.000000e+30 : f32
    %339 = vector.broadcast %cst_107 : f32 to vector<8x8xf32>
    %340 = arith.select %4, %338, %339 : vector<8x8xi1>, vector<8x8xf32>
    %cst_108 = arith.constant dense<0xFF800000> : vector<8xf32>
    %341 = vector.multi_reduction <maximumf>, %340, %cst_108 [1] : vector<8x8xf32> to vector<8xf32>
    %342 = vector.shape_cast %341 : vector<8xf32> to vector<8x1xf32>
    %343 = vector.broadcast %342 : vector<8x1xf32> to vector<8x8xf32>
    %344 = arith.subf %340, %343 : vector<8x8xf32>
    %345 = math.exp %344 : vector<8x8xf32>
    %cst_109 = arith.constant dense<0.000000e+00> : vector<8xf32>
    %346 = vector.multi_reduction <add>, %345, %cst_109 [1] : vector<8x8xf32> to vector<8xf32>
    %347 = vector.shape_cast %346 : vector<8xf32> to vector<8x1xf32>
    %348 = tpu.reciprocal %347 {approx = true} : vector<8x1xf32> -> vector<8x1xf32>
    %349 = arith.mulf %347, %348 : vector<8x1xf32>
    %cst_110 = arith.constant 2.000000e+00 : f32
    %350 = vector.broadcast %cst_110 : f32 to vector<8x1xf32>
    %351 = arith.subf %350, %349 : vector<8x1xf32>
    %352 = arith.mulf %348, %351 : vector<8x1xf32>
    %353 = vector.broadcast %352 : vector<8x1xf32> to vector<8x8xf32>
    %354 = arith.mulf %345, %353 : vector<8x8xf32>
    %355 = vector.extract_strided_slice %333 {offsets = [0, 0], sizes = [8, 8], strides = [1, 1]} : vector<16x8xf32> to vector<8x8xf32>
    %cst_111 = arith.constant dense<0.000000e+00> : vector<8x8xf32>
    %356 = tpu.matmul %354, %355, %cst_111 {dimension_numbers = #tpu.dot_dimension_numbers<[1], [0], [0], [1], [0, 0, 1, 1], [], []>} : vector<8x8xf32>, vector<8x8xf32>, vector<8x8xf32> -> vector<8x8xf32>
    %357 = vector.extract_strided_slice %331 {offsets = [8, 0], sizes = [8, 8], strides = [1, 1]} : vector<16x8xf32> to vector<8x8xf32>
    %358 = vector.extract_strided_slice %332 {offsets = [8, 0], sizes = [8, 8], strides = [1, 1]} : vector<16x8xf32> to vector<8x8xf32>
    "tpu.trace_start"() <{level = 10 : i32, message = "qd,kd->qk"}> : () -> ()
    %cst_112 = arith.constant dense<0.000000e+00> : vector<8x8xf32>
    %359 = tpu.matmul %357, %358, %cst_112 {dimension_numbers = #tpu.dot_dimension_numbers<[1], [1], [0], [0], [0, 0, 1, 0], [], []>} : vector<8x8xf32>, vector<8x8xf32>, vector<8x8xf32> -> vector<8x8xf32>
    "tpu.trace_stop"() : () -> ()
    %cst_113 = arith.constant 0.353553385 : f32
    %360 = vector.broadcast %cst_113 : f32 to vector<8x8xf32>
    %361 = arith.mulf %359, %360 : vector<8x8xf32>
    %cst_114 = arith.constant -1.000000e+30 : f32
    %362 = vector.broadcast %cst_114 : f32 to vector<8x8xf32>
    %363 = arith.select %4, %361, %362 : vector<8x8xi1>, vector<8x8xf32>
    %cst_115 = arith.constant dense<0xFF800000> : vector<8xf32>
    %364 = vector.multi_reduction <maximumf>, %363, %cst_115 [1] : vector<8x8xf32> to vector<8xf32>
    %365 = vector.shape_cast %364 : vector<8xf32> to vector<8x1xf32>
    %366 = vector.broadcast %365 : vector<8x1xf32> to vector<8x8xf32>
    %367 = arith.subf %363, %366 : vector<8x8xf32>
    %368 = math.exp %367 : vector<8x8xf32>
    %cst_116 = arith.constant dense<0.000000e+00> : vector<8xf32>
    %369 = vector.multi_reduction <add>, %368, %cst_116 [1] : vector<8x8xf32> to vector<8xf32>
    %370 = vector.shape_cast %369 : vector<8xf32> to vector<8x1xf32>
    %371 = tpu.reciprocal %370 {approx = true} : vector<8x1xf32> -> vector<8x1xf32>
    %372 = arith.mulf %370, %371 : vector<8x1xf32>
    %cst_117 = arith.constant 2.000000e+00 : f32
    %373 = vector.broadcast %cst_117 : f32 to vector<8x1xf32>
    %374 = arith.subf %373, %372 : vector<8x1xf32>
    %375 = arith.mulf %371, %374 : vector<8x1xf32>
    %376 = vector.broadcast %375 : vector<8x1xf32> to vector<8x8xf32>
    %377 = arith.mulf %368, %376 : vector<8x8xf32>
    %378 = vector.extract_strided_slice %333 {offsets = [8, 0], sizes = [8, 8], strides = [1, 1]} : vector<16x8xf32> to vector<8x8xf32>
    %cst_118 = arith.constant dense<0.000000e+00> : vector<8x8xf32>
    %379 = tpu.matmul %377, %378, %cst_118 {dimension_numbers = #tpu.dot_dimension_numbers<[1], [0], [0], [1], [0, 0, 1, 1], [], []>} : vector<8x8xf32>, vector<8x8xf32>, vector<8x8xf32> -> vector<8x8xf32>
    %380 = tpu.concatenate %356, %379 in 0 : vector<8x8xf32>, vector<8x8xf32> -> vector<16x8xf32>
    %c4 = arith.constant 4 : index
    %c0_119 = arith.constant 0 : index
    %c0_120 = arith.constant 0 : index
    %381 = vector.load %arg3[%c4, %c0_119, %c0_120] : memref<8x8x32xf32, #tpu.memory_space<vmem>>, vector<1x8x32xf32>
    %382 = vector.shape_cast %381 : vector<1x8x32xf32> to vector<8x32xf32>
    %cst_121 = arith.constant dense<0.000000e+00> : vector<16x32xf32>
    %383 = tpu.matmul %380, %382, %cst_121 {dimension_numbers = #tpu.dot_dimension_numbers<[1], [0], [0], [1], [0, 0, 1, 1], [], []>} : vector<16x8xf32>, vector<8x32xf32>, vector<16x32xf32> -> vector<16x32xf32>
    %384 = arith.addf %330, %383 : vector<16x32xf32>
    %385 = vector.extract_strided_slice %329 {offsets = [0, 8], sizes = [16, 8], strides = [1, 1]} : vector<16x128xf32> to vector<16x8xf32>
    %386 = vector.extract_strided_slice %329 {offsets = [0, 40], sizes = [16, 8], strides = [1, 1]} : vector<16x128xf32> to vector<16x8xf32>
    %387 = vector.extract_strided_slice %329 {offsets = [0, 72], sizes = [16, 8], strides = [1, 1]} : vector<16x128xf32> to vector<16x8xf32>
    %388 = vector.extract_strided_slice %385 {offsets = [0, 0], sizes = [8, 8], strides = [1, 1]} : vector<16x8xf32> to vector<8x8xf32>
    %389 = vector.extract_strided_slice %386 {offsets = [0, 0], sizes = [8, 8], strides = [1, 1]} : vector<16x8xf32> to vector<8x8xf32>
    "tpu.trace_start"() <{level = 10 : i32, message = "qd,kd->qk"}> : () -> ()
    %cst_122 = arith.constant dense<0.000000e+00> : vector<8x8xf32>
    %390 = tpu.matmul %388, %389, %cst_122 {dimension_numbers = #tpu.dot_dimension_numbers<[1], [1], [0], [0], [0, 0, 1, 0], [], []>} : vector<8x8xf32>, vector<8x8xf32>, vector<8x8xf32> -> vector<8x8xf32>
    "tpu.trace_stop"() : () -> ()
    %cst_123 = arith.constant 0.353553385 : f32
    %391 = vector.broadcast %cst_123 : f32 to vector<8x8xf32>
    %392 = arith.mulf %390, %391 : vector<8x8xf32>
    %cst_124 = arith.constant -1.000000e+30 : f32
    %393 = vector.broadcast %cst_124 : f32 to vector<8x8xf32>
    %394 = arith.select %4, %392, %393 : vector<8x8xi1>, vector<8x8xf32>
    %cst_125 = arith.constant dense<0xFF800000> : vector<8xf32>
    %395 = vector.multi_reduction <maximumf>, %394, %cst_125 [1] : vector<8x8xf32> to vector<8xf32>
    %396 = vector.shape_cast %395 : vector<8xf32> to vector<8x1xf32>
    %397 = vector.broadcast %396 : vector<8x1xf32> to vector<8x8xf32>
    %398 = arith.subf %394, %397 : vector<8x8xf32>
    %399 = math.exp %398 : vector<8x8xf32>
    %cst_126 = arith.constant dense<0.000000e+00> : vector<8xf32>
    %400 = vector.multi_reduction <add>, %399, %cst_126 [1] : vector<8x8xf32> to vector<8xf32>
    %401 = vector.shape_cast %400 : vector<8xf32> to vector<8x1xf32>
    %402 = tpu.reciprocal %401 {approx = true} : vector<8x1xf32> -> vector<8x1xf32>
    %403 = arith.mulf %401, %402 : vector<8x1xf32>
    %cst_127 = arith.constant 2.000000e+00 : f32
    %404 = vector.broadcast %cst_127 : f32 to vector<8x1xf32>
    %405 = arith.subf %404, %403 : vector<8x1xf32>
    %406 = arith.mulf %402, %405 : vector<8x1xf32>
    %407 = vector.broadcast %406 : vector<8x1xf32> to vector<8x8xf32>
    %408 = arith.mulf %399, %407 : vector<8x8xf32>
    %409 = vector.extract_strided_slice %387 {offsets = [0, 0], sizes = [8, 8], strides = [1, 1]} : vector<16x8xf32> to vector<8x8xf32>
    %cst_128 = arith.constant dense<0.000000e+00> : vector<8x8xf32>
    %410 = tpu.matmul %408, %409, %cst_128 {dimension_numbers = #tpu.dot_dimension_numbers<[1], [0], [0], [1], [0, 0, 1, 1], [], []>} : vector<8x8xf32>, vector<8x8xf32>, vector<8x8xf32> -> vector<8x8xf32>
    %411 = vector.extract_strided_slice %385 {offsets = [8, 0], sizes = [8, 8], strides = [1, 1]} : vector<16x8xf32> to vector<8x8xf32>
    %412 = vector.extract_strided_slice %386 {offsets = [8, 0], sizes = [8, 8], strides = [1, 1]} : vector<16x8xf32> to vector<8x8xf32>
    "tpu.trace_start"() <{level = 10 : i32, message = "qd,kd->qk"}> : () -> ()
    %cst_129 = arith.constant dense<0.000000e+00> : vector<8x8xf32>
    %413 = tpu.matmul %411, %412, %cst_129 {dimension_numbers = #tpu.dot_dimension_numbers<[1], [1], [0], [0], [0, 0, 1, 0], [], []>} : vector<8x8xf32>, vector<8x8xf32>, vector<8x8xf32> -> vector<8x8xf32>
    "tpu.trace_stop"() : () -> ()
    %cst_130 = arith.constant 0.353553385 : f32
    %414 = vector.broadcast %cst_130 : f32 to vector<8x8xf32>
    %415 = arith.mulf %413, %414 : vector<8x8xf32>
    %cst_131 = arith.constant -1.000000e+30 : f32
    %416 = vector.broadcast %cst_131 : f32 to vector<8x8xf32>
    %417 = arith.select %4, %415, %416 : vector<8x8xi1>, vector<8x8xf32>
    %cst_132 = arith.constant dense<0xFF800000> : vector<8xf32>
    %418 = vector.multi_reduction <maximumf>, %417, %cst_132 [1] : vector<8x8xf32> to vector<8xf32>
    %419 = vector.shape_cast %418 : vector<8xf32> to vector<8x1xf32>
    %420 = vector.broadcast %419 : vector<8x1xf32> to vector<8x8xf32>
    %421 = arith.subf %417, %420 : vector<8x8xf32>
    %422 = math.exp %421 : vector<8x8xf32>
    %cst_133 = arith.constant dense<0.000000e+00> : vector<8xf32>
    %423 = vector.multi_reduction <add>, %422, %cst_133 [1] : vector<8x8xf32> to vector<8xf32>
    %424 = vector.shape_cast %423 : vector<8xf32> to vector<8x1xf32>
    %425 = tpu.reciprocal %424 {approx = true} : vector<8x1xf32> -> vector<8x1xf32>
    %426 = arith.mulf %424, %425 : vector<8x1xf32>
    %cst_134 = arith.constant 2.000000e+00 : f32
    %427 = vector.broadcast %cst_134 : f32 to vector<8x1xf32>
    %428 = arith.subf %427, %426 : vector<8x1xf32>
    %429 = arith.mulf %425, %428 : vector<8x1xf32>
    %430 = vector.broadcast %429 : vector<8x1xf32> to vector<8x8xf32>
    %431 = arith.mulf %422, %430 : vector<8x8xf32>
    %432 = vector.extract_strided_slice %387 {offsets = [8, 0], sizes = [8, 8], strides = [1, 1]} : vector<16x8xf32> to vector<8x8xf32>
    %cst_135 = arith.constant dense<0.000000e+00> : vector<8x8xf32>
    %433 = tpu.matmul %431, %432, %cst_135 {dimension_numbers = #tpu.dot_dimension_numbers<[1], [0], [0], [1], [0, 0, 1, 1], [], []>} : vector<8x8xf32>, vector<8x8xf32>, vector<8x8xf32> -> vector<8x8xf32>
    %434 = tpu.concatenate %410, %433 in 0 : vector<8x8xf32>, vector<8x8xf32> -> vector<16x8xf32>
    %c5 = arith.constant 5 : index
    %c0_136 = arith.constant 0 : index
    %c0_137 = arith.constant 0 : index
    %435 = vector.load %arg3[%c5, %c0_136, %c0_137] : memref<8x8x32xf32, #tpu.memory_space<vmem>>, vector<1x8x32xf32>
    %436 = vector.shape_cast %435 : vector<1x8x32xf32> to vector<8x32xf32>
    %cst_138 = arith.constant dense<0.000000e+00> : vector<16x32xf32>
    %437 = tpu.matmul %434, %436, %cst_138 {dimension_numbers = #tpu.dot_dimension_numbers<[1], [0], [0], [1], [0, 0, 1, 1], [], []>} : vector<16x8xf32>, vector<8x32xf32>, vector<16x32xf32> -> vector<16x32xf32>
    %438 = arith.addf %384, %437 : vector<16x32xf32>
    %439 = vector.extract_strided_slice %329 {offsets = [0, 16], sizes = [16, 8], strides = [1, 1]} : vector<16x128xf32> to vector<16x8xf32>
    %440 = vector.extract_strided_slice %329 {offsets = [0, 48], sizes = [16, 8], strides = [1, 1]} : vector<16x128xf32> to vector<16x8xf32>
    %441 = vector.extract_strided_slice %329 {offsets = [0, 80], sizes = [16, 8], strides = [1, 1]} : vector<16x128xf32> to vector<16x8xf32>
    %442 = vector.extract_strided_slice %439 {offsets = [0, 0], sizes = [8, 8], strides = [1, 1]} : vector<16x8xf32> to vector<8x8xf32>
    %443 = vector.extract_strided_slice %440 {offsets = [0, 0], sizes = [8, 8], strides = [1, 1]} : vector<16x8xf32> to vector<8x8xf32>
    "tpu.trace_start"() <{level = 10 : i32, message = "qd,kd->qk"}> : () -> ()
    %cst_139 = arith.constant dense<0.000000e+00> : vector<8x8xf32>
    %444 = tpu.matmul %442, %443, %cst_139 {dimension_numbers = #tpu.dot_dimension_numbers<[1], [1], [0], [0], [0, 0, 1, 0], [], []>} : vector<8x8xf32>, vector<8x8xf32>, vector<8x8xf32> -> vector<8x8xf32>
    "tpu.trace_stop"() : () -> ()
    %cst_140 = arith.constant 0.353553385 : f32
    %445 = vector.broadcast %cst_140 : f32 to vector<8x8xf32>
    %446 = arith.mulf %444, %445 : vector<8x8xf32>
    %cst_141 = arith.constant -1.000000e+30 : f32
    %447 = vector.broadcast %cst_141 : f32 to vector<8x8xf32>
    %448 = arith.select %4, %446, %447 : vector<8x8xi1>, vector<8x8xf32>
    %cst_142 = arith.constant dense<0xFF800000> : vector<8xf32>
    %449 = vector.multi_reduction <maximumf>, %448, %cst_142 [1] : vector<8x8xf32> to vector<8xf32>
    %450 = vector.shape_cast %449 : vector<8xf32> to vector<8x1xf32>
    %451 = vector.broadcast %450 : vector<8x1xf32> to vector<8x8xf32>
    %452 = arith.subf %448, %451 : vector<8x8xf32>
    %453 = math.exp %452 : vector<8x8xf32>
    %cst_143 = arith.constant dense<0.000000e+00> : vector<8xf32>
    %454 = vector.multi_reduction <add>, %453, %cst_143 [1] : vector<8x8xf32> to vector<8xf32>
    %455 = vector.shape_cast %454 : vector<8xf32> to vector<8x1xf32>
    %456 = tpu.reciprocal %455 {approx = true} : vector<8x1xf32> -> vector<8x1xf32>
    %457 = arith.mulf %455, %456 : vector<8x1xf32>
    %cst_144 = arith.constant 2.000000e+00 : f32
    %458 = vector.broadcast %cst_144 : f32 to vector<8x1xf32>
    %459 = arith.subf %458, %457 : vector<8x1xf32>
    %460 = arith.mulf %456, %459 : vector<8x1xf32>
    %461 = vector.broadcast %460 : vector<8x1xf32> to vector<8x8xf32>
    %462 = arith.mulf %453, %461 : vector<8x8xf32>
    %463 = vector.extract_strided_slice %441 {offsets = [0, 0], sizes = [8, 8], strides = [1, 1]} : vector<16x8xf32> to vector<8x8xf32>
    %cst_145 = arith.constant dense<0.000000e+00> : vector<8x8xf32>
    %464 = tpu.matmul %462, %463, %cst_145 {dimension_numbers = #tpu.dot_dimension_numbers<[1], [0], [0], [1], [0, 0, 1, 1], [], []>} : vector<8x8xf32>, vector<8x8xf32>, vector<8x8xf32> -> vector<8x8xf32>
    %465 = vector.extract_strided_slice %439 {offsets = [8, 0], sizes = [8, 8], strides = [1, 1]} : vector<16x8xf32> to vector<8x8xf32>
    %466 = vector.extract_strided_slice %440 {offsets = [8, 0], sizes = [8, 8], strides = [1, 1]} : vector<16x8xf32> to vector<8x8xf32>
    "tpu.trace_start"() <{level = 10 : i32, message = "qd,kd->qk"}> : () -> ()
    %cst_146 = arith.constant dense<0.000000e+00> : vector<8x8xf32>
    %467 = tpu.matmul %465, %466, %cst_146 {dimension_numbers = #tpu.dot_dimension_numbers<[1], [1], [0], [0], [0, 0, 1, 0], [], []>} : vector<8x8xf32>, vector<8x8xf32>, vector<8x8xf32> -> vector<8x8xf32>
    "tpu.trace_stop"() : () -> ()
    %cst_147 = arith.constant 0.353553385 : f32
    %468 = vector.broadcast %cst_147 : f32 to vector<8x8xf32>
    %469 = arith.mulf %467, %468 : vector<8x8xf32>
    %cst_148 = arith.constant -1.000000e+30 : f32
    %470 = vector.broadcast %cst_148 : f32 to vector<8x8xf32>
    %471 = arith.select %4, %469, %470 : vector<8x8xi1>, vector<8x8xf32>
    %cst_149 = arith.constant dense<0xFF800000> : vector<8xf32>
    %472 = vector.multi_reduction <maximumf>, %471, %cst_149 [1] : vector<8x8xf32> to vector<8xf32>
    %473 = vector.shape_cast %472 : vector<8xf32> to vector<8x1xf32>
    %474 = vector.broadcast %473 : vector<8x1xf32> to vector<8x8xf32>
    %475 = arith.subf %471, %474 : vector<8x8xf32>
    %476 = math.exp %475 : vector<8x8xf32>
    %cst_150 = arith.constant dense<0.000000e+00> : vector<8xf32>
    %477 = vector.multi_reduction <add>, %476, %cst_150 [1] : vector<8x8xf32> to vector<8xf32>
    %478 = vector.shape_cast %477 : vector<8xf32> to vector<8x1xf32>
    %479 = tpu.reciprocal %478 {approx = true} : vector<8x1xf32> -> vector<8x1xf32>
    %480 = arith.mulf %478, %479 : vector<8x1xf32>
    %cst_151 = arith.constant 2.000000e+00 : f32
    %481 = vector.broadcast %cst_151 : f32 to vector<8x1xf32>
    %482 = arith.subf %481, %480 : vector<8x1xf32>
    %483 = arith.mulf %479, %482 : vector<8x1xf32>
    %484 = vector.broadcast %483 : vector<8x1xf32> to vector<8x8xf32>
    %485 = arith.mulf %476, %484 : vector<8x8xf32>
    %486 = vector.extract_strided_slice %441 {offsets = [8, 0], sizes = [8, 8], strides = [1, 1]} : vector<16x8xf32> to vector<8x8xf32>
    %cst_152 = arith.constant dense<0.000000e+00> : vector<8x8xf32>
    %487 = tpu.matmul %485, %486, %cst_152 {dimension_numbers = #tpu.dot_dimension_numbers<[1], [0], [0], [1], [0, 0, 1, 1], [], []>} : vector<8x8xf32>, vector<8x8xf32>, vector<8x8xf32> -> vector<8x8xf32>
    %488 = tpu.concatenate %464, %487 in 0 : vector<8x8xf32>, vector<8x8xf32> -> vector<16x8xf32>
    %c6 = arith.constant 6 : index
    %c0_153 = arith.constant 0 : index
    %c0_154 = arith.constant 0 : index
    %489 = vector.load %arg3[%c6, %c0_153, %c0_154] : memref<8x8x32xf32, #tpu.memory_space<vmem>>, vector<1x8x32xf32>
    %490 = vector.shape_cast %489 : vector<1x8x32xf32> to vector<8x32xf32>
    %cst_155 = arith.constant dense<0.000000e+00> : vector<16x32xf32>
    %491 = tpu.matmul %488, %490, %cst_155 {dimension_numbers = #tpu.dot_dimension_numbers<[1], [0], [0], [1], [0, 0, 1, 1], [], []>} : vector<16x8xf32>, vector<8x32xf32>, vector<16x32xf32> -> vector<16x32xf32>
    %492 = arith.addf %438, %491 : vector<16x32xf32>
    %493 = vector.extract_strided_slice %329 {offsets = [0, 24], sizes = [16, 8], strides = [1, 1]} : vector<16x128xf32> to vector<16x8xf32>
    %494 = vector.extract_strided_slice %329 {offsets = [0, 56], sizes = [16, 8], strides = [1, 1]} : vector<16x128xf32> to vector<16x8xf32>
    %495 = vector.extract_strided_slice %329 {offsets = [0, 88], sizes = [16, 8], strides = [1, 1]} : vector<16x128xf32> to vector<16x8xf32>
    %496 = vector.extract_strided_slice %493 {offsets = [0, 0], sizes = [8, 8], strides = [1, 1]} : vector<16x8xf32> to vector<8x8xf32>
    %497 = vector.extract_strided_slice %494 {offsets = [0, 0], sizes = [8, 8], strides = [1, 1]} : vector<16x8xf32> to vector<8x8xf32>
    "tpu.trace_start"() <{level = 10 : i32, message = "qd,kd->qk"}> : () -> ()
    %cst_156 = arith.constant dense<0.000000e+00> : vector<8x8xf32>
    %498 = tpu.matmul %496, %497, %cst_156 {dimension_numbers = #tpu.dot_dimension_numbers<[1], [1], [0], [0], [0, 0, 1, 0], [], []>} : vector<8x8xf32>, vector<8x8xf32>, vector<8x8xf32> -> vector<8x8xf32>
    "tpu.trace_stop"() : () -> ()
    %cst_157 = arith.constant 0.353553385 : f32
    %499 = vector.broadcast %cst_157 : f32 to vector<8x8xf32>
    %500 = arith.mulf %498, %499 : vector<8x8xf32>
    %cst_158 = arith.constant -1.000000e+30 : f32
    %501 = vector.broadcast %cst_158 : f32 to vector<8x8xf32>
    %502 = arith.select %4, %500, %501 : vector<8x8xi1>, vector<8x8xf32>
    %cst_159 = arith.constant dense<0xFF800000> : vector<8xf32>
    %503 = vector.multi_reduction <maximumf>, %502, %cst_159 [1] : vector<8x8xf32> to vector<8xf32>
    %504 = vector.shape_cast %503 : vector<8xf32> to vector<8x1xf32>
    %505 = vector.broadcast %504 : vector<8x1xf32> to vector<8x8xf32>
    %506 = arith.subf %502, %505 : vector<8x8xf32>
    %507 = math.exp %506 : vector<8x8xf32>
    %cst_160 = arith.constant dense<0.000000e+00> : vector<8xf32>
    %508 = vector.multi_reduction <add>, %507, %cst_160 [1] : vector<8x8xf32> to vector<8xf32>
    %509 = vector.shape_cast %508 : vector<8xf32> to vector<8x1xf32>
    %510 = tpu.reciprocal %509 {approx = true} : vector<8x1xf32> -> vector<8x1xf32>
    %511 = arith.mulf %509, %510 : vector<8x1xf32>
    %cst_161 = arith.constant 2.000000e+00 : f32
    %512 = vector.broadcast %cst_161 : f32 to vector<8x1xf32>
    %513 = arith.subf %512, %511 : vector<8x1xf32>
    %514 = arith.mulf %510, %513 : vector<8x1xf32>
    %515 = vector.broadcast %514 : vector<8x1xf32> to vector<8x8xf32>
    %516 = arith.mulf %507, %515 : vector<8x8xf32>
    %517 = vector.extract_strided_slice %495 {offsets = [0, 0], sizes = [8, 8], strides = [1, 1]} : vector<16x8xf32> to vector<8x8xf32>
    %cst_162 = arith.constant dense<0.000000e+00> : vector<8x8xf32>
    %518 = tpu.matmul %516, %517, %cst_162 {dimension_numbers = #tpu.dot_dimension_numbers<[1], [0], [0], [1], [0, 0, 1, 1], [], []>} : vector<8x8xf32>, vector<8x8xf32>, vector<8x8xf32> -> vector<8x8xf32>
    %519 = vector.extract_strided_slice %493 {offsets = [8, 0], sizes = [8, 8], strides = [1, 1]} : vector<16x8xf32> to vector<8x8xf32>
    %520 = vector.extract_strided_slice %494 {offsets = [8, 0], sizes = [8, 8], strides = [1, 1]} : vector<16x8xf32> to vector<8x8xf32>
    "tpu.trace_start"() <{level = 10 : i32, message = "qd,kd->qk"}> : () -> ()
    %cst_163 = arith.constant dense<0.000000e+00> : vector<8x8xf32>
    %521 = tpu.matmul %519, %520, %cst_163 {dimension_numbers = #tpu.dot_dimension_numbers<[1], [1], [0], [0], [0, 0, 1, 0], [], []>} : vector<8x8xf32>, vector<8x8xf32>, vector<8x8xf32> -> vector<8x8xf32>
    "tpu.trace_stop"() : () -> ()
    %cst_164 = arith.constant 0.353553385 : f32
    %522 = vector.broadcast %cst_164 : f32 to vector<8x8xf32>
    %523 = arith.mulf %521, %522 : vector<8x8xf32>
    %cst_165 = arith.constant -1.000000e+30 : f32
    %524 = vector.broadcast %cst_165 : f32 to vector<8x8xf32>
    %525 = arith.select %4, %523, %524 : vector<8x8xi1>, vector<8x8xf32>
    %cst_166 = arith.constant dense<0xFF800000> : vector<8xf32>
    %526 = vector.multi_reduction <maximumf>, %525, %cst_166 [1] : vector<8x8xf32> to vector<8xf32>
    %527 = vector.shape_cast %526 : vector<8xf32> to vector<8x1xf32>
    %528 = vector.broadcast %527 : vector<8x1xf32> to vector<8x8xf32>
    %529 = arith.subf %525, %528 : vector<8x8xf32>
    %530 = math.exp %529 : vector<8x8xf32>
    %cst_167 = arith.constant dense<0.000000e+00> : vector<8xf32>
    %531 = vector.multi_reduction <add>, %530, %cst_167 [1] : vector<8x8xf32> to vector<8xf32>
    %532 = vector.shape_cast %531 : vector<8xf32> to vector<8x1xf32>
    %533 = tpu.reciprocal %532 {approx = true} : vector<8x1xf32> -> vector<8x1xf32>
    %534 = arith.mulf %532, %533 : vector<8x1xf32>
    %cst_168 = arith.constant 2.000000e+00 : f32
    %535 = vector.broadcast %cst_168 : f32 to vector<8x1xf32>
    %536 = arith.subf %535, %534 : vector<8x1xf32>
    %537 = arith.mulf %533, %536 : vector<8x1xf32>
    %538 = vector.broadcast %537 : vector<8x1xf32> to vector<8x8xf32>
    %539 = arith.mulf %530, %538 : vector<8x8xf32>
    %540 = vector.extract_strided_slice %495 {offsets = [8, 0], sizes = [8, 8], strides = [1, 1]} : vector<16x8xf32> to vector<8x8xf32>
    %cst_169 = arith.constant dense<0.000000e+00> : vector<8x8xf32>
    %541 = tpu.matmul %539, %540, %cst_169 {dimension_numbers = #tpu.dot_dimension_numbers<[1], [0], [0], [1], [0, 0, 1, 1], [], []>} : vector<8x8xf32>, vector<8x8xf32>, vector<8x8xf32> -> vector<8x8xf32>
    %542 = tpu.concatenate %518, %541 in 0 : vector<8x8xf32>, vector<8x8xf32> -> vector<16x8xf32>
    %c7 = arith.constant 7 : index
    %c0_170 = arith.constant 0 : index
    %c0_171 = arith.constant 0 : index
    %543 = vector.load %arg3[%c7, %c0_170, %c0_171] : memref<8x8x32xf32, #tpu.memory_space<vmem>>, vector<1x8x32xf32>
    %544 = vector.shape_cast %543 : vector<1x8x32xf32> to vector<8x32xf32>
    %cst_172 = arith.constant dense<0.000000e+00> : vector<16x32xf32>
    %545 = tpu.matmul %542, %544, %cst_172 {dimension_numbers = #tpu.dot_dimension_numbers<[1], [0], [0], [1], [0, 0, 1, 1], [], []>} : vector<16x8xf32>, vector<8x32xf32>, vector<16x32xf32> -> vector<16x32xf32>
    %546 = arith.addf %492, %545 : vector<16x32xf32>
    %547 = arith.addf %294, %546 : vector<16x32xf32>
    %548 = vector.broadcast %298 : vector<1x32xf32> to vector<16x32xf32>
    %549 = arith.addf %547, %548 : vector<16x32xf32>
    %cst_173 = arith.constant dense<0.000000e+00> : vector<16xf32>
    %550 = vector.multi_reduction <add>, %549, %cst_173 [1] : vector<16x32xf32> to vector<16xf32>
    %551 = vector.shape_cast %550 : vector<16xf32> to vector<16x1xf32>
    %cst_174 = arith.constant 3.200000e+01 : f32
    %552 = vector.broadcast %cst_174 : f32 to vector<16x1xf32>
    %553 = arith.divf %551, %552 : vector<16x1xf32>
    %554 = vector.broadcast %553 : vector<16x1xf32> to vector<16x32xf32>
    %555 = arith.subf %549, %554 : vector<16x32xf32>
    %556 = arith.mulf %555, %555 : vector<16x32xf32>
    %cst_175 = arith.constant dense<0.000000e+00> : vector<16xf32>
    %557 = vector.multi_reduction <add>, %556, %cst_175 [1] : vector<16x32xf32> to vector<16xf32>
    %558 = vector.shape_cast %557 : vector<16xf32> to vector<16x1xf32>
    %cst_176 = arith.constant 3.200000e+01 : f32
    %559 = vector.broadcast %cst_176 : f32 to vector<16x1xf32>
    %560 = arith.divf %558, %559 : vector<16x1xf32>
    %561 = vector.broadcast %553 : vector<16x1xf32> to vector<16x32xf32>
    %562 = arith.subf %549, %561 : vector<16x32xf32>
    %cst_177 = arith.constant 9.99999974E-6 : f32
    %563 = vector.broadcast %cst_177 : f32 to vector<16x1xf32>
    %564 = arith.addf %560, %563 : vector<16x1xf32>
    %565 = math.rsqrt %564 : vector<16x1xf32>
    %566 = vector.broadcast %565 : vector<16x1xf32> to vector<16x32xf32>
    %567 = arith.mulf %562, %566 : vector<16x32xf32>
    %568 = vector.broadcast %299 : vector<1x32xf32> to vector<16x32xf32>
    %569 = arith.mulf %567, %568 : vector<16x32xf32>
    %570 = vector.broadcast %300 : vector<1x32xf32> to vector<16x32xf32>
    %571 = arith.addf %569, %570 : vector<16x32xf32>
    %c1_178 = arith.constant 1 : index
    %c0_179 = arith.constant 0 : index
    %c0_180 = arith.constant 0 : index
    %572 = vector.load %arg4[%c1_178, %c0_179, %c0_180] : memref<2x32x64xf32, #tpu.memory_space<vmem>>, vector<1x32x64xf32>
    %573 = vector.shape_cast %572 : vector<1x32x64xf32> to vector<32x64xf32>
    %cst_181 = arith.constant dense<0.000000e+00> : vector<16x64xf32>
    %574 = tpu.matmul %571, %573, %cst_181 {dimension_numbers = #tpu.dot_dimension_numbers<[1], [0], [0], [1], [0, 0, 1, 1], [], []>} : vector<16x32xf32>, vector<32x64xf32>, vector<16x64xf32> -> vector<16x64xf32>
    %575 = vector.broadcast %301 : vector<1x64xf32> to vector<16x64xf32>
    %576 = arith.addf %574, %575 : vector<16x64xf32>
    %cst_182 = arith.constant 0.000000e+00 : f32
    %577 = vector.broadcast %cst_182 : f32 to vector<16x64xf32>
    %578 = arith.maximumf %576, %577 : vector<16x64xf32>
    %c1_183 = arith.constant 1 : index
    %c0_184 = arith.constant 0 : index
    %c0_185 = arith.constant 0 : index
    %579 = vector.load %arg5[%c1_183, %c0_184, %c0_185] : memref<2x64x32xf32, #tpu.memory_space<vmem>>, vector<1x64x32xf32>
    %580 = vector.shape_cast %579 : vector<1x64x32xf32> to vector<64x32xf32>
    %cst_186 = arith.constant dense<0.000000e+00> : vector<16x32xf32>
    %581 = tpu.matmul %578, %580, %cst_186 {dimension_numbers = #tpu.dot_dimension_numbers<[1], [0], [0], [1], [0, 0, 1, 1], [], []>} : vector<16x64xf32>, vector<64x32xf32>, vector<16x32xf32> -> vector<16x32xf32>
    %582 = vector.broadcast %302 : vector<1x32xf32> to vector<16x32xf32>
    %583 = arith.addf %581, %582 : vector<16x32xf32>
    %584 = arith.addf %549, %583 : vector<16x32xf32>
    %585 = vector.extract_strided_slice %1 {offsets = [16, 0], sizes = [1, 32], strides = [1, 1]} : vector<24x128xf32> to vector<1x32xf32>
    %586 = vector.extract_strided_slice %1 {offsets = [17, 0], sizes = [1, 32], strides = [1, 1]} : vector<24x128xf32> to vector<1x32xf32>
    %cst_187 = arith.constant dense<0.000000e+00> : vector<16xf32>
    %587 = vector.multi_reduction <add>, %584, %cst_187 [1] : vector<16x32xf32> to vector<16xf32>
    %588 = vector.shape_cast %587 : vector<16xf32> to vector<16x1xf32>
    %cst_188 = arith.constant 3.200000e+01 : f32
    %589 = vector.broadcast %cst_188 : f32 to vector<16x1xf32>
    %590 = arith.divf %588, %589 : vector<16x1xf32>
    %591 = vector.broadcast %590 : vector<16x1xf32> to vector<16x32xf32>
    %592 = arith.subf %584, %591 : vector<16x32xf32>
    %593 = arith.mulf %592, %592 : vector<16x32xf32>
    %cst_189 = arith.constant dense<0.000000e+00> : vector<16xf32>
    %594 = vector.multi_reduction <add>, %593, %cst_189 [1] : vector<16x32xf32> to vector<16xf32>
    %595 = vector.shape_cast %594 : vector<16xf32> to vector<16x1xf32>
    %cst_190 = arith.constant 3.200000e+01 : f32
    %596 = vector.broadcast %cst_190 : f32 to vector<16x1xf32>
    %597 = arith.divf %595, %596 : vector<16x1xf32>
    %598 = vector.broadcast %590 : vector<16x1xf32> to vector<16x32xf32>
    %599 = arith.subf %584, %598 : vector<16x32xf32>
    %cst_191 = arith.constant 9.99999974E-6 : f32
    %600 = vector.broadcast %cst_191 : f32 to vector<16x1xf32>
    %601 = arith.addf %597, %600 : vector<16x1xf32>
    %602 = math.rsqrt %601 : vector<16x1xf32>
    %603 = vector.broadcast %602 : vector<16x1xf32> to vector<16x32xf32>
    %604 = arith.mulf %599, %603 : vector<16x32xf32>
    %605 = vector.broadcast %585 : vector<1x32xf32> to vector<16x32xf32>
    %606 = arith.mulf %604, %605 : vector<16x32xf32>
    %607 = vector.broadcast %586 : vector<1x32xf32> to vector<16x32xf32>
    %608 = arith.addf %606, %607 : vector<16x32xf32>
    %c0_192 = arith.constant 0 : index
    %c0_193 = arith.constant 0 : index
    %609 = vector.load %arg7[%c0_192, %c0_193] : memref<32x128xf32, #tpu.memory_space<vmem>>, vector<32x128xf32>
    %cst_194 = arith.constant dense<0.000000e+00> : vector<16x128xf32>
    %610 = tpu.matmul %608, %609, %cst_194 {dimension_numbers = #tpu.dot_dimension_numbers<[1], [0], [0], [1], [0, 0, 1, 1], [], []>} : vector<16x32xf32>, vector<32x128xf32>, vector<16x128xf32> -> vector<16x128xf32>
    %c0_195 = arith.constant 0 : index
    %c0_196 = arith.constant 0 : index
    %611 = vector.load %arg8[%c0_195, %c0_196] : memref<16x128xf32, #tpu.memory_space<vmem>>, vector<16x128xf32>
    tpu.vector_store %arg8[%c0_195, %c0_196], %610 {strides = array<i32>} : memref<16x128xf32, #tpu.memory_space<vmem>>, vector<16x128xf32>,
    return
  }
  func.func @transform_0(%arg0: i32) -> (i32, i32) {
    %c0_i32 = arith.constant 0 : i32
    %c0_i32_0 = arith.constant 0 : i32
    %c0_i32_1 = arith.constant 0 : i32
    return %c0_i32, %c0_i32_0 : i32, i32
  }
  func.func @transform_1(%arg0: i32) -> (i32, i32, i32) {
    %c0_i32 = arith.constant 0 : i32
    %c0_i32_0 = arith.constant 0 : i32
    %c0_i32_1 = arith.constant 0 : i32
    %c0_i32_2 = arith.constant 0 : i32
    return %c0_i32, %c0_i32_0, %c0_i32_1 : i32, i32, i32
  }
  func.func @transform_2(%arg0: i32) -> (i32, i32, i32) {
    %c0_i32 = arith.constant 0 : i32
    %c0_i32_0 = arith.constant 0 : i32
    %c0_i32_1 = arith.constant 0 : i32
    %c0_i32_2 = arith.constant 0 : i32
    return %c0_i32, %c0_i32_0, %c0_i32_1 : i32, i32, i32
  }
  func.func @transform_3(%arg0: i32) -> (i32, i32, i32) {
    %c0_i32 = arith.constant 0 : i32
    %c0_i32_0 = arith.constant 0 : i32
    %c0_i32_1 = arith.constant 0 : i32
    %c0_i32_2 = arith.constant 0 : i32
    return %c0_i32, %c0_i32_0, %c0_i32_1 : i32, i32, i32
  }
  func.func @transform_4(%arg0: i32) -> (i32, i32, i32) {
    %c0_i32 = arith.constant 0 : i32
    %c0_i32_0 = arith.constant 0 : i32
    %c0_i32_1 = arith.constant 0 : i32
    %c0_i32_2 = arith.constant 0 : i32
    return %c0_i32, %c0_i32_0, %c0_i32_1 : i32, i32, i32
  }
  func.func @transform_5(%arg0: i32) -> (i32, i32) {
    %c0_i32 = arith.constant 0 : i32
    %c0_i32_0 = arith.constant 0 : i32
    %c0_i32_1 = arith.constant 0 : i32
    return %c0_i32, %c0_i32_0 : i32, i32
  }
  func.func @transform_6(%arg0: i32) -> (i32, i32) {
    %c0_i32 = arith.constant 0 : i32
    %c0_i32_0 = arith.constant 0 : i32
    %c0_i32_1 = arith.constant 0 : i32
    return %c0_i32, %c0_i32_0 : i32, i32
  }
  func.func @transform_7(%arg0: i32) -> (i32, i32) {
    %c0_i32 = arith.constant 0 : i32
    %c0_i32_0 = arith.constant 0 : i32
    %c0_i32_1 = arith.constant 0 : i32
    return %c0_i32, %c0_i32_0 : i32, i32
  }
}

</mosaic_0001>

<bundles_post_ra>
// kernel: decoder_no_cache_forward.1
= control target key start
LH: loop header
LB: loop body
LE: loop exit
PB: predicated region body
PF: predicated region fallthrough
CT: control target
= control target key end

     0   :  { %vm37_vm0 = vcmask 261120   ;;  %s5715_s0 = inlined_call_operand.vmem [shape: f32[16,32], index: 0, kind: input, shape index: {}]   ;;  %s5716_s1 = inlined_call_operand.vmem [shape: f32[2,32,128], index: 1, kind: input, shape index: {}]   ;;  %s5717_s2 = inlined_call_operand.vmem [shape: f32[8,8,32], index: 2, kind: input, shape index: {}]   ;;  %s5718_s3 = inlined_call_operand.vmem [shape: f32[2,32,64], index: 3, kind: input, shape index: {}]   ;;  %s5719_s4 = inlined_call_operand.vmem [shape: f32[2,64,32], index: 4, kind: input, shape index: {}]   ;;  %s5720_s5 = inlined_call_operand.vmem [shape: f32[24,128], index: 5, kind: input, shape index: {}]   ;;  %s5721_s6 = inlined_call_operand.vmem [shape: f32[32,128], index: 6, kind: input, shape index: {}]   ;;  %s5722_s7 = inlined_call_operand.hbm [shape: f32[16,128], index: 7, kind: output, shape index: {}]  }
   0x1   :  { %v5089_v0 = vld [vmem:[%s5715_s0] sm:$0xff]  ;;  %v5094_v1 = vld [vmem:[%s5715_s0 + $0x8] sm:$0xff] }
   0x2   :  { %12 = vsyncpa [#allocation3], 0  ;;  %v38_v2 = vsel %vm37_vm0, %v5089_v0, 0.0  ;;  %v41_v3 = vsel %vm37_vm0, %v5094_v1, 0.0  ;;  %v77_v14 = vld [vmem:[%s5716_s1] sm:$0xff]  ;;  %v78_v15 = vld [vmem:[%s5716_s1 + $0x8] sm:$0xff]  ;;  %v32_v22 = vlaneseq }
   0x3   :  { %39 = vadd.xlane.f32.xlu0 %v38_v2  ;;  %v79_v16 = vld [vmem:[%s5716_s1 + $0x10] sm:$0xff]  ;;  %v4822_v17 = vpack.c.bf16 %v78_v15, %v77_v14  ;;  %v80_v18 = vld [vmem:[%s5716_s1 + $0x18] sm:$0xff]  ;;  %v5124_v29 = vld [vmem:[%s5720_s5] sm:$0xff]  ;;  %v5030_v41 = vmov 0.0   ;;  %vm5031_vm1 = vmmov 0   ;;  %s5032_s14 = smov 96  }
   0x4   :  { %v4826_v19 = vpack.c.bf16 %v80_v18, %v79_v16  ;;  %v5116_v26 = vshrl.u32 %v32_v22, 7  ;;  %4540 = vmatprep.subr.mxu1 %v5030_v41  ;;  %4542 = vmatprep.mubr.msk.f32.mxu1 %vm5031_vm1, %v5030_v41  ;;  %s5033_s15 = smov 120   ;;  %vm169_vm2 = vcmask 64512   ;;  %v35_v49 = vand.u32 127, %v32_v22  ;;  %s5034_s16 = smov 64  }
   0x5   :  { %4823 = vmatprep.subr.bf16.mxu0 %v4822_v17  ;;  %s5035_s17 = smov 88   ;;  %s5036_s18 = smov 56   ;;  %vm2009_vm4 = vcmask 523264  }
   0x6   :  { %4825 = vmatpush3.bf16.msra.mxu0 %v4822_v17  ;;  %v5119_v28 = vsub.s32 0, %v5116_v26  ;;  %v5127_v30 = vsub.s32 1, %v5116_v26  ;;  %v83_v42 = vsub.s32 2, %v5116_v26  ;;  %vm5164_vm3 = vcmp.le.s32.totalorder %v35_v49, %v5116_v26  ;;  %s5037_s19 = smov 80   ;;  %s5038_s20 = smov 112  }
   0x7   :  { %42 = vadd.xlane.f32.xlu0 %v41_v3  ;;  %4827 = vmatprep.subr.bf16.mxu0 %v4826_v19  ;;  %s5039_s25 = smov 48   ;;  %s5040_s26 = smov 72  }
   0x8   :  { %v68_v31 = vrot.slane %v5124_v29, %v5119_v28  ;;  %v74_v34 = vrot.slane %v5124_v29, %v5127_v30  ;;  %v84_v43 = vrot.slane %v5124_v29, %v83_v42  ;;  %s5041_s27 = smov 104   ;;  %s5042_s29 = smov 40  }
   0xa   :  { %4829 = vmatpush3.bf16.msra.mxu0 %v4826_v19 }
   0xb   :  { %4560 = vmatprep.subr.mxu0 %v5030_v41 }
  0x90   :  { %v40_v4 = vpop.xlane.xlu0 %39 }
  0x91   :  { %v45_v5 = vmul.f32 0.03125, %v40_v4 }
  0x93   :  { %v47_v6 = vsub.f32 %v5089_v0, %v45_v5 }
  0x94   :  { %v43_v7 = vpop.xlane.xlu0 %42 }
  0x95   :  { %v46_v8 = vmul.f32 0.03125, %v43_v7  ;;  %v49_v9 = vmul.f32 %v47_v6, %v47_v6 }
  0x97   :  { %v48_v10 = vsub.f32 %v5094_v1, %v46_v8  ;;  %v51_v11 = vsel %vm37_vm0, %v49_v9, 0.0 }
  0x98   :  { %52 = vadd.xlane.f32.xlu1 %v51_v11 }
  0x99   :  { %v50_v12 = vmul.f32 %v48_v10, %v48_v10 }
  0x9b   :  { %v54_v13 = vsel %vm37_vm0, %v50_v12, 0.0 }
  0x9c   :  { %55 = vadd.xlane.f32.xlu1 %v54_v13 }
 0x125   :  { %v53_v20 = vpop.xlane.xlu1 %52 }
 0x126   :  { %v57_v21 = vmul.f32 0.03125, %v53_v20 }
 0x128   :  { %v59_v23 = vadd.f32 1e-05, %v57_v21 }
 0x129   :  { %v56_v24 = vpop.xlane.xlu1 %55 }
 0x12a   :  { %4922 = vrsqrt.f32 %v59_v23  ;;  %v58_v25 = vmul.f32 0.03125, %v56_v24 }
 0x12c   :  { %v60_v27 = vadd.f32 1e-05, %v58_v25 }
 0x12e   :  { %4924 = vrsqrt.f32 %v60_v27 }
 0x134   :  { %v4923_v32 = vpop.eup %4922 }
 0x135   :  { %v63_v33 = vmul.f32 %v4923_v32, %v47_v6 }
 0x137   :  { %v69_v35 = vmul.f32 %v68_v31, %v63_v33 }
 0x138   :  { %v4925_v36 = vpop.eup %4924 }
 0x139   :  { %v64_v37 = vmul.f32 %v4925_v36, %v48_v10  ;;  %v75_v38 = vadd.f32 %v74_v34, %v69_v35 }
 0x13b   :  { %v70_v39 = vmul.f32 %v68_v31, %v64_v37  ;;  %4537 = vmatprep.mubr.msk.f32.mxu0 %vm37_vm0, %v75_v38 }
 0x13d   :  { %v76_v40 = vadd.f32 %v74_v34, %v70_v39 }
 0x13f   :  { %4538 = vmatmul.mubr.msk.f32.vlgmr.msra.gmra.mrb[0].mxu0 %vm37_vm0, %v76_v40 }
 0x140   :  { %4562 = vmatprep.mubr.msk.f32.mxu0 %vm5031_vm1, %v5030_v41 }
 0x212   :  { %v4539_v44 = vpop.f32.mrb[0].mxu0 }
 0x213   :  { %v157_v45 = vpop.f32.mrb[1].mxu0  ;;  %v5149_v47 = vadd.f32 %v4539_v44, %v84_v43 }
 0x214   :  { %v5145_v46 = vadd.f32 %v157_v45, %v84_v43 }
 0x216   :  { %167 = vrot.lane.b32.xlu0 %v5145_v46, %s5032_s14 }
 0x21a   :  { %337 = vrot.lane.b32.xlu0 %v5149_v47, %s5032_s14 }
 0x21e   :  { %506 = vrot.lane.b32.xlu0 %v5145_v46, %s5033_s15 }
 0x222   :  { %676 = vrot.lane.b32.xlu0 %v5149_v47, %s5033_s15 }
 0x288   :  { %v168_v48 = vpop.permute.xlu0 %167 }
 0x289   :  { %4541 = vmatpush3.xpose.msk.msra.mxu1 %vm169_vm2, %v168_v48 }
 0x28a   :  { %4545 = vmatprep.subr.mxu1 %v5030_v41 }
 0x28c   :  { %4543 = vmatmul.mubr.msk.f32.vlgmr.msra.gmra.mrb[0].mxu1 %vm169_vm2, %v5145_v46  ;;  %v338_v62 = vpop.permute.xlu0 %337 }
 0x28d   :  { %4547 = vmatprep.mubr.msk.f32.mxu1 %vm5031_vm1, %v5030_v41 }
 0x290   :  { %v507_v3 = vpop.permute.xlu0 %506 }
 0x294   :  { %v677_v8 = vpop.permute.xlu0 %676 }
 0x35f   :  { %v240_v51 = vpop.f32.mrb[0].mxu1 }
 0x360   :  { %v244_v52 = vmul.f32 0.35355338, %v240_v51  ;;  %v4544_v53 = vpop.f32.mrb[1].mxu1 }
 0x362   :  { %v245_v54 = vsel %vm5164_vm3, %v244_v52, -1e+30 }
 0x363   :  { %v246_v55 = vsel %vm169_vm2, %v245_v54, -inf }
 0x364   :  { %247 = vmax.xlane.f32.xlu1 %v246_v55 }
 0x3f1   :  { %v248_v56 = vpop.xlane.xlu1 %247 }
 0x3f2   :  { %v249_v57 = vsub.f32 %v245_v54, %v248_v56 }
 0x3f4   :  { %v250_v58 = vmul.f32 1.442695, %v249_v57 }
 0x3f6   :  { %4926 = vpow2.f32 %v250_v58 }
 0x400   :  { %v4927_v59 = vpop.eup %4926 }
 0x401   :  { %v252_v60 = vsel %vm169_vm2, %v4927_v59, 0.0 }
 0x402   :  { %253 = vadd.xlane.f32.xlu1 %v252_v60 }
 0x413   :  { %260 = vrot.lane.b32.xlu1 %v5145_v46, %s5034_s16 }
 0x417   :  { %508 = vrot.lane.b32.xlu1 %v5145_v46, %s5035_s17 }
 0x41b   :  { %678 = vrot.lane.b32.xlu1 %v5149_v47, %s5035_s17 }
 0x48f   :  { %v254_v61 = vpop.xlane.xlu1 %253 }
 0x490   :  { %4928 = vrcp.f32 %v254_v61 }
 0x493   :  { %v261_v63 = vpop.permute.xlu1 %260 }
 0x494   :  { %4546 = vmatpush3.msra.mxu1 %v261_v63 }
 0x495   :  { %4550 = vmatprep.subr.mxu1 %v5030_v41 }
 0x497   :  { %v509_v2 = vpop.permute.xlu1 %508 }
 0x498   :  { %4561 = vmatpush3.xpose.msk.msra.mxu0 %vm169_vm2, %v509_v2 }
 0x499   :  { %4570 = vmatprep.subr.mxu0 %v5030_v41 }
 0x49a   :  { %v4929_v4 = vpop.eup %4928 }
 0x49b   :  { %v256_v5 = vmul.f32 %v4929_v4, %v254_v61  ;;  %v679_v6 = vpop.permute.xlu1 %678  ;;  %4563 = vmatmul.mubr.msk.f32.vlgmr.msra.gmra.mrb[2].mxu0 %vm169_vm2, %v507_v3 }
 0x49c   :  { %4571 = vmatpush3.xpose.msk.msra.mxu0 %vm169_vm2, %v679_v6  ;;  %4572 = vmatprep.mubr.msk.f32.mxu0 %vm5031_vm1, %v5030_v41 }
 0x49d   :  { %v257_v7 = vsub.f32 2.0, %v256_v5 }
 0x49f   :  { %v258_v9 = vmul.f32 %v4929_v4, %v257_v7  ;;  %4573 = vmatmul.mubr.msk.f32.vlgmr.msra.gmra.mrb[4].mxu0 %vm169_vm2, %v677_v8 }
 0x4a1   :  { %v259_v10 = vmul.f32 %v4927_v59, %v258_v9 }
 0x4a3   :  { %4548 = vmatmul.mubr.msk.f32.vlgmr.msra.gmra.mrb[2].mxu1 %vm169_vm2, %v259_v10 }
 0x4a4   :  { %4551 = vmatpush3.xpose.msk.msra.mxu1 %vm169_vm2, %v338_v62  ;;  %4552 = vmatprep.mubr.msk.f32.mxu1 %vm5031_vm1, %v5030_v41 }
 0x4a5   :  { %4555 = vmatprep.subr.mxu1 %v5030_v41 }
 0x4a7   :  { %4553 = vmatmul.mubr.msk.f32.vlgmr.msra.gmra.mrb[4].mxu1 %vm169_vm2, %v5149_v47 }
 0x4a8   :  { %4557 = vmatprep.mubr.msk.f32.mxu1 %vm5031_vm1, %v5030_v41 }
 0x56e   :  { %v580_v11 = vpop.f32.mrb[2].mxu0 }
 0x56f   :  { %v584_v12 = vmul.f32 0.35355338, %v580_v11  ;;  %v4564_v13 = vpop.f32.mrb[3].mxu0 }
 0x570   :  { %v4304_v13 = vld [vmem:[%s5717_s2 + $0x8] sm:$0xff] }
 0x571   :  { %v585_v14 = vsel %vm5164_vm3, %v584_v12, -1e+30  ;;  %4580 = vmatprep.subr.mxu0 %v4304_v13 }
 0x572   :  { %v750_v15 = vpop.f32.mrb[4].mxu0  ;;  %v586_v16 = vsel %vm169_vm2, %v585_v14, -inf  ;;  %4581 = vmatpush3.msra.mxu0 %v4304_v13 }
 0x573   :  { %v754_v17 = vmul.f32 0.35355338, %v750_v15  ;;  %587 = vmax.xlane.f32.xlu0 %v586_v16  ;;  %v4574_v18 = vpop.f32.mrb[5].mxu0 }
 0x575   :  { %v755_v19 = vsel %vm5164_vm3, %v754_v17, -1e+30 }
 0x576   :  { %v5200_v20 = vpop.f32.mrb[2].mxu1  ;;  %v756_v21 = vsel %vm169_vm2, %v755_v19, -inf }
 0x577   :  { %v4549_v22 = vpop.f32.mrb[3].mxu1  ;;  %757 = vmax.xlane.f32.xlu0 %v756_v21 }
 0x57a   :  { %v409_v23 = vpop.f32.mrb[4].mxu1 }
 0x57b   :  { %v413_v24 = vmul.f32 0.35355338, %v409_v23  ;;  %v4554_v25 = vpop.f32.mrb[5].mxu1 }
 0x57d   :  { %v414_v27 = vsel %vm5164_vm3, %v413_v24, -1e+30 }
 0x57e   :  { %v415_v31 = vsel %vm169_vm2, %v414_v27, -inf }
 0x57f   :  { %416 = vmax.xlane.f32.xlu1 %v415_v31 }
 0x600   :  { %v588_v32 = vpop.xlane.xlu0 %587 }
 0x601   :  { %v589_v33 = vsub.f32 %v585_v14, %v588_v32  ;;  %v505_v14 = vld [vmem:[%s5717_s2] sm:$0xff] }
 0x602   :  { %4585 = vmatprep.subr.mxu0 %v505_v14 }
 0x603   :  { %v590_v34 = vmul.f32 1.442695, %v589_v33 }
 0x604   :  { %v758_v35 = vpop.xlane.xlu0 %757 }
 0x605   :  { %4930 = vpow2.f32 %v590_v34  ;;  %v759_v36 = vsub.f32 %v755_v19, %v758_v35 }
 0x607   :  { %v760_v40 = vmul.f32 1.442695, %v759_v36 }
 0x60c   :  { %v417_v37 = vpop.xlane.xlu1 %416 }
 0x60d   :  { %v418_v38 = vsub.f32 %v414_v27, %v417_v37 }
 0x60f   :  { %v4931_v39 = vpop.eup %4930  ;;  %v419_v43 = vmul.f32 1.442695, %v418_v38 }
 0x610   :  { %v592_v44 = vsel %vm169_vm2, %v4931_v39, 0.0 }
 0x611   :  { %4932 = vpow2.f32 %v419_v43  ;;  %593 = vadd.xlane.f32.xlu1 %v592_v44 }
 0x612   :  { %4934 = vpow2.f32 %v760_v40 }
 0x61b   :  { %v4933_v45 = vpop.eup %4932 }
 0x61c   :  { %v421_v48 = vsel %vm169_vm2, %v4933_v45, 0.0  ;;  %v4935_v49 = vpop.eup %4934 }
 0x61d   :  { %422 = vadd.xlane.f32.xlu0 %v421_v48  ;;  %v762_v51 = vsel %vm169_vm2, %v4935_v49, 0.0 }
 0x621   :  { %763 = vadd.xlane.f32.xlu0 %v762_v51 }
 0x622   :  { %429 = vrot.lane.b32.xlu1 %v5149_v47, %s5034_s16 }
 0x626   :  { %770 = vrot.lane.b32.xlu1 %v5149_v47, %s5036_s18 }
 0x62a   :  { %1012 = vrot.lane.b32.xlu1 %v5145_v46, %s5037_s19 }
 0x62e   :  { %1010 = vrot.lane.b32.xlu1 %v5145_v46, %s5038_s20 }
 0x632   :  { %1180 = vrot.lane.b32.xlu1 %v5149_v47, %s5038_s20 }
 0x637   :  { %600 = vrot.lane.b32.xlu0 %v5145_v46, %s5036_s18 }
 0x63b   :  { %1182 = vrot.lane.b32.xlu0 %v5149_v47, %s5037_s19 }
 0x69e   :  { %v594_v52 = vpop.xlane.xlu1 %593 }
 0x69f   :  { %4936 = vrcp.f32 %v594_v52 }
 0x6a2   :  { %v430_v53 = vpop.permute.xlu1 %429 }
 0x6a3   :  { %4556 = vmatpush3.msra.mxu1 %v430_v53 }
 0x6a4   :  { %4565 = vmatprep.subr.mxu1 %v5030_v41 }
 0x6a6   :  { %v771_v8 = vpop.permute.xlu1 %770 }
 0x6a9   :  { %v4937_v56 = vpop.eup %4936 }
 0x6aa   :  { %v423_v54 = vpop.xlane.xlu0 %422  ;;  %v596_v57 = vmul.f32 %v4937_v56, %v594_v52  ;;  %v1013_v11 = vpop.permute.xlu1 %1012 }
 0x6ab   :  { %4938 = vrcp.f32 %v423_v54 }
 0x6ac   :  { %v597_v60 = vsub.f32 2.0, %v596_v57 }
 0x6ae   :  { %v764_v55 = vpop.xlane.xlu0 %763  ;;  %v598_v3 = vmul.f32 %v4937_v56, %v597_v60  ;;  %v1011_v12 = vpop.permute.xlu1 %1010 }
 0x6af   :  { %4940 = vrcp.f32 %v764_v55 }
 0x6b0   :  { %v599_v7 = vmul.f32 %v4931_v39, %v598_v3 }
 0x6b2   :  { %v601_v6 = vpop.permute.xlu0 %600  ;;  %v1181_v32 = vpop.permute.xlu1 %1180 }
 0x6b5   :  { %v4939_v58 = vpop.eup %4938 }
 0x6b6   :  { %v425_v59 = vmul.f32 %v4939_v58, %v423_v54  ;;  %v1183_v25 = vpop.permute.xlu0 %1182 }
 0x6b8   :  { %v426_v61 = vsub.f32 2.0, %v425_v59 }
 0x6b9   :  { %v4941_v62 = vpop.eup %4940 }
 0x6ba   :  { %v427_v63 = vmul.f32 %v4939_v58, %v426_v61  ;;  %v766_v2 = vmul.f32 %v4941_v62, %v764_v55 }
 0x6bc   :  { %v428_v4 = vmul.f32 %v4933_v45, %v427_v63  ;;  %v767_v5 = vsub.f32 2.0, %v766_v2 }
 0x6be   :  { %4558 = vmatmul.mubr.msk.f32.vlgmr.msra.gmra.mrb[6].mxu1 %vm169_vm2, %v428_v4  ;;  %v768_v9 = vmul.f32 %v4941_v62, %v767_v5 }
 0x6bf   :  { %4566 = vmatpush3.msra.mxu1 %v601_v6  ;;  %4567 = vmatprep.mubr.msk.f32.mxu1 %vm5031_vm1, %v5030_v41 }
 0x6c0   :  { %4575 = vmatprep.subr.mxu1 %v5030_v41  ;;  %v769_v10 = vmul.f32 %v4935_v49, %v768_v9 }
 0x6c2   :  { %4568 = vmatmul.mubr.msk.f32.vlgmr.msra.gmra.mrb[8].mxu1 %vm169_vm2, %v599_v7 }
 0x6c3   :  { %4576 = vmatpush3.msra.mxu1 %v771_v8  ;;  %4577 = vmatprep.mubr.msk.f32.mxu1 %vm5031_vm1, %v5030_v41  ;;  %v4315_v8 = vld [vmem:[%s5717_s2 + $0x10] sm:$0xff] }
 0x6c4   :  { %4590 = vmatprep.subr.mxu1 %v5030_v41 }
 0x6c6   :  { %4578 = vmatmul.mubr.msk.f32.vlgmr.msra.gmra.mrb[10].mxu1 %vm169_vm2, %v769_v10 }
 0x6c7   :  { %4592 = vmatprep.mubr.msk.f32.mxu1 %vm5031_vm1, %v5030_v41 }
 0x6ca   :  { %4591 = vmatpush3.xpose.msk.msra.mxu1 %vm169_vm2, %v1013_v11 }
 0x6cb   :  { %4595 = vmatprep.subr.mxu1 %v5030_v41 }
 0x6cd   :  { %4593 = vmatmul.mubr.msk.f32.vlgmr.msra.gmra.mrb[12].mxu1 %vm169_vm2, %v1011_v12 }
 0x6ce   :  { %4597 = vmatprep.mubr.msk.f32.mxu1 %vm5031_vm1, %v5030_v41 }
 0x791   :  { %v501_v15 = vpop.f32.mrb[6].mxu1 }
 0x792   :  { %v4559_v16 = vpop.f32.mrb[7].mxu1 }
 0x795   :  { %v672_v17 = vpop.f32.mrb[8].mxu1 }
 0x796   :  { %v4569_v18 = vpop.f32.mrb[9].mxu1  ;;  %4582 = vmatprep.mubr.msk.f32.mxu0 %vm169_vm2, %v672_v17 }
 0x799   :  { %v842_v19 = vpop.f32.mrb[10].mxu1 }
 0x79a   :  { %v4579_v21 = vpop.f32.mrb[11].mxu1  ;;  %4583 = vmatmul.mubr.msk.f32.vlgmr.msra.gmra.mrb[6].mxu0 %vm169_vm2, %v842_v19 }
 0x79b   :  { %4586 = vmatpush3.msra.mxu0 %v505_v14  ;;  %4587 = vmatprep.mubr.msk.f32.mxu0 %vm169_vm2, %v5200_v20 }
 0x79c   :  { %4600 = vmatprep.subr.mxu0 %v5030_v41 }
 0x7a0   :  { %v1084_v22 = vpop.f32.mrb[12].mxu1 }
 0x7a1   :  { %v1088_v23 = vmul.f32 0.35355338, %v1084_v22  ;;  %v4594_v24 = vpop.f32.mrb[13].mxu1 }
 0x7a2   :  { %4588 = vmatmul.mubr.msk.f32.vlgmr.msra.gmra.mrb[6].mxu0 %vm169_vm2, %v501_v15 }
 0x7a3   :  { %4601 = vmatpush3.xpose.msk.msra.mxu0 %vm169_vm2, %v1183_v25  ;;  %v1089_v27 = vsel %vm5164_vm3, %v1088_v23, -1e+30  ;;  %4602 = vmatprep.mubr.msk.f32.mxu0 %vm5031_vm1, %v5030_v41 }
 0x7a4   :  { %v1090_v31 = vsel %vm169_vm2, %v1089_v27, -inf  ;;  %4610 = vmatprep.subr.mxu0 %v4315_v8 }
 0x7a5   :  { %1091 = vmax.xlane.f32.xlu0 %v1090_v31 }
 0x7a6   :  { %4603 = vmatmul.mubr.msk.f32.vlgmr.msra.gmra.mrb[8].mxu0 %vm169_vm2, %v1181_v32 }
 0x7a7   :  { %4611 = vmatpush3.msra.mxu0 %v4315_v8 }
 0x7a8   :  { %4620 = vmatprep.subr.mxu0 %v5030_v41 }
 0x832   :  { %v1092_v20 = vpop.xlane.xlu0 %1091 }
 0x833   :  { %v1093_v33 = vsub.f32 %v1089_v27, %v1092_v20 }
 0x835   :  { %v1094_v34 = vmul.f32 1.442695, %v1093_v33 }
 0x837   :  { %4942 = vpow2.f32 %v1094_v34 }
 0x841   :  { %v4943_v35 = vpop.eup %4942 }
 0x842   :  { %v1096_v36 = vsel %vm169_vm2, %v4943_v35, 0.0 }
 0x843   :  { %1097 = vadd.xlane.f32.xlu0 %v1096_v36 }
 0x879   :  { %v1254_v37 = vpop.f32.mrb[8].mxu0 }
 0x87a   :  { %v1258_v38 = vmul.f32 0.35355338, %v1254_v37  ;;  %v4604_v39 = vpop.f32.mrb[9].mxu0 }
 0x87c   :  { %v1259_v40 = vsel %vm5164_vm3, %v1258_v38, -1e+30 }
 0x87d   :  { %v1260_v43 = vsel %vm169_vm2, %v1259_v40, -inf }
 0x87e   :  { %1261 = vmax.xlane.f32.xlu1 %v1260_v43 }
 0x88f   :  { %1274 = vrot.lane.b32.xlu1 %v5149_v47, %s5039_s25 }
 0x893   :  { %1437 = vrot.lane.b32.xlu1 %v5145_v46, %s5040_s26 }
 0x897   :  { %1435 = vrot.lane.b32.xlu1 %v5145_v46, %s5041_s27 }
 0x89b   :  { %1605 = vrot.lane.b32.xlu1 %v5149_v47, %s5041_s27 }
 0x8d0   :  { %v1098_v52 = vpop.xlane.xlu0 %1097 }
 0x90b   :  { %v1262_v44 = vpop.xlane.xlu1 %1261 }
 0x90c   :  { %v1263_v45 = vsub.f32 %v1259_v40, %v1262_v44 }
 0x90e   :  { %v1264_v48 = vmul.f32 1.442695, %v1263_v45 }
 0x90f   :  { %v1275_v60 = vpop.permute.xlu1 %1274 }
 0x910   :  { %4944 = vpow2.f32 %v1264_v48 }
 0x911   :  { %4946 = vrcp.f32 %v1098_v52 }
 0x913   :  { %v1438_v2 = vpop.permute.xlu1 %1437 }
 0x917   :  { %v1436_v5 = vpop.permute.xlu1 %1435 }
 0x91a   :  { %v4945_v49 = vpop.eup %4944 }
 0x91b   :  { %v1266_v51 = vsel %vm169_vm2, %v4945_v49, 0.0  ;;  %v4947_v53 = vpop.eup %4946  ;;  %v1606_v7 = vpop.permute.xlu1 %1605 }
 0x91c   :  { %1267 = vadd.xlane.f32.xlu0 %v1266_v51  ;;  %v1100_v54 = vmul.f32 %v4947_v53, %v1098_v52 }
 0x91e   :  { %v1101_v55 = vsub.f32 2.0, %v1100_v54  ;;  %v4324_v54 = vld [vmem:[%s5717_s2 + $0x18] sm:$0xff] }
 0x920   :  { %v1102_v56 = vmul.f32 %v4947_v53, %v1101_v55 }
 0x922   :  { %v1103_v58 = vmul.f32 %v4943_v35, %v1102_v56 }
 0x932   :  { %1104 = vrot.lane.b32.xlu0 %v5145_v46, %s5039_s25 }
 0x936   :  { %1607 = vrot.lane.b32.xlu0 %v5149_v47, %s5040_s26 }
 0x9a9   :  { %v1268_v57 = vpop.xlane.xlu0 %1267 }
 0x9aa   :  { %4948 = vrcp.f32 %v1268_v57 }
 0x9ad   :  { %v1105_v59 = vpop.permute.xlu0 %1104 }
 0x9ae   :  { %4596 = vmatpush3.msra.mxu1 %v1105_v59  ;;  %v1864_v59 = vsub.s32 3, %v5116_v26 }
 0x9af   :  { %4598 = vmatmul.mubr.msk.f32.vlgmr.msra.gmra.mrb[14].mxu1 %vm169_vm2, %v1103_v58  ;;  %4605 = vmatprep.subr.mxu1 %v5030_v41 }
 0x9b0   :  { %4606 = vmatpush3.msra.mxu1 %v1275_v60  ;;  %4607 = vmatprep.mubr.msk.f32.mxu1 %vm5031_vm1, %v5030_v41  ;;  %v1865_v60 = vrot.slane %v5124_v29, %v1864_v59 }
 0x9b1   :  { %4615 = vmatprep.subr.mxu1 %v5030_v41  ;;  %v1608_v6 = vpop.permute.xlu0 %1607 }
 0x9b4   :  { %v4949_v61 = vpop.eup %4948 }
 0x9b5   :  { %v1270_v62 = vmul.f32 %v4949_v61, %v1268_v57 }
 0x9b7   :  { %v1271_v63 = vsub.f32 2.0, %v1270_v62 }
 0x9b9   :  { %v1272_v3 = vmul.f32 %v4949_v61, %v1271_v63 }
 0x9bb   :  { %v1273_v4 = vmul.f32 %v4945_v49, %v1272_v3 }
 0x9bd   :  { %4608 = vmatmul.mubr.msk.f32.vlgmr.msra.gmra.mrb[16].mxu1 %vm169_vm2, %v1273_v4 }
 0x9be   :  { %4616 = vmatpush3.xpose.msk.msra.mxu1 %vm169_vm2, %v1438_v2  ;;  %4617 = vmatprep.mubr.msk.f32.mxu1 %vm5031_vm1, %v5030_v41 }
 0x9bf   :  { %4625 = vmatprep.subr.mxu1 %v5030_v41 }
 0x9c1   :  { %4618 = vmatmul.mubr.msk.f32.vlgmr.msra.gmra.mrb[18].mxu1 %vm169_vm2, %v1436_v5 }
 0x9c2   :  { %4626 = vmatpush3.xpose.msk.msra.mxu1 %vm169_vm2, %v1608_v6  ;;  %4627 = vmatprep.mubr.msk.f32.mxu1 %vm5031_vm1, %v5030_v41 }
 0x9c5   :  { %4628 = vmatmul.mubr.msk.f32.vlgmr.msra.gmra.mrb[20].mxu1 %vm169_vm2, %v1606_v7 }
 0xa82   :  { %v1176_v9 = vpop.f32.mrb[14].mxu1 }
 0xa83   :  { %v4599_v10 = vpop.f32.mrb[15].mxu1  ;;  %4612 = vmatprep.mubr.msk.f32.mxu0 %vm169_vm2, %v1176_v9 }
 0xa90   :  { %v1346_v11 = vpop.f32.mrb[16].mxu1 }
 0xa91   :  { %v4609_v12 = vpop.f32.mrb[17].mxu1  ;;  %4613 = vmatmul.mubr.msk.f32.vlgmr.msra.gmra.mrb[6].mxu0 %vm169_vm2, %v1346_v11 }
 0xa92   :  { %4622 = vmatprep.mubr.msk.f32.mxu0 %vm5031_vm1, %v5030_v41 }
 0xa94   :  { %v1509_v13 = vpop.f32.mrb[18].mxu1 }
 0xa95   :  { %v1513_v14 = vmul.f32 0.35355338, %v1509_v13  ;;  %v4619_v15 = vpop.f32.mrb[19].mxu1 }
 0xa96   :  { %v1906_v15 = vld [vmem:[%s5718_s3] sm:$0xff] }
 0xa97   :  { %v1514_v16 = vsel %vm5164_vm3, %v1513_v14, -1e+30 }
 0xa98   :  { %v1679_v17 = vpop.f32.mrb[20].mxu1  ;;  %v1515_v18 = vsel %vm169_vm2, %v1514_v16, -inf }
 0xa99   :  { %v1683_v19 = vmul.f32 0.35355338, %v1679_v17  ;;  %1516 = vmax.xlane.f32.xlu0 %v1515_v18  ;;  %v4629_v21 = vpop.f32.mrb[21].mxu1  ;;  %v1908_v18 = vld [vmem:[%s5718_s3 + $0x10] sm:$0xff] }
 0xa9b   :  { %v1684_v22 = vsel %vm5164_vm3, %v1683_v19, -1e+30  ;;  %v1909_v19 = vld [vmem:[%s5718_s3 + $0x18] sm:$0xff] }
 0xa9c   :  { %v1685_v23 = vsel %vm169_vm2, %v1684_v22, -inf  ;;  %v4834_v21 = vpack.c.bf16 %v1909_v19, %v1908_v18 }
 0xa9d   :  { %1686 = vmax.xlane.f32.xlu1 %v1685_v23  ;;  %v1998_v23 = vld [vmem:[%s5719_s4 + $0x8] sm:$0xff] }
 0xaae   :  { %1699 = vrot.lane.b32.xlu1 %v5149_v47, %s5042_s29 }
 0xb26   :  { %v1517_v24 = vpop.xlane.xlu0 %1516 }
 0xb27   :  { %v1518_v25 = vsub.f32 %v1514_v16, %v1517_v24  ;;  %v1907_v16 = vld [vmem:[%s5718_s3 + $0x8] sm:$0xff]  ;;  %v1999_v24 = vld [vmem:[%s5719_s4 + $0x10] sm:$0xff] }
 0xb28   :  { %v4830_v17 = vpack.c.bf16 %v1907_v16, %v1906_v15 }
 0xb29   :  { %v1519_v27 = vmul.f32 1.442695, %v1518_v25 }
 0xb2a   :  { %v1687_v31 = vpop.xlane.xlu1 %1686  ;;  %4831 = vmatprep.subr.bf16.mxu1 %v4830_v17 }
 0xb2b   :  { %4950 = vpow2.f32 %v1519_v27  ;;  %v1688_v32 = vsub.f32 %v1684_v22, %v1687_v31  ;;  %4833 = vmatpush3.bf16.msra.mxu1 %v4830_v17  ;;  %v1997_v22 = vld [vmem:[%s5719_s4] sm:$0xff]  ;;  %v2000_v27 = vld [vmem:[%s5719_s4 + $0x18] sm:$0xff] }
 0xb2c   :  { %4835 = vmatprep.subr.bf16.mxu1 %v4834_v21  ;;  %v4838_v25 = vpack.c.bf16 %v1998_v23, %v1997_v22  ;;  %v4842_v31 = vpack.c.bf16 %v2000_v27, %v1999_v24  ;;  %v4331_v23 = vld [vmem:[%s5716_s1 + $0x20] sm:$0xff]  ;;  %v4332_v24 = vld [vmem:[%s5716_s1 + $0x28] sm:$0xff]  ;;  %v4333_v27 = vld [vmem:[%s5716_s1 + $0x30] sm:$0xff] }
 0xb2d   :  { %v1689_v20 = vmul.f32 1.442695, %v1688_v32  ;;  %v2001_v32 = vld [vmem:[%s5719_s4 + $0x20] sm:$0xff] }
 0xb2e   :  { %v1700_v52 = vpop.permute.xlu1 %1699 }
 0xb2f   :  { %4952 = vpow2.f32 %v1689_v20  ;;  %4837 = vmatpush3.bf16.msra.mxu1 %v4834_v21  ;;  %v2002_v20 = vld [vmem:[%s5719_s4 + $0x28] sm:$0xff] }
 0xb35   :  { %v4951_v33 = vpop.eup %4950 }
 0xb36   :  { %v1521_v34 = vsel %vm169_vm2, %v4951_v33, 0.0 }
 0xb37   :  { %1522 = vadd.xlane.f32.xlu0 %v1521_v34 }
 0xb39   :  { %v4953_v35 = vpop.eup %4952 }
 0xb3a   :  { %v1691_v36 = vsel %vm169_vm2, %v4953_v35, 0.0 }
 0xb3b   :  { %1692 = vadd.xlane.f32.xlu0 %v1691_v36 }
 0xb51   :  { %1529 = vrot.lane.b32.xlu0 %v5145_v46, %s5042_s29 }
 0xbc4   :  { %v1523_v47 = vpop.xlane.xlu0 %1522 }
 0xbc5   :  { %4954 = vrcp.f32 %v1523_v47 }
 0xbc8   :  { %v1693_v37 = vpop.xlane.xlu0 %1692 }
 0xbc9   :  { %4956 = vrcp.f32 %v1693_v37 }
 0xbcc   :  { %v1530_v38 = vpop.permute.xlu0 %1529 }
 0xbcd   :  { %4621 = vmatpush3.msra.mxu0 %v1530_v38 }
 0xbce   :  { %4630 = vmatprep.subr.mxu0 %v5030_v41 }
 0xbcf   :  { %v4955_v39 = vpop.eup %4954 }
 0xbd0   :  { %v1525_v40 = vmul.f32 %v4955_v39, %v1523_v47 }
 0xbd2   :  { %v1526_v43 = vsub.f32 2.0, %v1525_v40  ;;  %v1902_v40 = vsub.s32 5, %v5116_v26 }
 0xbd3   :  { %v4957_v44 = vpop.eup %4956 }
 0xbd4   :  { %v1527_v45 = vmul.f32 %v4955_v39, %v1526_v43  ;;  %v1695_v48 = vmul.f32 %v4957_v44, %v1693_v37  ;;  %v1896_v39 = vsub.s32 4, %v5116_v26 }
 0xbd6   :  { %v1528_v49 = vmul.f32 %v4951_v33, %v1527_v45  ;;  %v1696_v51 = vsub.f32 2.0, %v1695_v48  ;;  %v4846_v33 = vpack.c.bf16 %v2002_v20, %v2001_v32  ;;  %v1897_v43 = vrot.slane %v5124_v29, %v1896_v39 }
 0xbd8   :  { %v1697_v53 = vmul.f32 %v4957_v44, %v1696_v51  ;;  %4623 = vmatmul.mubr.msk.f32.vlgmr.msra.gmra.mrb[10].mxu0 %vm169_vm2, %v1528_v49  ;;  %v1903_v51 = vrot.slane %v5124_v29, %v1902_v40 }
 0xbd9   :  { %4631 = vmatpush3.msra.mxu0 %v1700_v52  ;;  %4632 = vmatprep.mubr.msk.f32.mxu0 %vm5031_vm1, %v5030_v41 }
 0xbda   :  { %v1698_v46 = vmul.f32 %v4953_v35, %v1697_v53  ;;  %4635 = vmatprep.subr.mxu0 %v4324_v54 }
 0xbdc   :  { %4633 = vmatmul.mubr.msk.f32.vlgmr.msra.gmra.mrb[12].mxu0 %vm169_vm2, %v1698_v46 }
 0xbdd   :  { %4636 = vmatpush3.msra.mxu0 %v4324_v54 }
 0xbde   :  { %4839 = vmatprep.subr.bf16.mxu0 %v4838_v25 }
 0xcab   :  { %v1601_v55 = vpop.f32.mrb[10].mxu0 }
 0xcac   :  { %v4624_v56 = vpop.f32.mrb[11].mxu0  ;;  %4637 = vmatprep.mubr.msk.f32.mxu0 %vm169_vm2, %v1601_v55  ;;  %v2003_v55 = vld [vmem:[%s5719_s4 + $0x30] sm:$0xff] }
 0xcad   :  { %v2004_v56 = vld [vmem:[%s5719_s4 + $0x38] sm:$0xff] }
 0xcaf   :  { %v1771_v57 = vpop.f32.mrb[12].mxu0 }
 0xcb0   :  { %v4634_v58 = vpop.f32.mrb[13].mxu0  ;;  %4638 = vmatmul.mubr.msk.f32.vlgmr.msra.gmra.mrb[6].mxu0 %vm169_vm2, %v1771_v57  ;;  %v4850_v57 = vpack.c.bf16 %v2004_v56, %v2003_v55 }
 0xcb1   :  { %4841 = vmatpush3.bf16.msra.mxu0 %v4838_v25  ;;  %v1912_v58 = vsub.s32 6, %v5116_v26  ;;  %v4854_v25 = vpack.c.bf16 %v4332_v24, %v4331_v23 }
 0xcb2   :  { %4843 = vmatprep.subr.bf16.mxu0 %v4842_v31 }
 0xcb3   :  { %4855 = vmatprep.subr.bf16.mxu1 %v4854_v25 }
 0xcb5   :  { %4845 = vmatpush3.bf16.msra.mxu0 %v4842_v31  ;;  %v4334_v31 = vld [vmem:[%s5716_s1 + $0x38] sm:$0xff] }
 0xcb6   :  { %4847 = vmatprep.subr.bf16.mxu0 %v4846_v33  ;;  %v4858_v32 = vpack.c.bf16 %v4334_v31, %v4333_v27 }
 0xcb9   :  { %4849 = vmatpush3.bf16.msra.mxu0 %v4846_v33 }
 0xcba   :  { %4851 = vmatprep.subr.bf16.mxu0 %v4850_v57 }
 0xcbd   :  { %4853 = vmatpush3.bf16.msra.mxu0 %v4850_v57 }
 0xcbe   :  { %4691 = vmatprep.subr.mxu0 %v5030_v41 }
 0xd83   :  { %v4639_v61 = vpop.f32.mrb[6].mxu0 }
 0xd84   :  { %v1861_v62 = vadd.f32 %v4639_v61, %v5094_v1  ;;  %v1849_v63 = vpop.f32.mrb[7].mxu0 }
 0xd85   :  { %v1860_v2 = vadd.f32 %v1849_v63, %v5089_v0 }
 0xd86   :  { %v5327_v3 = vadd.f32 %v1865_v60, %v1861_v62 }
 0xd87   :  { %v5329_v4 = vadd.f32 %v1865_v60, %v1860_v2  ;;  %v1913_v60 = vrot.slane %v5124_v29, %v1912_v58 }
 0xd88   :  { %v1871_v5 = vsel %vm37_vm0, %v5327_v3, 0.0 }
 0xd89   :  { %1872 = vadd.xlane.f32.xlu0 %v1871_v5  ;;  %v1868_v6 = vsel %vm37_vm0, %v5329_v4, 0.0 }
 0xd8a   :  { %1869 = vadd.xlane.f32.xlu1 %v1868_v6 }
 0xe16   :  { %v1873_v7 = vpop.xlane.xlu0 %1872 }
 0xe17   :  { %v1875_v8 = vmul.f32 0.03125, %v1873_v7  ;;  %v1870_v9 = vpop.xlane.xlu1 %1869  ;;  %v2007_v7 = vsub.s32 7, %v5116_v26 }
 0xe18   :  { %v1874_v10 = vmul.f32 0.03125, %v1870_v9 }
 0xe19   :  { %v1877_v1 = vsub.f32 %v5327_v3, %v1875_v8  ;;  %v2008_v8 = vrot.slane %v5124_v29, %v2007_v7 }
 0xe1a   :  { %v1876_v0 = vsub.f32 %v5329_v4, %v1874_v10 }
 0xe1b   :  { %v1879_v11 = vmul.f32 %v1877_v1, %v1877_v1 }
 0xe1c   :  { %v1878_v12 = vmul.f32 %v1876_v0, %v1876_v0 }
 0xe1d   :  { %v1883_v13 = vsel %vm37_vm0, %v1879_v11, 0.0 }
 0xe1e   :  { %1884 = vadd.xlane.f32.xlu1 %v1883_v13  ;;  %v1880_v14 = vsel %vm37_vm0, %v1878_v12, 0.0 }
 0xe1f   :  { %1881 = vadd.xlane.f32.xlu0 %v1880_v14 }
 0xeab   :  { %v1885_v34 = vpop.xlane.xlu1 %1884 }
 0xeac   :  { %v1887_v35 = vmul.f32 0.03125, %v1885_v34  ;;  %v1882_v36 = vpop.xlane.xlu0 %1881 }
 0xead   :  { %v1886_v47 = vmul.f32 0.03125, %v1882_v36 }
 0xeae   :  { %v1889_v37 = vadd.f32 1e-05, %v1887_v35 }
 0xeaf   :  { %v1888_v38 = vadd.f32 1e-05, %v1886_v47 }
 0xeb0   :  { %4958 = vrsqrt.f32 %v1889_v37  ;;  %v5428_v37 = vld [vmem:[%s5720_s5 + $0x8] sm:$0xff] }
 0xeb1   :  { %4960 = vrsqrt.f32 %v1888_v38  ;;  %v2122_v38 = vrot.slane %v5428_v37, %v5119_v28 }
 0xeba   :  { %v4959_v44 = vpop.eup %4958 }
 0xebb   :  { %v4961_v45 = vpop.eup %4960  ;;  %v1893_v48 = vmul.f32 %v4959_v44, %v1877_v1 }
 0xebc   :  { %v1892_v49 = vmul.f32 %v4961_v45, %v1876_v0 }
 0xebd   :  { %v1899_v52 = vmul.f32 %v1897_v43, %v1893_v48 }
 0xebe   :  { %v1898_v53 = vmul.f32 %v1897_v43, %v1892_v49  ;;  %v2128_v49 = vrot.slane %v5428_v37, %v5127_v30 }
 0xebf   :  { %v1905_v54 = vadd.f32 %v1903_v51, %v1899_v52 }
 0xec0   :  { %v1904_v46 = vadd.f32 %v1903_v51, %v1898_v53 }
 0xec2   :  { %4648 = vmatprep.mubr.msk.f32.mxu1 %vm37_vm0, %v1904_v46 }
 0xec3   :  { %4649 = vmatmul.mubr.msk.f32.vlgmr.msra.gmra.mrb[22].mxu1 %vm37_vm0, %v1905_v54  ;;  %v2139_v54 = vrot.slane %v5428_v37, %v83_v42 }
 0xec4   :  { %4857 = vmatpush3.bf16.msra.mxu1 %v4854_v25 }
 0xec5   :  { %4859 = vmatprep.subr.bf16.mxu1 %v4858_v32 }
 0xec8   :  { %4861 = vmatpush3.bf16.msra.mxu1 %v4858_v32 }
 0xec9   :  { %4681 = vmatprep.subr.mxu1 %v5030_v41 }
 0xf96   :  { %v4650_v61 = vpop.f32.mrb[22].mxu1 }
 0xf97   :  { %v1992_v62 = vadd.f32 %v4650_v61, %v1913_v60  ;;  %v1986_v63 = vpop.f32.mrb[23].mxu1 }
 0xf98   :  { %v1987_v2 = vadd.f32 %v1986_v63, %v1913_v60 }
 0xf99   :  { %v1996_v6 = vmax.f32 %v1992_v62, 0.0 }
 0xf9a   :  { %v1995_v5 = vmax.f32 %v1987_v2, 0.0 }
 0xf9c   :  { %4667 = vmatprep.mubr.msk.f32.mxu0 %vm2009_vm4, %v1995_v5 }
 0xf9d   :  { %4668 = vmatmul.mubr.msk.f32.vlgmr.msra.gmra.mrb[14].mxu0 %vm2009_vm4, %v1996_v6 }
 0xf9e   :  { %4693 = vmatprep.mubr.msk.f32.mxu0 %vm5031_vm1, %v5030_v41 }
0x1070   :  { %v4669_v9 = vpop.f32.mrb[14].mxu0 }
0x1071   :  { %v2088_v10 = vadd.f32 %v4669_v9, %v2008_v8  ;;  %v2082_v1 = vpop.f32.mrb[15].mxu0 }
0x1072   :  { %v2083_v0 = vadd.f32 %v2082_v1, %v2008_v8 }
0x1073   :  { %v5399_v11 = vadd.f32 %v2088_v10, %v5327_v3 }
0x1074   :  { %v5402_v12 = vadd.f32 %v2083_v0, %v5329_v4 }
0x1075   :  { %v2096_v13 = vsel %vm37_vm0, %v5399_v11, 0.0 }
0x1076   :  { %2097 = vadd.xlane.f32.xlu1 %v2096_v13  ;;  %v2093_v14 = vsel %vm37_vm0, %v5402_v12, 0.0 }
0x1077   :  { %2094 = vadd.xlane.f32.xlu0 %v2093_v14 }
0x1103   :  { %v2098_v15 = vpop.xlane.xlu1 %2097 }
0x1104   :  { %v2100_v29 = vmul.f32 0.03125, %v2098_v15  ;;  %v2095_v16 = vpop.xlane.xlu0 %2094 }
0x1105   :  { %v2099_v17 = vmul.f32 0.03125, %v2095_v16 }
0x1106   :  { %v2102_v18 = vsub.f32 %v5399_v11, %v2100_v29 }
0x1107   :  { %v2101_v3 = vsub.f32 %v5402_v12, %v2099_v17 }
0x1108   :  { %v2104_v19 = vmul.f32 %v2102_v18, %v2102_v18 }
0x1109   :  { %v2103_v21 = vmul.f32 %v2101_v3, %v2101_v3 }
0x110a   :  { %v2108_v4 = vsel %vm37_vm0, %v2104_v19, 0.0 }
0x110b   :  { %2109 = vadd.xlane.f32.xlu1 %v2108_v4  ;;  %v2105_v22 = vsel %vm37_vm0, %v2103_v21, 0.0 }
0x110c   :  { %2106 = vadd.xlane.f32.xlu0 %v2105_v22 }
0x1198   :  { %v2110_v20 = vpop.xlane.xlu1 %2109 }
0x1199   :  { %v2112_v33 = vmul.f32 0.03125, %v2110_v20  ;;  %v2107_v34 = vpop.xlane.xlu0 %2106 }
0x119a   :  { %v2111_v35 = vmul.f32 0.03125, %v2107_v34 }
0x119b   :  { %v2114_v36 = vadd.f32 1e-05, %v2112_v33 }
0x119c   :  { %v2113_v47 = vadd.f32 1e-05, %v2111_v35 }
0x119d   :  { %4962 = vrsqrt.f32 %v2114_v36 }
0x119e   :  { %4964 = vrsqrt.f32 %v2113_v47 }
0x11a7   :  { %v4963_v43 = vpop.eup %4962 }
0x11a8   :  { %v4965_v44 = vpop.eup %4964  ;;  %v2118_v45 = vmul.f32 %v4963_v43, %v2102_v18 }
0x11a9   :  { %v2117_v48 = vmul.f32 %v4965_v44, %v2101_v3 }
0x11aa   :  { %v2124_v51 = vmul.f32 %v2122_v38, %v2118_v45 }
0x11ab   :  { %v2123_v52 = vmul.f32 %v2122_v38, %v2117_v48 }
0x11ac   :  { %v2130_v46 = vadd.f32 %v2128_v49, %v2124_v51 }
0x11ad   :  { %v2129_v53 = vadd.f32 %v2128_v49, %v2123_v52 }
0x11af   :  { %4678 = vmatprep.mubr.msk.f32.mxu1 %vm37_vm0, %v2129_v53 }
0x11b0   :  { %4679 = vmatmul.mubr.msk.f32.vlgmr.msra.gmra.mrb[24].mxu1 %vm37_vm0, %v2130_v46 }
0x11b1   :  { %4683 = vmatprep.mubr.msk.f32.mxu1 %vm5031_vm1, %v5030_v41 }
0x1283   :  { %v4680_v55 = vpop.f32.mrb[24].mxu1 }
0x1284   :  { %v5441_v56 = vadd.f32 %v4680_v55, %v2139_v54  ;;  %v2212_v57 = vpop.f32.mrb[25].mxu1 }
0x1285   :  { %v5443_v60 = vadd.f32 %v2212_v57, %v2139_v54 }
0x1286   :  { %2391 = vrot.lane.b32.xlu1 %v5441_v56, %s5032_s14 }
0x1287   :  { %2222 = vrot.lane.b32.xlu0 %v5443_v60, %s5032_s14 }
0x128a   :  { %2563 = vrot.lane.b32.xlu1 %v5443_v60, %s5035_s17 }
0x128b   :  { %2733 = vrot.lane.b32.xlu0 %v5441_v56, %s5035_s17 }
0x128e   :  { %2561 = vrot.lane.b32.xlu1 %v5443_v60, %s5033_s15 }
0x1292   :  { %2731 = vrot.lane.b32.xlu1 %v5441_v56, %s5033_s15 }
0x12f8   :  { %v2392_v42 = vpop.permute.xlu1 %2391 }
0x12f9   :  { %4692 = vmatpush3.xpose.msk.msra.mxu0 %vm169_vm2, %v2392_v42  ;;  %v2223_v61 = vpop.permute.xlu0 %2222 }
0x12fa   :  { %4682 = vmatpush3.xpose.msk.msra.mxu1 %vm169_vm2, %v2223_v61  ;;  %4701 = vmatprep.subr.mxu0 %v5030_v41 }
0x12fb   :  { %4686 = vmatprep.subr.mxu1 %v5030_v41 }
0x12fc   :  { %4694 = vmatmul.mubr.msk.f32.vlgmr.msra.gmra.mrb[16].mxu0 %vm169_vm2, %v5441_v56  ;;  %v2564_v62 = vpop.permute.xlu1 %2563 }
0x12fd   :  { %4684 = vmatmul.mubr.msk.f32.vlgmr.msra.gmra.mrb[26].mxu1 %vm169_vm2, %v5443_v60  ;;  %4702 = vmatpush3.xpose.msk.msra.mxu0 %vm169_vm2, %v2564_v62  ;;  %v2734_v2 = vpop.permute.xlu0 %2733 }
0x12fe   :  { %4703 = vmatprep.mubr.msk.f32.mxu0 %vm5031_vm1, %v5030_v41  ;;  %4711 = vmatprep.subr.mxu0 %v5030_v41 }
0x12ff   :  { %4688 = vmatprep.mubr.msk.f32.mxu1 %vm5031_vm1, %v5030_v41 }
0x1300   :  { %v2562_v63 = vpop.permute.xlu1 %2561 }
0x1301   :  { %4704 = vmatmul.mubr.msk.f32.vlgmr.msra.gmra.mrb[18].mxu0 %vm169_vm2, %v2562_v63 }
0x1302   :  { %4712 = vmatpush3.xpose.msk.msra.mxu0 %vm169_vm2, %v2734_v2  ;;  %4713 = vmatprep.mubr.msk.f32.mxu0 %vm5031_vm1, %v5030_v41 }
0x1304   :  { %v2732_v5 = vpop.permute.xlu1 %2731 }
0x1305   :  { %4714 = vmatmul.mubr.msk.f32.vlgmr.msra.gmra.mrb[20].mxu0 %vm169_vm2, %v2732_v5 }
0x13cf   :  { %v2463_v6 = vpop.f32.mrb[16].mxu0 }
0x13d0   :  { %v2467_v8 = vmul.f32 0.35355338, %v2463_v6  ;;  %v2294_v9 = vpop.f32.mrb[26].mxu1  ;;  %v4695_v10 = vpop.f32.mrb[17].mxu0 }
0x13d1   :  { %v2298_v1 = vmul.f32 0.35355338, %v2294_v9  ;;  %v4685_v0 = vpop.f32.mrb[27].mxu1 }
0x13d2   :  { %v2468_v13 = vsel %vm5164_vm3, %v2467_v8, -1e+30 }
0x13d3   :  { %v2469_v14 = vsel %vm169_vm2, %v2468_v13, -inf  ;;  %v2299_v15 = vsel %vm5164_vm3, %v2298_v1, -1e+30 }
0x13d4   :  { %2470 = vmax.xlane.f32.xlu1 %v2469_v14  ;;  %v2635_v29 = vpop.f32.mrb[18].mxu0  ;;  %v2300_v16 = vsel %vm169_vm2, %v2299_v15, -inf }
0x13d5   :  { %v2639_v17 = vmul.f32 0.35355338, %v2635_v29  ;;  %v4705_v18 = vpop.f32.mrb[19].mxu0  ;;  %2301 = vmax.xlane.f32.xlu0 %v2300_v16 }
0x13d7   :  { %v2640_v3 = vsel %vm5164_vm3, %v2639_v17, -1e+30 }
0x13d8   :  { %v2805_v19 = vpop.f32.mrb[20].mxu0  ;;  %v2641_v21 = vsel %vm169_vm2, %v2640_v3, -inf }
0x13d9   :  { %v2809_v4 = vmul.f32 0.35355338, %v2805_v19  ;;  %2642 = vmax.xlane.f32.xlu0 %v2641_v21  ;;  %v4715_v22 = vpop.f32.mrb[21].mxu0 }
0x13db   :  { %v2810_v23 = vsel %vm5164_vm3, %v2809_v4, -1e+30 }
0x13dc   :  { %v2811_v24 = vsel %vm169_vm2, %v2810_v23, -inf }
0x13dd   :  { %2812 = vmax.xlane.f32.xlu0 %v2811_v24 }
0x1461   :  { %v2471_v25 = vpop.xlane.xlu1 %2470 }
0x1462   :  { %v2472_v27 = vsub.f32 %v2468_v13, %v2471_v25  ;;  %v2302_v31 = vpop.xlane.xlu0 %2301 }
0x1463   :  { %v2303_v32 = vsub.f32 %v2299_v15, %v2302_v31  ;;  %v4343_v31 = vld [vmem:[%s5717_s2 + $0x20] sm:$0xff] }
0x1464   :  { %v2473_v20 = vmul.f32 1.442695, %v2472_v27  ;;  %v4350_v27 = vld [vmem:[%s5717_s2 + $0x28] sm:$0xff] }
0x1465   :  { %v2304_v33 = vmul.f32 1.442695, %v2303_v32  ;;  %4721 = vmatprep.subr.mxu0 %v4350_v27 }
0x1466   :  { %4966 = vpow2.f32 %v2473_v20  ;;  %v2643_v34 = vpop.xlane.xlu0 %2642  ;;  %4722 = vmatpush3.msra.mxu0 %v4350_v27 }
0x1467   :  { %4968 = vpow2.f32 %v2304_v33  ;;  %v2644_v35 = vsub.f32 %v2640_v3, %v2643_v34  ;;  %4726 = vmatprep.subr.mxu0 %v4343_v31 }
0x1469   :  { %v2645_v36 = vmul.f32 1.442695, %v2644_v35 }
0x146a   :  { %v2813_v49 = vpop.xlane.xlu0 %2812 }
0x146b   :  { %4970 = vpow2.f32 %v2645_v36  ;;  %v2814_v51 = vsub.f32 %v2810_v23, %v2813_v49 }
0x146d   :  { %v2815_v52 = vmul.f32 1.442695, %v2814_v51 }
0x146f   :  { %4972 = vpow2.f32 %v2815_v52 }
0x1470   :  { %v4967_v47 = vpop.eup %4966 }
0x1471   :  { %v4969_v38 = vpop.eup %4968  ;;  %v2475_v43 = vsel %vm169_vm2, %v4967_v47, 0.0 }
0x1472   :  { %2476 = vadd.xlane.f32.xlu1 %v2475_v43  ;;  %v2306_v44 = vsel %vm169_vm2, %v4969_v38, 0.0 }
0x1473   :  { %2307 = vadd.xlane.f32.xlu0 %v2306_v44 }
0x1475   :  { %v4971_v45 = vpop.eup %4970 }
0x1476   :  { %v2647_v48 = vsel %vm169_vm2, %v4971_v45, 0.0 }
0x1477   :  { %2648 = vadd.xlane.f32.xlu0 %v2647_v48 }
0x1479   :  { %v4973_v53 = vpop.eup %4972 }
0x147a   :  { %v2817_v46 = vsel %vm169_vm2, %v4973_v53, 0.0 }
0x1483   :  { %2483 = vrot.lane.b32.xlu1 %v5441_v56, %s5034_s16 }
0x1487   :  { %2655 = vrot.lane.b32.xlu1 %v5443_v60, %s5036_s18 }
0x148d   :  { %2314 = vrot.lane.b32.xlu0 %v5443_v60, %s5034_s16 }
0x1491   :  { %3067 = vrot.lane.b32.xlu0 %v5443_v60, %s5037_s19 }
0x1495   :  { %3237 = vrot.lane.b32.xlu0 %v5441_v56, %s5037_s19 }
0x14ab   :  { %2818 = vadd.xlane.f32.xlu1 %v2817_v46 }
0x14bc   :  { %2825 = vrot.lane.b32.xlu1 %v5441_v56, %s5036_s18 }
0x14c0   :  { %3065 = vrot.lane.b32.xlu1 %v5443_v60, %s5038_s20 }
0x14c4   :  { %3235 = vrot.lane.b32.xlu1 %v5441_v56, %s5038_s20 }
0x14ff   :  { %v2477_v54 = vpop.xlane.xlu1 %2476 }
0x1500   :  { %4974 = vrcp.f32 %v2477_v54  ;;  %v2308_v55 = vpop.xlane.xlu0 %2307 }
0x1501   :  { %4976 = vrcp.f32 %v2308_v55 }
0x1503   :  { %v2484_v13 = vpop.permute.xlu1 %2483 }
0x1504   :  { %v2649_v57 = vpop.xlane.xlu0 %2648 }
0x1505   :  { %4978 = vrcp.f32 %v2649_v57 }
0x1507   :  { %v2656_v16 = vpop.permute.xlu1 %2655 }
0x1508   :  { %v2315_v42 = vpop.permute.xlu0 %2314 }
0x1509   :  { %4687 = vmatpush3.msra.mxu1 %v2315_v42 }
0x150a   :  { %v4975_v61 = vpop.eup %4974  ;;  %4696 = vmatprep.subr.mxu1 %v5030_v41 }
0x150b   :  { %v4977_v62 = vpop.eup %4976  ;;  %v2479_v63 = vmul.f32 %v4975_v61, %v2477_v54 }
0x150c   :  { %v2310_v2 = vmul.f32 %v4977_v62, %v2308_v55  ;;  %v3068_v24 = vpop.permute.xlu0 %3067 }
0x150d   :  { %v2480_v5 = vsub.f32 2.0, %v2479_v63 }
0x150e   :  { %v2311_v6 = vsub.f32 2.0, %v2310_v2 }
0x150f   :  { %v4979_v8 = vpop.eup %4978  ;;  %v2481_v1 = vmul.f32 %v4975_v61, %v2480_v5 }
0x1510   :  { %v2312_v9 = vmul.f32 %v4977_v62, %v2311_v6  ;;  %v2651_v10 = vmul.f32 %v4979_v8, %v2649_v57  ;;  %v3238_v51 = vpop.permute.xlu0 %3237 }
0x1511   :  { %v2482_v15 = vmul.f32 %v4967_v47, %v2481_v1 }
0x1512   :  { %v2313_v0 = vmul.f32 %v4969_v38, %v2312_v9  ;;  %v2652_v14 = vsub.f32 2.0, %v2651_v10 }
0x1514   :  { %4689 = vmatmul.mubr.msk.f32.vlgmr.msra.gmra.mrb[28].mxu1 %vm169_vm2, %v2313_v0  ;;  %v2653_v29 = vmul.f32 %v4979_v8, %v2652_v14 }
0x1515   :  { %4697 = vmatpush3.msra.mxu1 %v2484_v13  ;;  %4698 = vmatprep.mubr.msk.f32.mxu1 %vm5031_vm1, %v5030_v41 }
0x1516   :  { %4706 = vmatprep.subr.mxu1 %v5030_v41  ;;  %v2654_v17 = vmul.f32 %v4971_v45, %v2653_v29 }
0x1518   :  { %4699 = vmatmul.mubr.msk.f32.vlgmr.msra.gmra.mrb[30].mxu1 %vm169_vm2, %v2482_v15 }
0x1519   :  { %4707 = vmatpush3.msra.mxu1 %v2656_v16  ;;  %4708 = vmatprep.mubr.msk.f32.mxu1 %vm5031_vm1, %v5030_v41 }
0x151a   :  { %4716 = vmatprep.subr.mxu1 %v5030_v41 }
0x151c   :  { %4709 = vmatmul.mubr.msk.f32.vlgmr.msra.gmra.mrb[32].mxu1 %vm169_vm2, %v2654_v17 }
0x151d   :  { %4718 = vmatprep.mubr.msk.f32.mxu1 %vm5031_vm1, %v5030_v41 }
0x1538   :  { %v2819_v18 = vpop.xlane.xlu1 %2818 }
0x1539   :  { %4980 = vrcp.f32 %v2819_v18 }
0x153c   :  { %v2826_v3 = vpop.permute.xlu1 %2825 }
0x153d   :  { %4717 = vmatpush3.msra.mxu1 %v2826_v3 }
0x153e   :  { %4731 = vmatprep.subr.mxu1 %v5030_v41 }
0x1540   :  { %v3066_v25 = vpop.permute.xlu1 %3065 }
0x1543   :  { %v4981_v19 = vpop.eup %4980 }
0x1544   :  { %v2821_v21 = vmul.f32 %v4981_v19, %v2819_v18  ;;  %v3236_v52 = vpop.permute.xlu1 %3235 }
0x1546   :  { %v2822_v4 = vsub.f32 2.0, %v2821_v21 }
0x1548   :  { %v2823_v22 = vmul.f32 %v4981_v19, %v2822_v4 }
0x154a   :  { %v2824_v23 = vmul.f32 %v4973_v53, %v2823_v22 }
0x154c   :  { %4719 = vmatmul.mubr.msk.f32.vlgmr.msra.gmra.mrb[34].mxu1 %vm169_vm2, %v2824_v23 }
0x154d   :  { %4732 = vmatpush3.xpose.msk.msra.mxu1 %vm169_vm2, %v3068_v24  ;;  %4733 = vmatprep.mubr.msk.f32.mxu1 %vm5031_vm1, %v5030_v41 }
0x154e   :  { %4736 = vmatprep.subr.mxu1 %v5030_v41 }
0x1550   :  { %4734 = vmatmul.mubr.msk.f32.vlgmr.msra.gmra.mrb[36].mxu1 %vm169_vm2, %v3066_v25 }
0x1551   :  { %4738 = vmatprep.mubr.msk.f32.mxu1 %vm5031_vm1, %v5030_v41 }
0x15e7   :  { %v2386_v32 = vpop.f32.mrb[28].mxu1 }
0x15e8   :  { %v4690_v20 = vpop.f32.mrb[29].mxu1 }
0x15eb   :  { %v2555_v33 = vpop.f32.mrb[30].mxu1 }
0x15ec   :  { %v4700_v34 = vpop.f32.mrb[31].mxu1 }
0x15ef   :  { %v2727_v35 = vpop.f32.mrb[32].mxu1 }
0x15f0   :  { %v4710_v36 = vpop.f32.mrb[33].mxu1  ;;  %4723 = vmatprep.mubr.msk.f32.mxu0 %vm169_vm2, %v2727_v35 }
0x161f   :  { %v2897_v47 = vpop.f32.mrb[34].mxu1 }
0x1620   :  { %v4720_v38 = vpop.f32.mrb[35].mxu1  ;;  %4724 = vmatmul.mubr.msk.f32.vlgmr.msra.gmra.mrb[22].mxu0 %vm169_vm2, %v2897_v47 }
0x1621   :  { %4727 = vmatpush3.msra.mxu0 %v4343_v31  ;;  %4728 = vmatprep.mubr.msk.f32.mxu0 %vm169_vm2, %v2386_v32  ;;  %v4361_v31 = vld [vmem:[%s5717_s2 + $0x30] sm:$0xff] }
0x1622   :  { %4741 = vmatprep.subr.mxu0 %v5030_v41 }
0x1623   :  { %v3139_v43 = vpop.f32.mrb[36].mxu1 }
0x1624   :  { %v3143_v44 = vmul.f32 0.35355338, %v3139_v43  ;;  %v4735_v45 = vpop.f32.mrb[37].mxu1 }
0x1626   :  { %v3144_v48 = vsel %vm5164_vm3, %v3143_v44, -1e+30 }
0x1627   :  { %v3145_v49 = vsel %vm169_vm2, %v3144_v48, -inf }
0x1628   :  { %4729 = vmatmul.mubr.msk.f32.vlgmr.msra.gmra.mrb[22].mxu0 %vm169_vm2, %v2555_v33  ;;  %3146 = vmax.xlane.f32.xlu0 %v3145_v49 }
0x1629   :  { %4742 = vmatpush3.xpose.msk.msra.mxu0 %vm169_vm2, %v3238_v51  ;;  %4743 = vmatprep.mubr.msk.f32.mxu0 %vm5031_vm1, %v5030_v41 }
0x162a   :  { %4751 = vmatprep.subr.mxu0 %v4361_v31 }
0x162c   :  { %4744 = vmatmul.mubr.msk.f32.vlgmr.msra.gmra.mrb[24].mxu0 %vm169_vm2, %v3236_v52 }
0x162d   :  { %4752 = vmatpush3.msra.mxu0 %v4361_v31 }
0x162e   :  { %4761 = vmatprep.subr.mxu0 %v5030_v41 }
0x16b5   :  { %v3147_v53 = vpop.xlane.xlu0 %3146 }
0x16b6   :  { %v3148_v46 = vsub.f32 %v3144_v48, %v3147_v53 }
0x16b8   :  { %v3149_v54 = vmul.f32 1.442695, %v3148_v46 }
0x16ba   :  { %4982 = vpow2.f32 %v3149_v54 }
0x16c4   :  { %v4983_v55 = vpop.eup %4982 }
0x16c5   :  { %v3151_v57 = vsel %vm169_vm2, %v4983_v55, 0.0 }
0x16c6   :  { %3152 = vadd.xlane.f32.xlu0 %v3151_v57 }
0x16ff   :  { %v3309_v42 = vpop.f32.mrb[24].mxu0 }
0x1700   :  { %v3313_v61 = vmul.f32 0.35355338, %v3309_v42  ;;  %v4745_v62 = vpop.f32.mrb[25].mxu0 }
0x1702   :  { %v3314_v63 = vsel %vm5164_vm3, %v3313_v61, -1e+30 }
0x1703   :  { %v3315_v2 = vsel %vm169_vm2, %v3314_v63, -inf }
0x1704   :  { %3316 = vmax.xlane.f32.xlu1 %v3315_v2 }
0x1715   :  { %3329 = vrot.lane.b32.xlu1 %v5441_v56, %s5039_s25 }
0x1719   :  { %3492 = vrot.lane.b32.xlu1 %v5443_v60, %s5040_s26 }
0x171d   :  { %3490 = vrot.lane.b32.xlu1 %v5443_v60, %s5041_s27 }
0x1721   :  { %3660 = vrot.lane.b32.xlu1 %v5441_v56, %s5041_s27 }
0x1753   :  { %v3153_v1 = vpop.xlane.xlu0 %3152 }
0x1791   :  { %v3317_v5 = vpop.xlane.xlu1 %3316 }
0x1792   :  { %v3318_v6 = vsub.f32 %v3314_v63, %v3317_v5 }
0x1794   :  { %v3319_v8 = vmul.f32 1.442695, %v3318_v6 }
0x1795   :  { %v3330_v18 = vpop.permute.xlu1 %3329 }
0x1796   :  { %4984 = vpow2.f32 %v3319_v8 }
0x1797   :  { %4986 = vrcp.f32 %v3153_v1 }
0x1799   :  { %v3493_v4 = vpop.permute.xlu1 %3492 }
0x179d   :  { %v3491_v24 = vpop.permute.xlu1 %3490 }
0x17a0   :  { %v4985_v9 = vpop.eup %4984 }
0x17a1   :  { %v3321_v10 = vsel %vm169_vm2, %v4985_v9, 0.0  ;;  %v4987_v0 = vpop.eup %4986  ;;  %v3661_v27 = vpop.permute.xlu1 %3660 }
0x17a2   :  { %3322 = vadd.xlane.f32.xlu0 %v3321_v10  ;;  %v3155_v13 = vmul.f32 %v4987_v0, %v3153_v1 }
0x17a4   :  { %v3156_v14 = vsub.f32 2.0, %v3155_v13 }
0x17a6   :  { %v3157_v15 = vmul.f32 %v4987_v0, %v3156_v14 }
0x17a8   :  { %v3158_v16 = vmul.f32 %v4983_v55, %v3157_v15 }
0x17b8   :  { %3159 = vrot.lane.b32.xlu0 %v5443_v60, %s5039_s25 }
0x17bc   :  { %3662 = vrot.lane.b32.xlu0 %v5441_v56, %s5040_s26 }
0x182f   :  { %v3323_v29 = vpop.xlane.xlu0 %3322 }
0x1830   :  { %4988 = vrcp.f32 %v3323_v29 }
0x1833   :  { %v3160_v17 = vpop.permute.xlu0 %3159 }
0x1834   :  { %4737 = vmatpush3.msra.mxu1 %v3160_v17 }
0x1835   :  { %4739 = vmatmul.mubr.msk.f32.vlgmr.msra.gmra.mrb[38].mxu1 %vm169_vm2, %v3158_v16  ;;  %4746 = vmatprep.subr.mxu1 %v5030_v41 }
0x1836   :  { %4747 = vmatpush3.msra.mxu1 %v3330_v18  ;;  %4748 = vmatprep.mubr.msk.f32.mxu1 %vm5031_vm1, %v5030_v41 }
0x1837   :  { %4756 = vmatprep.subr.mxu1 %v5030_v41  ;;  %v3663_v25 = vpop.permute.xlu0 %3662 }
0x183a   :  { %v4989_v3 = vpop.eup %4988 }
0x183b   :  { %v3325_v19 = vmul.f32 %v4989_v3, %v3323_v29  ;;  %v4370_v29 = vld [vmem:[%s5717_s2 + $0x38] sm:$0xff] }
0x183d   :  { %v3326_v21 = vsub.f32 2.0, %v3325_v19 }
0x183f   :  { %v3327_v22 = vmul.f32 %v4989_v3, %v3326_v21 }
0x1841   :  { %v3328_v23 = vmul.f32 %v4985_v9, %v3327_v22 }
0x1843   :  { %4749 = vmatmul.mubr.msk.f32.vlgmr.msra.gmra.mrb[40].mxu1 %vm169_vm2, %v3328_v23 }
0x1844   :  { %4757 = vmatpush3.xpose.msk.msra.mxu1 %vm169_vm2, %v3493_v4  ;;  %4758 = vmatprep.mubr.msk.f32.mxu1 %vm5031_vm1, %v5030_v41 }
0x1845   :  { %4766 = vmatprep.subr.mxu1 %v5030_v41 }
0x1847   :  { %4759 = vmatmul.mubr.msk.f32.vlgmr.msra.gmra.mrb[42].mxu1 %vm169_vm2, %v3491_v24 }
0x1848   :  { %4767 = vmatpush3.xpose.msk.msra.mxu1 %vm169_vm2, %v3663_v25  ;;  %4768 = vmatprep.mubr.msk.f32.mxu1 %vm5031_vm1, %v5030_v41 }
0x184b   :  { %4769 = vmatmul.mubr.msk.f32.vlgmr.msra.gmra.mrb[44].mxu1 %vm169_vm2, %v3661_v27 }
0x1908   :  { %v3231_v32 = vpop.f32.mrb[38].mxu1 }
0x1909   :  { %v4740_v20 = vpop.f32.mrb[39].mxu1  ;;  %4753 = vmatprep.mubr.msk.f32.mxu0 %vm169_vm2, %v3231_v32 }
0x1916   :  { %v3401_v33 = vpop.f32.mrb[40].mxu1 }
0x1917   :  { %v4750_v34 = vpop.f32.mrb[41].mxu1  ;;  %4754 = vmatmul.mubr.msk.f32.vlgmr.msra.gmra.mrb[22].mxu0 %vm169_vm2, %v3401_v33 }
0x1918   :  { %4763 = vmatprep.mubr.msk.f32.mxu0 %vm5031_vm1, %v5030_v41 }
0x191a   :  { %v3564_v35 = vpop.f32.mrb[42].mxu1 }
0x191b   :  { %v3568_v36 = vmul.f32 0.35355338, %v3564_v35  ;;  %v4760_v47 = vpop.f32.mrb[43].mxu1 }
0x191c   :  { %v4373_v47 = vld [vmem:[%s5718_s3 + $0x20] sm:$0xff] }
0x191d   :  { %v3569_v38 = vsel %vm5164_vm3, %v3568_v36, -1e+30 }
0x191e   :  { %v3734_v43 = vpop.f32.mrb[44].mxu1  ;;  %v3570_v44 = vsel %vm169_vm2, %v3569_v38, -inf }
0x191f   :  { %v3738_v45 = vmul.f32 0.35355338, %v3734_v43  ;;  %3571 = vmax.xlane.f32.xlu0 %v3570_v44  ;;  %v4770_v48 = vpop.f32.mrb[45].mxu1  ;;  %v4375_v44 = vld [vmem:[%s5718_s3 + $0x30] sm:$0xff] }
0x1921   :  { %v3739_v49 = vsel %vm5164_vm3, %v3738_v45, -1e+30  ;;  %v4376_v45 = vld [vmem:[%s5718_s3 + $0x38] sm:$0xff] }
0x1922   :  { %v3740_v51 = vsel %vm169_vm2, %v3739_v49, -inf  ;;  %v4866_v48 = vpack.c.bf16 %v4376_v45, %v4375_v44 }
0x1923   :  { %3741 = vmax.xlane.f32.xlu1 %v3740_v51  ;;  %v4380_v51 = vld [vmem:[%s5719_s4 + $0x48] sm:$0xff] }
0x1934   :  { %3754 = vrot.lane.b32.xlu1 %v5441_v56, %s5042_s29 }
0x19ac   :  { %v3572_v52 = vpop.xlane.xlu0 %3571 }
0x19ad   :  { %v3573_v53 = vsub.f32 %v3569_v38, %v3572_v52  ;;  %v4374_v38 = vld [vmem:[%s5718_s3 + $0x28] sm:$0xff]  ;;  %v4381_v52 = vld [vmem:[%s5719_s4 + $0x50] sm:$0xff] }
0x19ae   :  { %v4862_v43 = vpack.c.bf16 %v4374_v38, %v4373_v47  ;;  %v4189_v38 = vld [vmem:[%s5721_s6 + $0x10] sm:$0xff] }
0x19af   :  { %v3574_v46 = vmul.f32 1.442695, %v3573_v53 }
0x19b0   :  { %v3742_v54 = vpop.xlane.xlu1 %3741  ;;  %4863 = vmatprep.subr.bf16.mxu1 %v4862_v43 }
0x19b1   :  { %4990 = vpow2.f32 %v3574_v46  ;;  %v3743_v55 = vsub.f32 %v3739_v49, %v3742_v54  ;;  %4865 = vmatpush3.bf16.msra.mxu1 %v4862_v43  ;;  %v4379_v49 = vld [vmem:[%s5719_s4 + $0x40] sm:$0xff]  ;;  %v4382_v46 = vld [vmem:[%s5719_s4 + $0x58] sm:$0xff] }
0x19b2   :  { %4867 = vmatprep.subr.bf16.mxu1 %v4866_v48  ;;  %v4870_v53 = vpack.c.bf16 %v4380_v51, %v4379_v49  ;;  %v4874_v54 = vpack.c.bf16 %v4382_v46, %v4381_v52  ;;  %v4190_v43 = vld [vmem:[%s5721_s6 + $0x18] sm:$0xff]  ;;  %v31_v46 = vld [vmem:[%s5720_s5 + $0x10] sm:$0xff] }
0x19b3   :  { %v3744_v57 = vmul.f32 1.442695, %v3743_v55  ;;  %v4383_v55 = vld [vmem:[%s5719_s4 + $0x60] sm:$0xff]  ;;  %v4890_v44 = vpack.c.bf16 %v4190_v43, %v4189_v38 }
0x19b4   :  { %v3755_v14 = vpop.permute.xlu1 %3754 }
0x19b5   :  { %4992 = vpow2.f32 %v3744_v57  ;;  %4869 = vmatpush3.bf16.msra.mxu1 %v4866_v48  ;;  %v4384_v57 = vld [vmem:[%s5719_s4 + $0x68] sm:$0xff] }
0x19bb   :  { %v4991_v42 = vpop.eup %4990 }
0x19bc   :  { %v3576_v61 = vsel %vm169_vm2, %v4991_v42, 0.0 }
0x19bd   :  { %3577 = vadd.xlane.f32.xlu0 %v3576_v61 }
0x19bf   :  { %v4993_v50 = vpop.eup %4992 }
0x19c0   :  { %v3746_v62 = vsel %vm169_vm2, %v4993_v50, 0.0 }
0x19c1   :  { %3747 = vadd.xlane.f32.xlu0 %v3746_v62 }
0x19d7   :  { %3584 = vrot.lane.b32.xlu0 %v5443_v60, %s5042_s29 }
0x1a4a   :  { %v3578_v56 = vpop.xlane.xlu0 %3577 }
0x1a4b   :  { %4994 = vrcp.f32 %v3578_v56 }
0x1a4e   :  { %v3748_v63 = vpop.xlane.xlu0 %3747 }
0x1a4f   :  { %4996 = vrcp.f32 %v3748_v63 }
0x1a52   :  { %v3585_v2 = vpop.permute.xlu0 %3584 }
0x1a53   :  { %4762 = vmatpush3.msra.mxu0 %v3585_v2 }
0x1a54   :  { %4771 = vmatprep.subr.mxu0 %v5030_v41 }
0x1a55   :  { %v4995_v5 = vpop.eup %4994 }
0x1a56   :  { %v3580_v6 = vmul.f32 %v4995_v5, %v3578_v56 }
0x1a58   :  { %v3581_v8 = vsub.f32 2.0, %v3580_v6 }
0x1a59   :  { %v4997_v9 = vpop.eup %4996 }
0x1a5a   :  { %v3582_v10 = vmul.f32 %v4995_v5, %v3581_v8  ;;  %v3750_v1 = vmul.f32 %v4997_v9, %v3748_v63  ;;  %v3952_v5 = vrot.slane %v5428_v37, %v1896_v39  ;;  %v4385_v39 = vld [vmem:[%s5719_s4 + $0x70] sm:$0xff] }
0x1a5c   :  { %v3583_v0 = vmul.f32 %v4991_v42, %v3582_v10  ;;  %v3751_v13 = vsub.f32 2.0, %v3750_v1  ;;  %v4878_v42 = vpack.c.bf16 %v4384_v57, %v4383_v55  ;;  %v3958_v1 = vrot.slane %v5428_v37, %v1902_v40 }
0x1a5d   :  { %v3969_v40 = vrot.slane %v5428_v37, %v1912_v58 }
0x1a5e   :  { %v3752_v15 = vmul.f32 %v4997_v9, %v3751_v13  ;;  %4764 = vmatmul.mubr.msk.f32.vlgmr.msra.gmra.mrb[26].mxu0 %vm169_vm2, %v3583_v0 }
0x1a5f   :  { %4772 = vmatpush3.msra.mxu0 %v3755_v14  ;;  %4773 = vmatprep.mubr.msk.f32.mxu0 %vm5031_vm1, %v5030_v41  ;;  %v3920_v41 = vrot.slane %v5428_v37, %v1864_v59 }
0x1a60   :  { %v3753_v60 = vmul.f32 %v4993_v50, %v3752_v15  ;;  %4776 = vmatprep.subr.mxu0 %v4370_v29 }
0x1a62   :  { %4774 = vmatmul.mubr.msk.f32.vlgmr.msra.gmra.mrb[28].mxu0 %vm169_vm2, %v3753_v60  ;;  %v4386_v60 = vld [vmem:[%s5719_s4 + $0x78] sm:$0xff] }
0x1a63   :  { %4777 = vmatpush3.msra.mxu0 %v4370_v29  ;;  %v4882_v29 = vpack.c.bf16 %v4386_v60, %v4385_v39 }
0x1a64   :  { %4871 = vmatprep.subr.bf16.mxu0 %v4870_v53 }
0x1b31   :  { %v3656_v16 = vpop.f32.mrb[26].mxu0 }
0x1b32   :  { %v4765_v17 = vpop.f32.mrb[27].mxu0  ;;  %4778 = vmatprep.mubr.msk.f32.mxu0 %vm169_vm2, %v3656_v16 }
0x1b35   :  { %v3826_v18 = vpop.f32.mrb[28].mxu0 }
0x1b36   :  { %v4775_v3 = vpop.f32.mrb[29].mxu0  ;;  %4779 = vmatmul.mubr.msk.f32.vlgmr.msra.gmra.mrb[22].mxu0 %vm169_vm2, %v3826_v18 }
0x1b37   :  { %4873 = vmatpush3.bf16.msra.mxu0 %v4870_v53 }
0x1b38   :  { %4875 = vmatprep.subr.bf16.mxu0 %v4874_v54 }
0x1b3b   :  { %4877 = vmatpush3.bf16.msra.mxu0 %v4874_v54  ;;  %v4178_v54 = vrot.slane %v31_v46, %v5119_v28 }
0x1b3c   :  { %4879 = vmatprep.subr.bf16.mxu0 %v4878_v42 }
0x1b3f   :  { %4881 = vmatpush3.bf16.msra.mxu0 %v4878_v42 }
0x1b40   :  { %4883 = vmatprep.subr.bf16.mxu0 %v4882_v29 }
0x1b43   :  { %4885 = vmatpush3.bf16.msra.mxu0 %v4882_v29 }
0x1c09   :  { %v4780_v19 = vpop.f32.mrb[22].mxu0 }
0x1c0a   :  { %v3916_v21 = vadd.f32 %v4780_v19, %v5399_v11  ;;  %v3904_v4 = vpop.f32.mrb[23].mxu0 }
0x1c0b   :  { %v3915_v22 = vadd.f32 %v3904_v4, %v5402_v12 }
0x1c0c   :  { %v5614_v23 = vadd.f32 %v3920_v41, %v3916_v21  ;;  %v4065_v21 = vrot.slane %v5428_v37, %v2007_v7 }
0x1c0d   :  { %v5616_v24 = vadd.f32 %v3920_v41, %v3915_v22 }
0x1c0e   :  { %v3926_v25 = vsel %vm37_vm0, %v5614_v23, 0.0 }
0x1c0f   :  { %3927 = vadd.xlane.f32.xlu0 %v3926_v25  ;;  %v3923_v27 = vsel %vm37_vm0, %v5616_v24, 0.0 }
0x1c10   :  { %3924 = vadd.xlane.f32.xlu1 %v3923_v27 }
0x1c9c   :  { %v3928_v31 = vpop.xlane.xlu0 %3927 }
0x1c9d   :  { %v3930_v59 = vmul.f32 0.03125, %v3928_v31  ;;  %v3925_v32 = vpop.xlane.xlu1 %3924 }
0x1c9e   :  { %v3929_v20 = vmul.f32 0.03125, %v3925_v32 }
0x1c9f   :  { %v3932_v11 = vsub.f32 %v5614_v23, %v3930_v59 }
0x1ca0   :  { %v3931_v12 = vsub.f32 %v5616_v24, %v3929_v20 }
0x1ca1   :  { %v3934_v33 = vmul.f32 %v3932_v11, %v3932_v11 }
0x1ca2   :  { %v3933_v34 = vmul.f32 %v3931_v12, %v3931_v12 }
0x1ca3   :  { %v3938_v35 = vsel %vm37_vm0, %v3934_v33, 0.0 }
0x1ca4   :  { %3939 = vadd.xlane.f32.xlu1 %v3938_v35  ;;  %v3935_v36 = vsel %vm37_vm0, %v3933_v34, 0.0 }
0x1ca5   :  { %3936 = vadd.xlane.f32.xlu0 %v3935_v36  ;;  %v4188_v36 = vld [vmem:[%s5721_s6 + $0x8] sm:$0xff] }
0x1d31   :  { %v3940_v61 = vpop.xlane.xlu1 %3939 }
0x1d32   :  { %v3942_v50 = vmul.f32 0.03125, %v3940_v61  ;;  %v3937_v62 = vpop.xlane.xlu0 %3936 }
0x1d33   :  { %v3941_v56 = vmul.f32 0.03125, %v3937_v62 }
0x1d34   :  { %v3944_v63 = vadd.f32 1e-05, %v3942_v50  ;;  %v4184_v50 = vrot.slane %v31_v46, %v5127_v30 }
0x1d35   :  { %v3943_v2 = vadd.f32 1e-05, %v3941_v56 }
0x1d36   :  { %4998 = vrsqrt.f32 %v3944_v63 }
0x1d37   :  { %5000 = vrsqrt.f32 %v3943_v2 }
0x1d40   :  { %v4999_v6 = vpop.eup %4998 }
0x1d41   :  { %v5001_v8 = vpop.eup %5000  ;;  %v3948_v9 = vmul.f32 %v4999_v6, %v3932_v11 }
0x1d42   :  { %v3947_v10 = vmul.f32 %v5001_v8, %v3931_v12 }
0x1d43   :  { %v3954_v0 = vmul.f32 %v3952_v5, %v3948_v9 }
0x1d44   :  { %v3953_v13 = vmul.f32 %v3952_v5, %v3947_v10 }
0x1d45   :  { %v3960_v15 = vadd.f32 %v3958_v1, %v3954_v0 }
0x1d46   :  { %v3959_v14 = vadd.f32 %v3958_v1, %v3953_v13 }
0x1d48   :  { %4789 = vmatprep.mubr.msk.f32.mxu1 %vm37_vm0, %v3959_v14 }
0x1d49   :  { %4790 = vmatmul.mubr.msk.f32.vlgmr.msra.gmra.mrb[46].mxu1 %vm37_vm0, %v3960_v15 }
0x1e1c   :  { %v4791_v16 = vpop.f32.mrb[46].mxu1 }
0x1e1d   :  { %v4048_v17 = vadd.f32 %v4791_v16, %v3969_v40  ;;  %v4042_v18 = vpop.f32.mrb[47].mxu1 }
0x1e1e   :  { %v4043_v3 = vadd.f32 %v4042_v18, %v3969_v40 }
0x1e1f   :  { %v4052_v19 = vmax.f32 %v4048_v17, 0.0 }
0x1e20   :  { %v4051_v41 = vmax.f32 %v4043_v3, 0.0 }
0x1e22   :  { %4808 = vmatprep.mubr.msk.f32.mxu0 %vm2009_vm4, %v4051_v41 }
0x1e23   :  { %4809 = vmatmul.mubr.msk.f32.vlgmr.msra.gmra.mrb[30].mxu0 %vm2009_vm4, %v4052_v19 }
0x1ef6   :  { %v4810_v4 = vpop.f32.mrb[30].mxu0 }
0x1ef7   :  { %v4144_v22 = vadd.f32 %v4810_v4, %v4065_v21  ;;  %v4138_v25 = vpop.f32.mrb[31].mxu0 }
0x1ef8   :  { %v4139_v27 = vadd.f32 %v4138_v25, %v4065_v21 }
0x1ef9   :  { %v4148_v58 = vadd.f32 %v4144_v22, %v5614_v23 }
0x1efa   :  { %v4147_v31 = vadd.f32 %v4139_v27, %v5616_v24  ;;  %v4187_v24 = vld [vmem:[%s5721_s6] sm:$0xff]  ;;  %s5043_s6 = smov [#allocation2]  }
0x1efb   :  { %v4152_v59 = vsel %vm37_vm0, %v4148_v58, 0.0  ;;  %v4886_v47 = vpack.c.bf16 %v4188_v36, %v4187_v24  ;;  %s4279_s0 = sshll.u32 %s5043_s6, 4  ;;  %s4280_s0 = int_to_ptr.vmem [resolvable:$true] %s4279_s0 }
0x1efc   :  { %4153 = vadd.xlane.f32.xlu1 %v4152_v59  ;;  %v4149_v32 = vsel %vm37_vm0, %v4147_v31, 0.0  ;;  %s5006_s5 = scalar_lea.vmem %s4280_s0, 256  ;;  %p5011_p1 = scmp.lt.s32.totalorder %s4280_s0, %s4280_s0 }
0x1efd   :  { %4150 = vadd.xlane.f32.xlu0 %v4149_v32  ;;  %4887 = vmatprep.subr.bf16.mxu1 %v4886_v47  ;;  %p5007_p0 = scmp.ne.s32.totalorder %s4280_s0, %s5006_s5  ;;  %p5012_p2 = scmp.lt.s32.totalorder %s5006_s5, %s5006_s5 }
0x1efe   :  { %4889 = vmatpush3.bf16.msra.mxu1 %v4886_v47 }
0x1eff   :  { %4891 = vmatprep.subr.bf16.mxu1 %v4890_v44  ;;  %p5013_p3 = por %p5012_p2, %p5011_p1 }
0x1f01   :  { %p5014_p4 = pnand %p5013_p3, %p5007_p0 }
0x1f02   :  { %4893 = vmatpush3.bf16.msra.mxu1 %v4890_v44 }
0x1f89   :  { %v4154_v20 = vpop.xlane.xlu1 %4153 }
0x1f8a   :  { %v4156_v11 = vmul.f32 0.03125, %v4154_v20  ;;  %v4151_v12 = vpop.xlane.xlu0 %4150 }
0x1f8b   :  { %v4155_v26 = vmul.f32 0.03125, %v4151_v12 }
0x1f8c   :  { %v4158_v33 = vsub.f32 %v4148_v58, %v4156_v11 }
0x1f8d   :  { %v4157_v7 = vsub.f32 %v4147_v31, %v4155_v26 }
0x1f8e   :  { %v4160_v37 = vmul.f32 %v4158_v33, %v4158_v33 }
0x1f8f   :  { %v4159_v34 = vmul.f32 %v4157_v7, %v4157_v7 }
0x1f90   :  { %v4164_v35 = vsel %vm37_vm0, %v4160_v37, 0.0 }
0x1f91   :  { %4165 = vadd.xlane.f32.xlu1 %v4164_v35  ;;  %v4161_v23 = vsel %vm37_vm0, %v4159_v34, 0.0 }
0x1f92   :  { %4162 = vadd.xlane.f32.xlu0 %v4161_v23 }
0x201e   :  { %v4166_v45 = vpop.xlane.xlu1 %4165 }
0x201f   :  { %v4168_v48 = vmul.f32 0.03125, %v4166_v45  ;;  %v4163_v49 = vpop.xlane.xlu0 %4162 }
0x2020   :  { %v4167_v51 = vmul.f32 0.03125, %v4163_v49 }
0x2021   :  { %v4170_v52 = vadd.f32 1e-05, %v4168_v48 }
0x2022   :  { %v4169_v53 = vadd.f32 1e-05, %v4167_v51 }
0x2023   :  { %5002 = vrsqrt.f32 %v4170_v52 }
0x2024   :  { %5004 = vrsqrt.f32 %v4169_v53 }
0x202d   :  { %v5003_v55 = vpop.eup %5002 }
0x202e   :  { %v5005_v57 = vpop.eup %5004  ;;  %v4174_v42 = vmul.f32 %v5003_v55, %v4158_v33 }
0x202f   :  { %v4173_v61 = vmul.f32 %v5005_v57, %v4157_v7 }
0x2030   :  { %v4180_v62 = vmul.f32 %v4178_v54, %v4174_v42 }
0x2031   :  { %v4179_v56 = vmul.f32 %v4178_v54, %v4173_v61 }
0x2032   :  { %v4186_v2 = vadd.f32 %v4184_v50, %v4180_v62 }
0x2033   :  { %v4185_v63 = vadd.f32 %v4184_v50, %v4179_v56 }
0x2035   :  { %4819 = vmatprep.mubr.msk.f32.mxu1 %vm37_vm0, %v4185_v63 }
0x2036   :  { %4820 = vmatmul.mubr.msk.f32.vlgmr.msra.gmra.mrb[48].mxu1 %vm37_vm0, %v4186_v2 }
0x2109   :  { %v4821_v5 = vpop.f32.mrb[48].mxu1 }
0x210a   :  { %4273 = vst [vmem:[#allocation2 + $0x8] sm:$0xff] %v4821_v5  ;;  %v4263_v28 = vpop.f32.mrb[49].mxu1 }
0x210b   :  { %4272 = vst [vmem:[#allocation2] sm:$0xff] %v4263_v28 }
0x210c   :  { %5017 = shalt.err (!%p5014_p4)
}
0x210d   :  { %s5018_s8 = scalar_lea.hbm %s5722_s7, 256 }
0x210e   :  { %p5019_p5 = scmp.ne.s32.totalorder %s5722_s7, %s5018_s8  ;;  %p5022_p6 = scmp.lt.u32.totalorder %s5018_s8, %s5722_s7 }
0x2110   :  { %p5024_p7 = pnand %p5022_p6, %p5019_p5 }
0x2112   :  { %5027 = shalt.err (!%p5024_p7)
}
0x2113   :  { %s5044_s13 = smov 128   ;;  %s5045_s3 = smov 8  }
0x2114   :  { %4285 = dma.vmem_to_hbm [thread:$0]  %s4280_s0, 256, %s5722_s7, [#allocation3], %s5044_s13, %s5044_s13, %s5045_s3  }
0x2115   :  { %5028 = dma.done.wait [#allocation3], 256  }
0x2116   :  { %5029 = vsyncadd [#allocation3], 4294967040 }
0x2117   :  { %4289 = vsyncpa [#allocation3], 1 }

</bundles_post_ra>
